<compile_context>
chip_gen: v6e
topology: v6e:2x2x1
jax: 0.10.0
libtpu: 0.0.40
codegen_flags: <defaults>
</compile_context>

<pallas_src>
import functools

import jax
import jax.numpy as jnp
from jax.experimental import pallas as pl
from jax.experimental.pallas import tpu as pltpu

_POST_LINEAR, _POST_TANH = 0, 1
_MB = 1024 * 1024


def _round_up(x, m):
    return (x + m - 1) // m * m


@functools.lru_cache(maxsize=None)
def _vmem_budget_bytes():
    """Working-set budget for one kernel's tiles (double-buffered)."""
    try:
        cap = pltpu.get_tpu_info().vmem_capacity_bytes
    except Exception:
        cap = 64 * _MB                      # conservative (v7x per-TC size)
    return int(max(12 * _MB, min(cap // 4, 32 * _MB)))


def _mm_working_set(tm, tk, c, n_k, out_item):
    buf = tm * tk * 2 + tk * c * 2 + tm * c * out_item + 2 * c * 4
    acc = tm * c * 4 if n_k > 1 else 0
    return 2 * buf + acc                    # inputs/outputs double-buffered


def _select_tiles(M, K, C, P, out_item):
    """Pick (tm, tk, Mp, Kp).  Prefer a single reduction step; otherwise K
    tiles in multiples of 256.  Cap tm so >=2 parallel programs exist when the
    batch/phase axis does not already provide megacore parallelism."""
    budget = _vmem_budget_bytes()
    Kp = _round_up(K, 128)
    M8 = _round_up(max(M, 8), 8)
    if P >= 2 or M8 < 16:
        tm_cap = M8
    else:
        tm_cap = max(8, _round_up(M8 // 2, 8))
    tm_cands = [t for t in (2048, 1024, 512, 256, 128, 64, 32, 16, 8)
                if t <= tm_cap]
    for tm in tm_cands:
        if _mm_working_set(tm, Kp, C, 1, out_item) <= budget:
            return tm, Kp, _round_up(M8, tm), Kp        # single K step
        for tk in (2048, 1024, 512, 256, 128):
            if tk < Kp and Kp % tk == 0 and \
               _mm_working_set(tm, tk, C, Kp // tk, out_item) <= budget:
                return tm, tk, _round_up(M8, tm), Kp
    tm = tm_cands[-1]
    return tm, 128, _round_up(M8, tm), Kp


# ----------------------------------------------------------------------------
# Pallas kernels.
# ----------------------------------------------------------------------------
def _mm_affine_single_kernel(a_ref, b_ref, scale_ref, shift_ref, o_ref, *,
                             post_mode, pre_relu):
    """Single reduction step: no accumulator scratch, direct epilogue+store."""
    a = a_ref[...]
    if pre_relu:
        a = jnp.maximum(a, 0)
    acc = jnp.dot(a, b_ref[...], preferred_element_type=jnp.float32)
    acc = acc * scale_ref[...] + shift_ref[...]
    if post_mode == _POST_TANH:
        acc = jnp.tanh(acc)
    o_ref[...] = acc.astype(o_ref.dtype)


def _mm_affine_multi_kernel(a_ref, b_ref, scale_ref, shift_ref, o_ref, acc_ref,
                            *, post_mode, pre_relu):
    """K-tiled reduction with f32 VMEM accumulator (first step assigns)."""
    k = pl.program_id(2)
    a = a_ref[...]
    if pre_relu:
        a = jnp.maximum(a, 0)
    prod = jnp.dot(a, b_ref[...], preferred_element_type=jnp.float32)

    @pl.when(k == 0)
    def _():
        acc_ref[...] = prod

    @pl.when(k > 0)
    def _():
        acc_ref[...] += prod

    @pl.when(k == pl.num_programs(2) - 1)
    def _():
        acc = acc_ref[...] * scale_ref[...] + shift_ref[...]
        if post_mode == _POST_TANH:
            acc = jnp.tanh(acc)
        o_ref[...] = acc.astype(o_ref.dtype)


def _mm2_scale_kernel(a1_ref, a2_ref, b1_ref, b2_ref, scale_ref, o_ref):
    """Split-K over two inputs (fused skip-concat) with in-kernel ReLU."""
    a1 = jnp.maximum(a1_ref[...], 0)
    a2 = jnp.maximum(a2_ref[...], 0)
    acc = jnp.dot(a1, b1_ref[...], preferred_element_type=jnp.float32)
    acc = acc + jnp.dot(a2, b2_ref[...], preferred_element_type=jnp.float32)
    o_ref[...] = (acc * scale_ref[...]).astype(o_ref.dtype)


# ----------------------------------------------------------------------------
# Kernel wrappers.
# ----------------------------------------------------------------------------
def _batched_matmul_affine(A, B, scale, shift, post_mode, out_dtype,
                           pre_relu=False):
    """out[p] = (act(A[p]) @ B[p]) * scale + shift  (optionally tanh'ed).

    A: (P, M, K)   B: (P, K, C)   scale/shift: (C,)   -> (P, M, C)
    """
    P, M, K = A.shape
    C = B.shape[2]
    out_item = jnp.dtype(out_dtype).itemsize
    tm, tk, Mp, Kp = _select_tiles(M, K, C, P, out_item)
    n_k = Kp // tk

    A = jnp.pad(A.astype(jnp.bfloat16), ((0, 0), (0, Mp - M), (0, Kp - K)))
    B = jnp.pad(B.astype(jnp.bfloat16), ((0, 0), (0, Kp - K), (0, 0)))
    scale = scale.astype(jnp.float32).reshape(1, C)
    shift = shift.astype(jnp.float32).reshape(1, C)

    ws = _mm_working_set(tm, tk, C, n_k, out_item)
    vmem_limit = int(max(ws * 1.5, 16 * _MB))

    if n_k == 1:
        kern = functools.partial(_mm_affine_single_kernel,
                                 post_mode=post_mode, pre_relu=pre_relu)
        out = pl.pallas_call(
            kern,
            out_shape=jax.ShapeDtypeStruct((P, Mp, C), out_dtype),
            grid=(P, Mp // tm),
            in_specs=[
                pl.BlockSpec((None, tm, tk), lambda p, i: (p, i, 0)),
                pl.BlockSpec((None, tk, C), lambda p, i: (p, 0, 0)),
                pl.BlockSpec((1, C), lambda p, i: (0, 0)),
                pl.BlockSpec((1, C), lambda p, i: (0, 0)),
            ],
            out_specs=pl.BlockSpec((None, tm, C), lambda p, i: (p, i, 0)),
            compiler_params=pltpu.CompilerParams(
                dimension_semantics=("parallel", "parallel"),
                vmem_limit_bytes=vmem_limit),
        )(A, B, scale, shift)
    else:
        kern = functools.partial(_mm_affine_multi_kernel,
                                 post_mode=post_mode, pre_relu=pre_relu)
        out = pl.pallas_call(
            kern,
            out_shape=jax.ShapeDtypeStruct((P, Mp, C), out_dtype),
            grid=(P, Mp // tm, n_k),
            in_specs=[
                pl.BlockSpec((None, tm, tk), lambda p, i, k: (p, i, k)),
                pl.BlockSpec((None, tk, C), lambda p, i, k: (p, k, 0)),
                pl.BlockSpec((1, C), lambda p, i, k: (0, 0)),
                pl.BlockSpec((1, C), lambda p, i, k: (0, 0)),
            ],
            out_specs=pl.BlockSpec((None, tm, C), lambda p, i, k: (p, i, 0)),
            scratch_shapes=[pltpu.VMEM((tm, C), jnp.float32)],
            compiler_params=pltpu.CompilerParams(
                dimension_semantics=("parallel", "parallel", "arbitrary"),
                vmem_limit_bytes=vmem_limit),
        )(A, B, scale, shift)
    if Mp != M:
        out = out[:, :M, :]
    return out


def _matmul2_scale(A1, A2, B, scale, out_dtype):
    """(relu(A1) @ B[:K1] + relu(A2) @ B[K1:]) * scale.

    Returns None if the full reduction does not fit the VMEM budget
    (caller falls back to the K-tiled single-A path)."""
    M, K1 = A1.shape
    K2 = A2.shape[1]
    C = B.shape[1]
    out_item = jnp.dtype(out_dtype).itemsize
    M8 = _round_up(max(M, 8), 8)

    def ws(tm):
        return 2 * (tm * (K1 + K2) * 2 + (K1 + K2) * C * 2
                    + tm * C * out_item + C * 4)

    tm_cap = M8 if M8 < 16 else max(8, _round_up(M8 // 2, 8))
    tm = None
    for cand in (2048, 1024, 512, 256, 128, 64, 32, 16, 8):
        if cand <= tm_cap and ws(cand) <= _vmem_budget_bytes():
            tm = cand
            break
    if tm is None:
        return None
    Mp = _round_up(M8, tm)
    A1 = jnp.pad(A1.astype(jnp.bfloat16), ((0, Mp - M), (0, 0)))
    A2 = jnp.pad(A2.astype(jnp.bfloat16), ((0, Mp - M), (0, 0)))
    Bb = B.astype(jnp.bfloat16)
    B1, B2 = Bb[:K1], Bb[K1:]
    scale = scale.astype(jnp.float32).reshape(1, C)
    vmem_limit = int(max(ws(tm) * 1.5, 16 * _MB))

    out = pl.pallas_call(
        _mm2_scale_kernel,
        out_shape=jax.ShapeDtypeStruct((Mp, C), out_dtype),
        grid=(Mp // tm,),
        in_specs=[
            pl.BlockSpec((tm, K1), lambda i: (i, 0)),
            pl.BlockSpec((tm, K2), lambda i: (i, 0)),
            pl.BlockSpec((K1, C), lambda i: (0, 0)),
            pl.BlockSpec((K2, C), lambda i: (0, 0)),
            pl.BlockSpec((1, C), lambda i: (0, 0)),
        ],
        out_specs=pl.BlockSpec((tm, C), lambda i: (i, 0)),
        compiler_params=pltpu.CompilerParams(
            dimension_semantics=("parallel",),
            vmem_limit_bytes=vmem_limit),
    )(A1, A2, B1, B2, scale)
    return out[:M] if Mp != M else out


def _affine_params(bn, bias, c):
    """Fold conv bias and (eval-mode) BatchNorm into one scale/shift pair."""
    if bn is not None:
        gamma, beta, mean, var = bn
        scale = gamma / jnp.sqrt(var + 1e-5)
        shift = beta - mean * scale
    else:
        scale = jnp.ones((c,), jnp.float32)
        shift = jnp.zeros((c,), jnp.float32)
    if bias is not None:
        shift = shift + scale * bias
    return scale, shift


# ----------------------------------------------------------------------------
# Conv2d(k=4, s=2, p=1): LeakyReLU applied once in f32, im2col (bf16) in XLA,
# tiled Pallas matmul with folded BN epilogue and exact-channel output.
# ----------------------------------------------------------------------------
def conv_down(x, w, pre_leaky, bn, out_dtype):
    # TODO(synk): fuse the im2col tap gather into the kernel (halo DMA) to
    #             avoid the 4x A materialization on the large outer layers.
    N, H, W, Cin = x.shape
    Cout = w.shape[0]                      # torch Conv2d weight: (Cout, Cin, 4, 4)
    Ho, Wo = H // 2, W // 2
    if pre_leaky:
        xf = x.astype(jnp.float32)
        x = jnp.where(xf >= 0, xf, 0.2 * xf)    # slope applied in f32
    x = x.astype(jnp.bfloat16)
    xp = jnp.pad(x, ((0, 0), (1, 1), (1, 1), (0, 0)))
    taps = [xp[:, kh:kh + 2 * Ho:2, kw:kw + 2 * Wo:2, :]
            for kh in range(4) for kw in range(4)]
    if Cin <= 4:
        # channel-major K order: 16-long contiguous tap runs per channel
        # (lane-friendlier im2col for the tiny-Cin RGB input layer).
        A = jnp.stack(taps, axis=4).reshape(1, N * Ho * Wo, Cin * 16)
        B = jnp.transpose(w, (1, 2, 3, 0)).reshape(1, Cin * 16, Cout)
    else:
        A = jnp.stack(taps, axis=3).reshape(1, N * Ho * Wo, 16 * Cin)
        B = jnp.transpose(w, (2, 3, 1, 0)).reshape(1, 16 * Cin, Cout)
    scale, shift = _affine_params(bn, None, Cout)   # downconvs have bias=False
    out = _batched_matmul_affine(A, B, scale, shift, _POST_LINEAR, out_dtype)
    return out.reshape(N, Ho, Wo, Cout)


# ----------------------------------------------------------------------------
# ConvTranspose2d(k=4, s=2, p=1): Pallas matmul (in-kernel ReLU, BN scale
# folded) producing per-pixel tap contributions Z, then an XLA col2im
# overlap-add that applies the shift / tanh and writes the interleaved output.
# ----------------------------------------------------------------------------
def conv_up(parts, w, bias, bn, post_mode, out_dtype):
    N, H, W, _ = parts[0].shape
    Cin = w.shape[0]                       # torch ConvT weight: (Cin, Cout, 4, 4)
    Cout = w.shape[1]
    C16 = 16 * Cout
    M = N * H * W
    assert sum(t.shape[-1] for t in parts) == Cin

    scale, shift = _affine_params(bn, bias, Cout)
    col_scale = jnp.tile(scale, 16)                    # per-(kh,kw,co) column
    Bw = jnp.transpose(w, (0, 2, 3, 1)).reshape(Cin, C16)   # cols = (kh, kw, co)

    xs = [t.astype(jnp.bfloat16) for t in parts]       # ReLU happens in-kernel
    Z = None
    if len(xs) == 2:                                   # fused skip-concat (split-K)
        Z = _matmul2_scale(xs[0].reshape(M, -1), xs[1].reshape(M, -1),
                           Bw, col_scale, jnp.bfloat16)
    if Z is None:
        A = xs[0].reshape(M, -1) if len(xs) == 1 else jnp.concatenate(
            [t.reshape(M, -1) for t in xs], axis=-1)
        Z = _batched_matmul_affine(A[None], Bw[None], col_scale,
                                   jnp.zeros((C16,), jnp.float32),
                                   _POST_LINEAR, jnp.bfloat16, pre_relu=True)[0]

    # col2im: output pixel (2h+p, 2w+q) sums the 4 taps (kh,kw)=(3-p-2dh,3-q-2dw)
    # taken from input pixel (h+p+dh-1, w+q+dw-1); the interleave is written
    # directly via the (p, q) stacking below (no post transpose).
    Z = Z.reshape(N, H, W, 4, 4, Cout)
    Zp = jnp.pad(Z, ((0, 0), (1, 1), (1, 1), (0, 0), (0, 0), (0, 0)))
    shift = shift.astype(jnp.float32)
    p_rows = []
    for p in (0, 1):
        q_cols = []
        for q in (0, 1):
            acc = None
            for dh in (0, 1):
                for dw in (0, 1):
                    kh, kw = 3 - p - 2 * dh, 3 - q - 2 * dw
                    tap = Zp[:, p + dh:p + dh + H, q + dw:q + dw + W, kh, kw, :]
                    tap = tap.astype(jnp.float32)
                    acc = tap if acc is None else acc + tap
            acc = acc + shift
            if post_mode == _POST_TANH:
                acc = jnp.tanh(acc)
            q_cols.append(acc.astype(out_dtype))
        p_rows.append(jnp.stack(q_cols, axis=3))       # (N, H, W, 2, Cout)
    y = jnp.stack(p_rows, axis=2)                      # (N, H, 2, W, 2, Cout)
    return y.reshape(N, 2 * H, 2 * W, Cout)


# ----------------------------------------------------------------------------
# Deterministic parameter construction mirroring UnetSkipConnectionBlock.
# norm_layer = BatchNorm2d  =>  use_bias = False everywhere except the
# outermost ConvTranspose2d (default bias=True).
# ----------------------------------------------------------------------------
def _init_bn(key, c):
    k1, k2, k3, k4 = jax.random.split(key, 4)
    gamma = 1.0 + 0.1 * jax.random.normal(k1, (c,), jnp.float32)
    beta = 0.1 * jax.random.normal(k2, (c,), jnp.float32)
    mean = 0.1 * jax.random.normal(k3, (c,), jnp.float32)
    var = 1.0 + 0.1 * jnp.abs(jax.random.normal(k4, (c,), jnp.float32))
    return (gamma, beta, mean, var)


def make_block(key, outer_nc, inner_nc, in_channel_num=None, submodule=None,
               outermost=False, innermost=False):
    if in_channel_num is None:
        in_channel_num = outer_nc
    ks = jax.random.split(key, 6)
    params = {
        "down_w": 0.05 * jax.random.normal(
            ks[0], (inner_nc, in_channel_num, 4, 4), jnp.float32),
    }
    if outermost:
        up_in = inner_nc * 2
        params["up_w"] = 0.05 * jax.random.normal(
            ks[1], (up_in, outer_nc, 4, 4), jnp.float32)
        params["up_b"] = 0.05 * jax.random.normal(ks[2], (outer_nc,), jnp.float32)
        params["down_bn"] = None
        params["up_bn"] = None
    elif innermost:
        up_in = inner_nc
        params["up_w"] = 0.05 * jax.random.normal(
            ks[1], (up_in, outer_nc, 4, 4), jnp.float32)
        params["up_b"] = None
        params["down_bn"] = None
        params["up_bn"] = _init_bn(ks[3], outer_nc)
    else:
        up_in = inner_nc * 2
        params["up_w"] = 0.05 * jax.random.normal(
            ks[1], (up_in, outer_nc, 4, 4), jnp.float32)
        params["up_b"] = None
        params["down_bn"] = _init_bn(ks[4], inner_nc)
        params["up_bn"] = _init_bn(ks[3], outer_nc)
    return {"params": params, "outermost": outermost, "innermost": innermost,
            "submodule": submodule}


def block_forward(block, x):
    p = block["params"]
    if block["outermost"]:
        y = conv_down(x, p["down_w"], pre_leaky=False, bn=None,
                      out_dtype=jnp.bfloat16)
        parts = block_forward(block["submodule"], y)
        return conv_up(parts, p["up_w"], p["up_b"], bn=None,
                       post_mode=_POST_TANH, out_dtype=jnp.float32)

    y = conv_down(x, p["down_w"], pre_leaky=True, bn=p["down_bn"],
                  out_dtype=jnp.bfloat16)
    if block["submodule"] is not None:
        parts = block_forward(block["submodule"], y)
    else:
        parts = [y]                                    # innermost
    up = conv_up(parts, p["up_w"], p["up_b"], bn=p["up_bn"],
                 post_mode=_POST_LINEAR, out_dtype=jnp.bfloat16)
    # Dropout(0.5) in eval mode is identity.  The skip-connection concat is
    # kept implicit (list of parts) and fused into the consumer's matmul.
    return [x, up]


def make_unet_generator(key, in_channel_num, out_channel_num, num_downs,
                        channel_base_num=64):
    keys = jax.random.split(key, num_downs + 1)
    kidx = 0
    blk = make_block(keys[kidx], channel_base_num * 8, channel_base_num * 8,
                     innermost=True)
    kidx += 1
    for _ in range(num_downs - 5):
        blk = make_block(keys[kidx], channel_base_num * 8, channel_base_num * 8,
                         submodule=blk)
        kidx += 1
    blk = make_block(keys[kidx], channel_base_num * 4, channel_base_num * 8,
                     submodule=blk); kidx += 1
    blk = make_block(keys[kidx], channel_base_num * 2, channel_base_num * 4,
                     submodule=blk); kidx += 1
    blk = make_block(keys[kidx], channel_base_num, channel_base_num * 2,
                     submodule=blk); kidx += 1
    blk = make_block(keys[kidx], out_channel_num, channel_base_num,
                     in_channel_num=in_channel_num, submodule=blk,
                     outermost=True)
    return blk


def unet_forward(blk, x_nchw):
    x = jnp.transpose(x_nchw, (0, 2, 3, 1))        # NCHW -> NHWC
    y = block_forward(blk, x)
    return jnp.transpose(y, (0, 3, 1, 2))          # NHWC -> NCHW


if __name__ == "__main__":
    key = jax.random.PRNGKey(0)
    k_param, k_data = jax.random.split(key)

    # Small config: num_downs=5 requires spatial size >= 2**5 = 32.
    in_ch, out_ch, num_downs, base = 3, 3, 5, 8
    N, H, W = 2, 32, 32

    unet = make_unet_generator(k_param, in_ch, out_ch, num_downs,
                               channel_base_num=base)
    x = jax.random.normal(k_data, (N, in_ch, H, W), jnp.float32)

    fwd = jax.jit(functools.partial(unet_forward, unet))
    y = jax.block_until_ready(fwd(x))
    assert y.shape == (N, out_ch, H, W), y.shape
    assert bool(jnp.all(jnp.isfinite(y)))
    print("KERNEL_OK")
</pallas_src>

<mosaic_0001>
module attributes {stable_mosaic.version = 11 : i64} {
  func.func @_mm_affine_single_kernel(%arg0: i32, %arg1: i32, %arg2: memref<1x256x128xbf16, #tpu.memory_space<vmem>>, %arg3: memref<1x128x8xbf16, #tpu.memory_space<vmem>>, %arg4: memref<1x8xf32, #tpu.memory_space<vmem>>, %arg5: memref<1x8xf32, #tpu.memory_space<vmem>>, %arg6: memref<1x256x8xbf16, #tpu.memory_space<vmem>>) attributes {dimension_semantics = [#tpu.dimension_semantics<parallel>, #tpu.dimension_semantics<parallel>], iteration_bounds = array<i64: 1, 2>, scalar_prefetch = 0 : i64, scratch_operands = 0 : i64, tpu.core_type = #tpu.core_type<tc>, window_params = [{transform_indices = @transform_0, window_bounds = array<i64: 1, 256, 128>}, {transform_indices = @transform_1, window_bounds = array<i64: 1, 128, 8>}, {pipeline_mode = #tpu.pipeline_mode<synchronous>, transform_indices = @transform_2, window_bounds = array<i64: 1, 8>}, {pipeline_mode = #tpu.pipeline_mode<synchronous>, transform_indices = @transform_3, window_bounds = array<i64: 1, 8>}, {transform_indices = @transform_4, window_bounds = array<i64: 1, 256, 8>}]} {
    %c0 = arith.constant 0 : index
    %c0_0 = arith.constant 0 : index
    %c0_1 = arith.constant 0 : index
    %0 = vector.load %arg2[%c0, %c0_0, %c0_1] : memref<1x256x128xbf16, #tpu.memory_space<vmem>>, vector<1x256x128xbf16>
    %1 = vector.shape_cast %0 : vector<1x256x128xbf16> to vector<256x128xbf16>
    %c0_2 = arith.constant 0 : index
    %c0_3 = arith.constant 0 : index
    %c0_4 = arith.constant 0 : index
    %2 = vector.load %arg3[%c0_2, %c0_3, %c0_4] : memref<1x128x8xbf16, #tpu.memory_space<vmem>>, vector<1x128x8xbf16>
    %3 = vector.shape_cast %2 : vector<1x128x8xbf16> to vector<128x8xbf16>
    %cst = arith.constant dense<0.000000e+00> : vector<256x8xf32>
    %4 = tpu.matmul %1, %3, %cst {dimension_numbers = #tpu.dot_dimension_numbers<[1], [0], [0], [1], [0, 0, 1, 1], [], []>} : vector<256x128xbf16>, vector<128x8xbf16>, vector<256x8xf32> -> vector<256x8xf32>
    %c0_5 = arith.constant 0 : index
    %c0_6 = arith.constant 0 : index
    %5 = vector.load %arg4[%c0_5, %c0_6] : memref<1x8xf32, #tpu.memory_space<vmem>>, vector<1x8xf32>
    %6 = vector.broadcast %5 : vector<1x8xf32> to vector<256x8xf32>
    %7 = arith.mulf %4, %6 : vector<256x8xf32>
    %c0_7 = arith.constant 0 : index
    %c0_8 = arith.constant 0 : index
    %8 = vector.load %arg5[%c0_7, %c0_8] : memref<1x8xf32, #tpu.memory_space<vmem>>, vector<1x8xf32>
    %9 = vector.broadcast %8 : vector<1x8xf32> to vector<256x8xf32>
    %10 = arith.addf %7, %9 : vector<256x8xf32>
    %11 = arith.truncf %10 : vector<256x8xf32> to vector<256x8xbf16>
    %c0_9 = arith.constant 0 : index
    %c0_10 = arith.constant 0 : index
    %c0_11 = arith.constant 0 : index
    %12 = vector.load %arg6[%c0_9, %c0_10, %c0_11] : memref<1x256x8xbf16, #tpu.memory_space<vmem>>, vector<1x256x8xbf16>
    %13 = vector.shape_cast %12 : vector<1x256x8xbf16> to vector<256x8xbf16>
    %14 = vector.shape_cast %11 : vector<256x8xbf16> to vector<1x256x8xbf16>
    tpu.vector_store %arg6[%c0_9, %c0_10, %c0_11], %14 {strides = array<i32>} : memref<1x256x8xbf16, #tpu.memory_space<vmem>>, vector<1x256x8xbf16>,
    return
  }
  func.func @transform_0(%arg0: i32, %arg1: i32) -> (i32, i32, i32) {
    %c0_i32 = arith.constant 0 : i32
    %c0_i32_0 = arith.constant 0 : i32
    return %arg0, %arg1, %c0_i32 : i32, i32, i32
  }
  func.func @transform_1(%arg0: i32, %arg1: i32) -> (i32, i32, i32) {
    %c0_i32 = arith.constant 0 : i32
    %c0_i32_0 = arith.constant 0 : i32
    %c0_i32_1 = arith.constant 0 : i32
    return %arg0, %c0_i32, %c0_i32_0 : i32, i32, i32
  }
  func.func @transform_2(%arg0: i32, %arg1: i32) -> (i32, i32) {
    %c0_i32 = arith.constant 0 : i32
    %c0_i32_0 = arith.constant 0 : i32
    %c0_i32_1 = arith.constant 0 : i32
    return %c0_i32, %c0_i32_0 : i32, i32
  }
  func.func @transform_3(%arg0: i32, %arg1: i32) -> (i32, i32) {
    %c0_i32 = arith.constant 0 : i32
    %c0_i32_0 = arith.constant 0 : i32
    %c0_i32_1 = arith.constant 0 : i32
    return %c0_i32, %c0_i32_0 : i32, i32
  }
  func.func @transform_4(%arg0: i32, %arg1: i32) -> (i32, i32, i32) {
    %c0_i32 = arith.constant 0 : i32
    %c0_i32_0 = arith.constant 0 : i32
    return %arg0, %arg1, %c0_i32 : i32, i32, i32
  }
}

module attributes {stable_mosaic.version = 11 : i64} {
  func.func @_mm_affine_single_kernel(%arg0: i32, %arg1: i32, %arg2: memref<1x64x128xbf16, #tpu.memory_space<vmem>>, %arg3: memref<1x128x16xbf16, #tpu.memory_space<vmem>>, %arg4: memref<1x16xf32, #tpu.memory_space<vmem>>, %arg5: memref<1x16xf32, #tpu.memory_space<vmem>>, %arg6: memref<1x64x16xbf16, #tpu.memory_space<vmem>>) attributes {dimension_semantics = [#tpu.dimension_semantics<parallel>, #tpu.dimension_semantics<parallel>], iteration_bounds = array<i64: 1, 2>, scalar_prefetch = 0 : i64, scratch_operands = 0 : i64, tpu.core_type = #tpu.core_type<tc>, window_params = [{transform_indices = @transform_0, window_bounds = array<i64: 1, 64, 128>}, {transform_indices = @transform_1, window_bounds = array<i64: 1, 128, 16>}, {pipeline_mode = #tpu.pipeline_mode<synchronous>, transform_indices = @transform_2, window_bounds = array<i64: 1, 16>}, {pipeline_mode = #tpu.pipeline_mode<synchronous>, transform_indices = @transform_3, window_bounds = array<i64: 1, 16>}, {transform_indices = @transform_4, window_bounds = array<i64: 1, 64, 16>}]} {
    %c0 = arith.constant 0 : index
    %c0_0 = arith.constant 0 : index
    %c0_1 = arith.constant 0 : index
    %0 = vector.load %arg2[%c0, %c0_0, %c0_1] : memref<1x64x128xbf16, #tpu.memory_space<vmem>>, vector<1x64x128xbf16>
    %1 = vector.shape_cast %0 : vector<1x64x128xbf16> to vector<64x128xbf16>
    %c0_2 = arith.constant 0 : index
    %c0_3 = arith.constant 0 : index
    %c0_4 = arith.constant 0 : index
    %2 = vector.load %arg3[%c0_2, %c0_3, %c0_4] : memref<1x128x16xbf16, #tpu.memory_space<vmem>>, vector<1x128x16xbf16>
    %3 = vector.shape_cast %2 : vector<1x128x16xbf16> to vector<128x16xbf16>
    %cst = arith.constant dense<0.000000e+00> : vector<64x16xf32>
    %4 = tpu.matmul %1, %3, %cst {dimension_numbers = #tpu.dot_dimension_numbers<[1], [0], [0], [1], [0, 0, 1, 1], [], []>} : vector<64x128xbf16>, vector<128x16xbf16>, vector<64x16xf32> -> vector<64x16xf32>
    %c0_5 = arith.constant 0 : index
    %c0_6 = arith.constant 0 : index
    %5 = vector.load %arg4[%c0_5, %c0_6] : memref<1x16xf32, #tpu.memory_space<vmem>>, vector<1x16xf32>
    %6 = vector.broadcast %5 : vector<1x16xf32> to vector<64x16xf32>
    %7 = arith.mulf %4, %6 : vector<64x16xf32>
    %c0_7 = arith.constant 0 : index
    %c0_8 = arith.constant 0 : index
    %8 = vector.load %arg5[%c0_7, %c0_8] : memref<1x16xf32, #tpu.memory_space<vmem>>, vector<1x16xf32>
    %9 = vector.broadcast %8 : vector<1x16xf32> to vector<64x16xf32>
    %10 = arith.addf %7, %9 : vector<64x16xf32>
    %11 = arith.truncf %10 : vector<64x16xf32> to vector<64x16xbf16>
    %c0_9 = arith.constant 0 : index
    %c0_10 = arith.constant 0 : index
    %c0_11 = arith.constant 0 : index
    %12 = vector.load %arg6[%c0_9, %c0_10, %c0_11] : memref<1x64x16xbf16, #tpu.memory_space<vmem>>, vector<1x64x16xbf16>
    %13 = vector.shape_cast %12 : vector<1x64x16xbf16> to vector<64x16xbf16>
    %14 = vector.shape_cast %11 : vector<64x16xbf16> to vector<1x64x16xbf16>
    tpu.vector_store %arg6[%c0_9, %c0_10, %c0_11], %14 {strides = array<i32>} : memref<1x64x16xbf16, #tpu.memory_space<vmem>>, vector<1x64x16xbf16>,
    return
  }
  func.func @transform_0(%arg0: i32, %arg1: i32) -> (i32, i32, i32) {
    %c0_i32 = arith.constant 0 : i32
    %c0_i32_0 = arith.constant 0 : i32
    return %arg0, %arg1, %c0_i32 : i32, i32, i32
  }
  func.func @transform_1(%arg0: i32, %arg1: i32) -> (i32, i32, i32) {
    %c0_i32 = arith.constant 0 : i32
    %c0_i32_0 = arith.constant 0 : i32
    %c0_i32_1 = arith.constant 0 : i32
    return %arg0, %c0_i32, %c0_i32_0 : i32, i32, i32
  }
  func.func @transform_2(%arg0: i32, %arg1: i32) -> (i32, i32) {
    %c0_i32 = arith.constant 0 : i32
    %c0_i32_0 = arith.constant 0 : i32
    %c0_i32_1 = arith.constant 0 : i32
    return %c0_i32, %c0_i32_0 : i32, i32
  }
  func.func @transform_3(%arg0: i32, %arg1: i32) -> (i32, i32) {
    %c0_i32 = arith.constant 0 : i32
    %c0_i32_0 = arith.constant 0 : i32
    %c0_i32_1 = arith.constant 0 : i32
    return %c0_i32, %c0_i32_0 : i32, i32
  }
  func.func @transform_4(%arg0: i32, %arg1: i32) -> (i32, i32, i32) {
    %c0_i32 = arith.constant 0 : i32
    %c0_i32_0 = arith.constant 0 : i32
    return %arg0, %arg1, %c0_i32 : i32, i32, i32
  }
}

module attributes {stable_mosaic.version = 11 : i64} {
  func.func @_mm_affine_single_kernel(%arg0: i32, %arg1: i32, %arg2: memref<1x16x256xbf16, #tpu.memory_space<vmem>>, %arg3: memref<1x256x32xbf16, #tpu.memory_space<vmem>>, %arg4: memref<1x32xf32, #tpu.memory_space<vmem>>, %arg5: memref<1x32xf32, #tpu.memory_space<vmem>>, %arg6: memref<1x16x32xbf16, #tpu.memory_space<vmem>>) attributes {dimension_semantics = [#tpu.dimension_semantics<parallel>, #tpu.dimension_semantics<parallel>], iteration_bounds = array<i64: 1, 2>, scalar_prefetch = 0 : i64, scratch_operands = 0 : i64, tpu.core_type = #tpu.core_type<tc>, window_params = [{transform_indices = @transform_0, window_bounds = array<i64: 1, 16, 256>}, {transform_indices = @transform_1, window_bounds = array<i64: 1, 256, 32>}, {pipeline_mode = #tpu.pipeline_mode<synchronous>, transform_indices = @transform_2, window_bounds = array<i64: 1, 32>}, {pipeline_mode = #tpu.pipeline_mode<synchronous>, transform_indices = @transform_3, window_bounds = array<i64: 1, 32>}, {transform_indices = @transform_4, window_bounds = array<i64: 1, 16, 32>}]} {
    %c0 = arith.constant 0 : index
    %c0_0 = arith.constant 0 : index
    %c0_1 = arith.constant 0 : index
    %0 = vector.load %arg2[%c0, %c0_0, %c0_1] : memref<1x16x256xbf16, #tpu.memory_space<vmem>>, vector<1x16x256xbf16>
    %1 = vector.shape_cast %0 : vector<1x16x256xbf16> to vector<16x256xbf16>
    %c0_2 = arith.constant 0 : index
    %c0_3 = arith.constant 0 : index
    %c0_4 = arith.constant 0 : index
    %2 = vector.load %arg3[%c0_2, %c0_3, %c0_4] : memref<1x256x32xbf16, #tpu.memory_space<vmem>>, vector<1x256x32xbf16>
    %3 = vector.shape_cast %2 : vector<1x256x32xbf16> to vector<256x32xbf16>
    %cst = arith.constant dense<0.000000e+00> : vector<16x32xf32>
    %4 = tpu.matmul %1, %3, %cst {dimension_numbers = #tpu.dot_dimension_numbers<[1], [0], [0], [1], [0, 0, 1, 1], [], []>} : vector<16x256xbf16>, vector<256x32xbf16>, vector<16x32xf32> -> vector<16x32xf32>
    %c0_5 = arith.constant 0 : index
    %c0_6 = arith.constant 0 : index
    %5 = vector.load %arg4[%c0_5, %c0_6] : memref<1x32xf32, #tpu.memory_space<vmem>>, vector<1x32xf32>
    %6 = vector.broadcast %5 : vector<1x32xf32> to vector<16x32xf32>
    %7 = arith.mulf %4, %6 : vector<16x32xf32>
    %c0_7 = arith.constant 0 : index
    %c0_8 = arith.constant 0 : index
    %8 = vector.load %arg5[%c0_7, %c0_8] : memref<1x32xf32, #tpu.memory_space<vmem>>, vector<1x32xf32>
    %9 = vector.broadcast %8 : vector<1x32xf32> to vector<16x32xf32>
    %10 = arith.addf %7, %9 : vector<16x32xf32>
    %11 = arith.truncf %10 : vector<16x32xf32> to vector<16x32xbf16>
    %c0_9 = arith.constant 0 : index
    %c0_10 = arith.constant 0 : index
    %c0_11 = arith.constant 0 : index
    %12 = vector.load %arg6[%c0_9, %c0_10, %c0_11] : memref<1x16x32xbf16, #tpu.memory_space<vmem>>, vector<1x16x32xbf16>
    %13 = vector.shape_cast %12 : vector<1x16x32xbf16> to vector<16x32xbf16>
    %14 = vector.shape_cast %11 : vector<16x32xbf16> to vector<1x16x32xbf16>
    tpu.vector_store %arg6[%c0_9, %c0_10, %c0_11], %14 {strides = array<i32>} : memref<1x16x32xbf16, #tpu.memory_space<vmem>>, vector<1x16x32xbf16>,
    return
  }
  func.func @transform_0(%arg0: i32, %arg1: i32) -> (i32, i32, i32) {
    %c0_i32 = arith.constant 0 : i32
    %c0_i32_0 = arith.constant 0 : i32
    return %arg0, %arg1, %c0_i32 : i32, i32, i32
  }
  func.func @transform_1(%arg0: i32, %arg1: i32) -> (i32, i32, i32) {
    %c0_i32 = arith.constant 0 : i32
    %c0_i32_0 = arith.constant 0 : i32
    %c0_i32_1 = arith.constant 0 : i32
    return %arg0, %c0_i32, %c0_i32_0 : i32, i32, i32
  }
  func.func @transform_2(%arg0: i32, %arg1: i32) -> (i32, i32) {
    %c0_i32 = arith.constant 0 : i32
    %c0_i32_0 = arith.constant 0 : i32
    %c0_i32_1 = arith.constant 0 : i32
    return %c0_i32, %c0_i32_0 : i32, i32
  }
  func.func @transform_3(%arg0: i32, %arg1: i32) -> (i32, i32) {
    %c0_i32 = arith.constant 0 : i32
    %c0_i32_0 = arith.constant 0 : i32
    %c0_i32_1 = arith.constant 0 : i32
    return %c0_i32, %c0_i32_0 : i32, i32
  }
  func.func @transform_4(%arg0: i32, %arg1: i32) -> (i32, i32, i32) {
    %c0_i32 = arith.constant 0 : i32
    %c0_i32_0 = arith.constant 0 : i32
    return %arg0, %arg1, %c0_i32 : i32, i32, i32
  }
}

module attributes {stable_mosaic.version = 11 : i64} {
  func.func @_mm_affine_single_kernel(%arg0: i32, %arg1: i32, %arg2: memref<1x8x512xbf16, #tpu.memory_space<vmem>>, %arg3: memref<1x512x64xbf16, #tpu.memory_space<vmem>>, %arg4: memref<1x64xf32, #tpu.memory_space<vmem>>, %arg5: memref<1x64xf32, #tpu.memory_space<vmem>>, %arg6: memref<1x8x64xbf16, #tpu.memory_space<vmem>>) attributes {dimension_semantics = [#tpu.dimension_semantics<parallel>, #tpu.dimension_semantics<parallel>], iteration_bounds = array<i64: 1, 1>, scalar_prefetch = 0 : i64, scratch_operands = 0 : i64, tpu.core_type = #tpu.core_type<tc>, window_params = [{transform_indices = @transform_0, window_bounds = array<i64: 1, 8, 512>}, {transform_indices = @transform_1, window_bounds = array<i64: 1, 512, 64>}, {pipeline_mode = #tpu.pipeline_mode<synchronous>, transform_indices = @transform_2, window_bounds = array<i64: 1, 64>}, {pipeline_mode = #tpu.pipeline_mode<synchronous>, transform_indices = @transform_3, window_bounds = array<i64: 1, 64>}, {transform_indices = @transform_4, window_bounds = array<i64: 1, 8, 64>}]} {
    %c0 = arith.constant 0 : index
    %c0_0 = arith.constant 0 : index
    %c0_1 = arith.constant 0 : index
    %0 = vector.load %arg2[%c0, %c0_0, %c0_1] : memref<1x8x512xbf16, #tpu.memory_space<vmem>>, vector<1x8x512xbf16>
    %1 = vector.shape_cast %0 : vector<1x8x512xbf16> to vector<8x512xbf16>
    %c0_2 = arith.constant 0 : index
    %c0_3 = arith.constant 0 : index
    %c0_4 = arith.constant 0 : index
    %2 = vector.load %arg3[%c0_2, %c0_3, %c0_4] : memref<1x512x64xbf16, #tpu.memory_space<vmem>>, vector<1x512x64xbf16>
    %3 = vector.shape_cast %2 : vector<1x512x64xbf16> to vector<512x64xbf16>
    %cst = arith.constant dense<0.000000e+00> : vector<8x64xf32>
    %4 = tpu.matmul %1, %3, %cst {dimension_numbers = #tpu.dot_dimension_numbers<[1], [0], [0], [1], [0, 0, 1, 1], [], []>} : vector<8x512xbf16>, vector<512x64xbf16>, vector<8x64xf32> -> vector<8x64xf32>
    %c0_5 = arith.constant 0 : index
    %c0_6 = arith.constant 0 : index
    %5 = vector.load %arg4[%c0_5, %c0_6] : memref<1x64xf32, #tpu.memory_space<vmem>>, vector<1x64xf32>
    %6 = vector.broadcast %5 : vector<1x64xf32> to vector<8x64xf32>
    %7 = arith.mulf %4, %6 : vector<8x64xf32>
    %c0_7 = arith.constant 0 : index
    %c0_8 = arith.constant 0 : index
    %8 = vector.load %arg5[%c0_7, %c0_8] : memref<1x64xf32, #tpu.memory_space<vmem>>, vector<1x64xf32>
    %9 = vector.broadcast %8 : vector<1x64xf32> to vector<8x64xf32>
    %10 = arith.addf %7, %9 : vector<8x64xf32>
    %11 = arith.truncf %10 : vector<8x64xf32> to vector<8x64xbf16>
    %c0_9 = arith.constant 0 : index
    %c0_10 = arith.constant 0 : index
    %c0_11 = arith.constant 0 : index
    %12 = vector.load %arg6[%c0_9, %c0_10, %c0_11] : memref<1x8x64xbf16, #tpu.memory_space<vmem>>, vector<1x8x64xbf16>
    %13 = vector.shape_cast %12 : vector<1x8x64xbf16> to vector<8x64xbf16>
    %14 = vector.shape_cast %11 : vector<8x64xbf16> to vector<1x8x64xbf16>
    tpu.vector_store %arg6[%c0_9, %c0_10, %c0_11], %14 {strides = array<i32>} : memref<1x8x64xbf16, #tpu.memory_space<vmem>>, vector<1x8x64xbf16>,
    return
  }
  func.func @transform_0(%arg0: i32, %arg1: i32) -> (i32, i32, i32) {
    %c0_i32 = arith.constant 0 : i32
    %c0_i32_0 = arith.constant 0 : i32
    return %arg0, %arg1, %c0_i32 : i32, i32, i32
  }
  func.func @transform_1(%arg0: i32, %arg1: i32) -> (i32, i32, i32) {
    %c0_i32 = arith.constant 0 : i32
    %c0_i32_0 = arith.constant 0 : i32
    %c0_i32_1 = arith.constant 0 : i32
    return %arg0, %c0_i32, %c0_i32_0 : i32, i32, i32
  }
  func.func @transform_2(%arg0: i32, %arg1: i32) -> (i32, i32) {
    %c0_i32 = arith.constant 0 : i32
    %c0_i32_0 = arith.constant 0 : i32
    %c0_i32_1 = arith.constant 0 : i32
    return %c0_i32, %c0_i32_0 : i32, i32
  }
  func.func @transform_3(%arg0: i32, %arg1: i32) -> (i32, i32) {
    %c0_i32 = arith.constant 0 : i32
    %c0_i32_0 = arith.constant 0 : i32
    %c0_i32_1 = arith.constant 0 : i32
    return %c0_i32, %c0_i32_0 : i32, i32
  }
  func.func @transform_4(%arg0: i32, %arg1: i32) -> (i32, i32, i32) {
    %c0_i32 = arith.constant 0 : i32
    %c0_i32_0 = arith.constant 0 : i32
    return %arg0, %arg1, %c0_i32 : i32, i32, i32
  }
}

module attributes {stable_mosaic.version = 11 : i64} {
  func.func @_mm_affine_single_kernel(%arg0: i32, %arg1: i32, %arg2: memref<1x8x1024xbf16, #tpu.memory_space<vmem>>, %arg3: memref<1x1024x64xbf16, #tpu.memory_space<vmem>>, %arg4: memref<1x64xf32, #tpu.memory_space<vmem>>, %arg5: memref<1x64xf32, #tpu.memory_space<vmem>>, %arg6: memref<1x8x64xbf16, #tpu.memory_space<vmem>>) attributes {dimension_semantics = [#tpu.dimension_semantics<parallel>, #tpu.dimension_semantics<parallel>], iteration_bounds = array<i64: 1, 1>, scalar_prefetch = 0 : i64, scratch_operands = 0 : i64, tpu.core_type = #tpu.core_type<tc>, window_params = [{transform_indices = @transform_0, window_bounds = array<i64: 1, 8, 1024>}, {transform_indices = @transform_1, window_bounds = array<i64: 1, 1024, 64>}, {pipeline_mode = #tpu.pipeline_mode<synchronous>, transform_indices = @transform_2, window_bounds = array<i64: 1, 64>}, {pipeline_mode = #tpu.pipeline_mode<synchronous>, transform_indices = @transform_3, window_bounds = array<i64: 1, 64>}, {transform_indices = @transform_4, window_bounds = array<i64: 1, 8, 64>}]} {
    %c0 = arith.constant 0 : index
    %c0_0 = arith.constant 0 : index
    %c0_1 = arith.constant 0 : index
    %0 = vector.load %arg2[%c0, %c0_0, %c0_1] : memref<1x8x1024xbf16, #tpu.memory_space<vmem>>, vector<1x8x1024xbf16>
    %1 = vector.shape_cast %0 : vector<1x8x1024xbf16> to vector<8x1024xbf16>
    %c0_2 = arith.constant 0 : index
    %c0_3 = arith.constant 0 : index
    %c0_4 = arith.constant 0 : index
    %2 = vector.load %arg3[%c0_2, %c0_3, %c0_4] : memref<1x1024x64xbf16, #tpu.memory_space<vmem>>, vector<1x1024x64xbf16>
    %3 = vector.shape_cast %2 : vector<1x1024x64xbf16> to vector<1024x64xbf16>
    %cst = arith.constant dense<0.000000e+00> : vector<8x64xf32>
    %4 = tpu.matmul %1, %3, %cst {dimension_numbers = #tpu.dot_dimension_numbers<[1], [0], [0], [1], [0, 0, 1, 1], [], []>} : vector<8x1024xbf16>, vector<1024x64xbf16>, vector<8x64xf32> -> vector<8x64xf32>
    %c0_5 = arith.constant 0 : index
    %c0_6 = arith.constant 0 : index
    %5 = vector.load %arg4[%c0_5, %c0_6] : memref<1x64xf32, #tpu.memory_space<vmem>>, vector<1x64xf32>
    %6 = vector.broadcast %5 : vector<1x64xf32> to vector<8x64xf32>
    %7 = arith.mulf %4, %6 : vector<8x64xf32>
    %c0_7 = arith.constant 0 : index
    %c0_8 = arith.constant 0 : index
    %8 = vector.load %arg5[%c0_7, %c0_8] : memref<1x64xf32, #tpu.memory_space<vmem>>, vector<1x64xf32>
    %9 = vector.broadcast %8 : vector<1x64xf32> to vector<8x64xf32>
    %10 = arith.addf %7, %9 : vector<8x64xf32>
    %11 = arith.truncf %10 : vector<8x64xf32> to vector<8x64xbf16>
    %c0_9 = arith.constant 0 : index
    %c0_10 = arith.constant 0 : index
    %c0_11 = arith.constant 0 : index
    %12 = vector.load %arg6[%c0_9, %c0_10, %c0_11] : memref<1x8x64xbf16, #tpu.memory_space<vmem>>, vector<1x8x64xbf16>
    %13 = vector.shape_cast %12 : vector<1x8x64xbf16> to vector<8x64xbf16>
    %14 = vector.shape_cast %11 : vector<8x64xbf16> to vector<1x8x64xbf16>
    tpu.vector_store %arg6[%c0_9, %c0_10, %c0_11], %14 {strides = array<i32>} : memref<1x8x64xbf16, #tpu.memory_space<vmem>>, vector<1x8x64xbf16>,
    return
  }
  func.func @transform_0(%arg0: i32, %arg1: i32) -> (i32, i32, i32) {
    %c0_i32 = arith.constant 0 : i32
    %c0_i32_0 = arith.constant 0 : i32
    return %arg0, %arg1, %c0_i32 : i32, i32, i32
  }
  func.func @transform_1(%arg0: i32, %arg1: i32) -> (i32, i32, i32) {
    %c0_i32 = arith.constant 0 : i32
    %c0_i32_0 = arith.constant 0 : i32
    %c0_i32_1 = arith.constant 0 : i32
    return %arg0, %c0_i32, %c0_i32_0 : i32, i32, i32
  }
  func.func @transform_2(%arg0: i32, %arg1: i32) -> (i32, i32) {
    %c0_i32 = arith.constant 0 : i32
    %c0_i32_0 = arith.constant 0 : i32
    %c0_i32_1 = arith.constant 0 : i32
    return %c0_i32, %c0_i32_0 : i32, i32
  }
  func.func @transform_3(%arg0: i32, %arg1: i32) -> (i32, i32) {
    %c0_i32 = arith.constant 0 : i32
    %c0_i32_0 = arith.constant 0 : i32
    %c0_i32_1 = arith.constant 0 : i32
    return %c0_i32, %c0_i32_0 : i32, i32
  }
  func.func @transform_4(%arg0: i32, %arg1: i32) -> (i32, i32, i32) {
    %c0_i32 = arith.constant 0 : i32
    %c0_i32_0 = arith.constant 0 : i32
    return %arg0, %arg1, %c0_i32 : i32, i32, i32
  }
}

module attributes {stable_mosaic.version = 11 : i64} {
  func.func @_mm_affine_single_kernel(%arg0: i32, %arg1: i32, %arg2: memref<1x8x128xbf16, #tpu.memory_space<vmem>>, %arg3: memref<1x128x1024xbf16, #tpu.memory_space<vmem>>, %arg4: memref<1x1024xf32, #tpu.memory_space<vmem>>, %arg5: memref<1x1024xf32, #tpu.memory_space<vmem>>, %arg6: memref<1x8x1024xbf16, #tpu.memory_space<vmem>>) attributes {dimension_semantics = [#tpu.dimension_semantics<parallel>, #tpu.dimension_semantics<parallel>], iteration_bounds = array<i64: 1, 1>, scalar_prefetch = 0 : i64, scratch_operands = 0 : i64, tpu.core_type = #tpu.core_type<tc>, window_params = [{transform_indices = @transform_0, window_bounds = array<i64: 1, 8, 128>}, {transform_indices = @transform_1, window_bounds = array<i64: 1, 128, 1024>}, {pipeline_mode = #tpu.pipeline_mode<synchronous>, transform_indices = @transform_2, window_bounds = array<i64: 1, 1024>}, {pipeline_mode = #tpu.pipeline_mode<synchronous>, transform_indices = @transform_3, window_bounds = array<i64: 1, 1024>}, {transform_indices = @transform_4, window_bounds = array<i64: 1, 8, 1024>}]} {
    %c0 = arith.constant 0 : index
    %c0_0 = arith.constant 0 : index
    %c0_1 = arith.constant 0 : index
    %0 = vector.load %arg2[%c0, %c0_0, %c0_1] : memref<1x8x128xbf16, #tpu.memory_space<vmem>>, vector<1x8x128xbf16>
    %1 = vector.shape_cast %0 : vector<1x8x128xbf16> to vector<8x128xbf16>
    %cst = arith.constant 0.000000e+00 : bf16
    %2 = vector.broadcast %cst : bf16 to vector<8x128xbf16>
    %3 = arith.maximumf %1, %2 : vector<8x128xbf16>
    %c0_2 = arith.constant 0 : index
    %c0_3 = arith.constant 0 : index
    %c0_4 = arith.constant 0 : index
    %4 = vector.load %arg3[%c0_2, %c0_3, %c0_4] : memref<1x128x1024xbf16, #tpu.memory_space<vmem>>, vector<1x128x1024xbf16>
    %5 = vector.shape_cast %4 : vector<1x128x1024xbf16> to vector<128x1024xbf16>
    %cst_5 = arith.constant dense<0.000000e+00> : vector<8x1024xf32>
    %6 = tpu.matmul %3, %5, %cst_5 {dimension_numbers = #tpu.dot_dimension_numbers<[1], [0], [0], [1], [0, 0, 1, 1], [], []>} : vector<8x128xbf16>, vector<128x1024xbf16>, vector<8x1024xf32> -> vector<8x1024xf32>
    %c0_6 = arith.constant 0 : index
    %c0_7 = arith.constant 0 : index
    %7 = vector.load %arg4[%c0_6, %c0_7] : memref<1x1024xf32, #tpu.memory_space<vmem>>, vector<1x1024xf32>
    %8 = vector.broadcast %7 : vector<1x1024xf32> to vector<8x1024xf32>
    %9 = arith.mulf %6, %8 : vector<8x1024xf32>
    %c0_8 = arith.constant 0 : index
    %c0_9 = arith.constant 0 : index
    %10 = vector.load %arg5[%c0_8, %c0_9] : memref<1x1024xf32, #tpu.memory_space<vmem>>, vector<1x1024xf32>
    %11 = vector.broadcast %10 : vector<1x1024xf32> to vector<8x1024xf32>
    %12 = arith.addf %9, %11 : vector<8x1024xf32>
    %13 = arith.truncf %12 : vector<8x1024xf32> to vector<8x1024xbf16>
    %c0_10 = arith.constant 0 : index
    %c0_11 = arith.constant 0 : index
    %c0_12 = arith.constant 0 : index
    %14 = vector.load %arg6[%c0_10, %c0_11, %c0_12] : memref<1x8x1024xbf16, #tpu.memory_space<vmem>>, vector<1x8x1024xbf16>
    %15 = vector.shape_cast %14 : vector<1x8x1024xbf16> to vector<8x1024xbf16>
    %16 = vector.shape_cast %13 : vector<8x1024xbf16> to vector<1x8x1024xbf16>
    tpu.vector_store %arg6[%c0_10, %c0_11, %c0_12], %16 {strides = array<i32>} : memref<1x8x1024xbf16, #tpu.memory_space<vmem>>, vector<1x8x1024xbf16>,
    return
  }
  func.func @transform_0(%arg0: i32, %arg1: i32) -> (i32, i32, i32) {
    %c0_i32 = arith.constant 0 : i32
    %c0_i32_0 = arith.constant 0 : i32
    return %arg0, %arg1, %c0_i32 : i32, i32, i32
  }
  func.func @transform_1(%arg0: i32, %arg1: i32) -> (i32, i32, i32) {
    %c0_i32 = arith.constant 0 : i32
    %c0_i32_0 = arith.constant 0 : i32
    %c0_i32_1 = arith.constant 0 : i32
    return %arg0, %c0_i32, %c0_i32_0 : i32, i32, i32
  }
  func.func @transform_2(%arg0: i32, %arg1: i32) -> (i32, i32) {
    %c0_i32 = arith.constant 0 : i32
    %c0_i32_0 = arith.constant 0 : i32
    %c0_i32_1 = arith.constant 0 : i32
    return %c0_i32, %c0_i32_0 : i32, i32
  }
  func.func @transform_3(%arg0: i32, %arg1: i32) -> (i32, i32) {
    %c0_i32 = arith.constant 0 : i32
    %c0_i32_0 = arith.constant 0 : i32
    %c0_i32_1 = arith.constant 0 : i32
    return %c0_i32, %c0_i32_0 : i32, i32
  }
  func.func @transform_4(%arg0: i32, %arg1: i32) -> (i32, i32, i32) {
    %c0_i32 = arith.constant 0 : i32
    %c0_i32_0 = arith.constant 0 : i32
    return %arg0, %arg1, %c0_i32 : i32, i32, i32
  }
}

module attributes {stable_mosaic.version = 11 : i64} {
  func.func @_mm2_scale_kernel(%arg0: i32, %arg1: memref<8x64xbf16, #tpu.memory_space<vmem>>, %arg2: memref<8x64xbf16, #tpu.memory_space<vmem>>, %arg3: memref<64x512xbf16, #tpu.memory_space<vmem>>, %arg4: memref<64x512xbf16, #tpu.memory_space<vmem>>, %arg5: memref<1x512xf32, #tpu.memory_space<vmem>>, %arg6: memref<8x512xbf16, #tpu.memory_space<vmem>>) attributes {dimension_semantics = [#tpu.dimension_semantics<parallel>], iteration_bounds = array<i64: 1>, scalar_prefetch = 0 : i64, scratch_operands = 0 : i64, tpu.core_type = #tpu.core_type<tc>, window_params = [{transform_indices = @transform_0, window_bounds = array<i64: 8, 64>}, {transform_indices = @transform_1, window_bounds = array<i64: 8, 64>}, {pipeline_mode = #tpu.pipeline_mode<synchronous>, transform_indices = @transform_2, window_bounds = array<i64: 64, 512>}, {pipeline_mode = #tpu.pipeline_mode<synchronous>, transform_indices = @transform_3, window_bounds = array<i64: 64, 512>}, {pipeline_mode = #tpu.pipeline_mode<synchronous>, transform_indices = @transform_4, window_bounds = array<i64: 1, 512>}, {transform_indices = @transform_5, window_bounds = array<i64: 8, 512>}]} {
    %c0 = arith.constant 0 : index
    %c0_0 = arith.constant 0 : index
    %0 = vector.load %arg1[%c0, %c0_0] : memref<8x64xbf16, #tpu.memory_space<vmem>>, vector<8x64xbf16>
    %cst = arith.constant 0.000000e+00 : bf16
    %1 = vector.broadcast %cst : bf16 to vector<8x64xbf16>
    %2 = arith.maximumf %0, %1 : vector<8x64xbf16>
    %c0_1 = arith.constant 0 : index
    %c0_2 = arith.constant 0 : index
    %3 = vector.load %arg2[%c0_1, %c0_2] : memref<8x64xbf16, #tpu.memory_space<vmem>>, vector<8x64xbf16>
    %cst_3 = arith.constant 0.000000e+00 : bf16
    %4 = vector.broadcast %cst_3 : bf16 to vector<8x64xbf16>
    %5 = arith.maximumf %3, %4 : vector<8x64xbf16>
    %c0_4 = arith.constant 0 : index
    %c0_5 = arith.constant 0 : index
    %6 = vector.load %arg3[%c0_4, %c0_5] : memref<64x512xbf16, #tpu.memory_space<vmem>>, vector<64x512xbf16>
    %cst_6 = arith.constant dense<0.000000e+00> : vector<8x512xf32>
    %7 = tpu.matmul %2, %6, %cst_6 {dimension_numbers = #tpu.dot_dimension_numbers<[1], [0], [0], [1], [0, 0, 1, 1], [], []>} : vector<8x64xbf16>, vector<64x512xbf16>, vector<8x512xf32> -> vector<8x512xf32>
    %c0_7 = arith.constant 0 : index
    %c0_8 = arith.constant 0 : index
    %8 = vector.load %arg4[%c0_7, %c0_8] : memref<64x512xbf16, #tpu.memory_space<vmem>>, vector<64x512xbf16>
    %cst_9 = arith.constant dense<0.000000e+00> : vector<8x512xf32>
    %9 = tpu.matmul %5, %8, %cst_9 {dimension_numbers = #tpu.dot_dimension_numbers<[1], [0], [0], [1], [0, 0, 1, 1], [], []>} : vector<8x64xbf16>, vector<64x512xbf16>, vector<8x512xf32> -> vector<8x512xf32>
    %10 = arith.addf %7, %9 : vector<8x512xf32>
    %c0_10 = arith.constant 0 : index
    %c0_11 = arith.constant 0 : index
    %11 = vector.load %arg5[%c0_10, %c0_11] : memref<1x512xf32, #tpu.memory_space<vmem>>, vector<1x512xf32>
    %12 = vector.broadcast %11 : vector<1x512xf32> to vector<8x512xf32>
    %13 = arith.mulf %10, %12 : vector<8x512xf32>
    %14 = arith.truncf %13 : vector<8x512xf32> to vector<8x512xbf16>
    %c0_12 = arith.constant 0 : index
    %c0_13 = arith.constant 0 : index
    %15 = vector.load %arg6[%c0_12, %c0_13] : memref<8x512xbf16, #tpu.memory_space<vmem>>, vector<8x512xbf16>
    tpu.vector_store %arg6[%c0_12, %c0_13], %14 {strides = array<i32>} : memref<8x512xbf16, #tpu.memory_space<vmem>>, vector<8x512xbf16>,
    return
  }
  func.func @transform_0(%arg0: i32) -> (i32, i32) {
    %c0_i32 = arith.constant 0 : i32
    %c0_i32_0 = arith.constant 0 : i32
    return %arg0, %c0_i32 : i32, i32
  }
  func.func @transform_1(%arg0: i32) -> (i32, i32) {
    %c0_i32 = arith.constant 0 : i32
    %c0_i32_0 = arith.constant 0 : i32
    return %arg0, %c0_i32 : i32, i32
  }
  func.func @transform_2(%arg0: i32) -> (i32, i32) {
    %c0_i32 = arith.constant 0 : i32
    %c0_i32_0 = arith.constant 0 : i32
    %c0_i32_1 = arith.constant 0 : i32
    return %c0_i32, %c0_i32_0 : i32, i32
  }
  func.func @transform_3(%arg0: i32) -> (i32, i32) {
    %c0_i32 = arith.constant 0 : i32
    %c0_i32_0 = arith.constant 0 : i32
    %c0_i32_1 = arith.constant 0 : i32
    return %c0_i32, %c0_i32_0 : i32, i32
  }
  func.func @transform_4(%arg0: i32) -> (i32, i32) {
    %c0_i32 = arith.constant 0 : i32
    %c0_i32_0 = arith.constant 0 : i32
    %c0_i32_1 = arith.constant 0 : i32
    return %c0_i32, %c0_i32_0 : i32, i32
  }
  func.func @transform_5(%arg0: i32) -> (i32, i32) {
    %c0_i32 = arith.constant 0 : i32
    %c0_i32_0 = arith.constant 0 : i32
    return %arg0, %c0_i32 : i32, i32
  }
}

module attributes {stable_mosaic.version = 11 : i64} {
  func.func @_mm2_scale_kernel(%arg0: i32, %arg1: memref<16x32xbf16, #tpu.memory_space<vmem>>, %arg2: memref<16x32xbf16, #tpu.memory_space<vmem>>, %arg3: memref<32x256xbf16, #tpu.memory_space<vmem>>, %arg4: memref<32x256xbf16, #tpu.memory_space<vmem>>, %arg5: memref<1x256xf32, #tpu.memory_space<vmem>>, %arg6: memref<16x256xbf16, #tpu.memory_space<vmem>>) attributes {dimension_semantics = [#tpu.dimension_semantics<parallel>], iteration_bounds = array<i64: 2>, scalar_prefetch = 0 : i64, scratch_operands = 0 : i64, tpu.core_type = #tpu.core_type<tc>, window_params = [{transform_indices = @transform_0, window_bounds = array<i64: 16, 32>}, {transform_indices = @transform_1, window_bounds = array<i64: 16, 32>}, {pipeline_mode = #tpu.pipeline_mode<synchronous>, transform_indices = @transform_2, window_bounds = array<i64: 32, 256>}, {pipeline_mode = #tpu.pipeline_mode<synchronous>, transform_indices = @transform_3, window_bounds = array<i64: 32, 256>}, {pipeline_mode = #tpu.pipeline_mode<synchronous>, transform_indices = @transform_4, window_bounds = array<i64: 1, 256>}, {transform_indices = @transform_5, window_bounds = array<i64: 16, 256>}]} {
    %c0 = arith.constant 0 : index
    %c0_0 = arith.constant 0 : index
    %0 = vector.load %arg1[%c0, %c0_0] : memref<16x32xbf16, #tpu.memory_space<vmem>>, vector<16x32xbf16>
    %cst = arith.constant 0.000000e+00 : bf16
    %1 = vector.broadcast %cst : bf16 to vector<16x32xbf16>
    %2 = arith.maximumf %0, %1 : vector<16x32xbf16>
    %c0_1 = arith.constant 0 : index
    %c0_2 = arith.constant 0 : index
    %3 = vector.load %arg2[%c0_1, %c0_2] : memref<16x32xbf16, #tpu.memory_space<vmem>>, vector<16x32xbf16>
    %cst_3 = arith.constant 0.000000e+00 : bf16
    %4 = vector.broadcast %cst_3 : bf16 to vector<16x32xbf16>
    %5 = arith.maximumf %3, %4 : vector<16x32xbf16>
    %c0_4 = arith.constant 0 : index
    %c0_5 = arith.constant 0 : index
    %6 = vector.load %arg3[%c0_4, %c0_5] : memref<32x256xbf16, #tpu.memory_space<vmem>>, vector<32x256xbf16>
    %cst_6 = arith.constant dense<0.000000e+00> : vector<16x256xf32>
    %7 = tpu.matmul %2, %6, %cst_6 {dimension_numbers = #tpu.dot_dimension_numbers<[1], [0], [0], [1], [0, 0, 1, 1], [], []>} : vector<16x32xbf16>, vector<32x256xbf16>, vector<16x256xf32> -> vector<16x256xf32>
    %c0_7 = arith.constant 0 : index
    %c0_8 = arith.constant 0 : index
    %8 = vector.load %arg4[%c0_7, %c0_8] : memref<32x256xbf16, #tpu.memory_space<vmem>>, vector<32x256xbf16>
    %cst_9 = arith.constant dense<0.000000e+00> : vector<16x256xf32>
    %9 = tpu.matmul %5, %8, %cst_9 {dimension_numbers = #tpu.dot_dimension_numbers<[1], [0], [0], [1], [0, 0, 1, 1], [], []>} : vector<16x32xbf16>, vector<32x256xbf16>, vector<16x256xf32> -> vector<16x256xf32>
    %10 = arith.addf %7, %9 : vector<16x256xf32>
    %c0_10 = arith.constant 0 : index
    %c0_11 = arith.constant 0 : index
    %11 = vector.load %arg5[%c0_10, %c0_11] : memref<1x256xf32, #tpu.memory_space<vmem>>, vector<1x256xf32>
    %12 = vector.broadcast %11 : vector<1x256xf32> to vector<16x256xf32>
    %13 = arith.mulf %10, %12 : vector<16x256xf32>
    %14 = arith.truncf %13 : vector<16x256xf32> to vector<16x256xbf16>
    %c0_12 = arith.constant 0 : index
    %c0_13 = arith.constant 0 : index
    %15 = vector.load %arg6[%c0_12, %c0_13] : memref<16x256xbf16, #tpu.memory_space<vmem>>, vector<16x256xbf16>
    tpu.vector_store %arg6[%c0_12, %c0_13], %14 {strides = array<i32>} : memref<16x256xbf16, #tpu.memory_space<vmem>>, vector<16x256xbf16>,
    return
  }
  func.func @transform_0(%arg0: i32) -> (i32, i32) {
    %c0_i32 = arith.constant 0 : i32
    %c0_i32_0 = arith.constant 0 : i32
    return %arg0, %c0_i32 : i32, i32
  }
  func.func @transform_1(%arg0: i32) -> (i32, i32) {
    %c0_i32 = arith.constant 0 : i32
    %c0_i32_0 = arith.constant 0 : i32
    return %arg0, %c0_i32 : i32, i32
  }
  func.func @transform_2(%arg0: i32) -> (i32, i32) {
    %c0_i32 = arith.constant 0 : i32
    %c0_i32_0 = arith.constant 0 : i32
    %c0_i32_1 = arith.constant 0 : i32
    return %c0_i32, %c0_i32_0 : i32, i32
  }
  func.func @transform_3(%arg0: i32) -> (i32, i32) {
    %c0_i32 = arith.constant 0 : i32
    %c0_i32_0 = arith.constant 0 : i32
    %c0_i32_1 = arith.constant 0 : i32
    return %c0_i32, %c0_i32_0 : i32, i32
  }
  func.func @transform_4(%arg0: i32) -> (i32, i32) {
    %c0_i32 = arith.constant 0 : i32
    %c0_i32_0 = arith.constant 0 : i32
    %c0_i32_1 = arith.constant 0 : i32
    return %c0_i32, %c0_i32_0 : i32, i32
  }
  func.func @transform_5(%arg0: i32) -> (i32, i32) {
    %c0_i32 = arith.constant 0 : i32
    %c0_i32_0 = arith.constant 0 : i32
    return %arg0, %c0_i32 : i32, i32
  }
}

module attributes {stable_mosaic.version = 11 : i64} {
  func.func @_mm2_scale_kernel(%arg0: i32, %arg1: memref<64x16xbf16, #tpu.memory_space<vmem>>, %arg2: memref<64x16xbf16, #tpu.memory_space<vmem>>, %arg3: memref<16x128xbf16, #tpu.memory_space<vmem>>, %arg4: memref<16x128xbf16, #tpu.memory_space<vmem>>, %arg5: memref<1x128xf32, #tpu.memory_space<vmem>>, %arg6: memref<64x128xbf16, #tpu.memory_space<vmem>>) attributes {dimension_semantics = [#tpu.dimension_semantics<parallel>], iteration_bounds = array<i64: 2>, scalar_prefetch = 0 : i64, scratch_operands = 0 : i64, tpu.core_type = #tpu.core_type<tc>, window_params = [{transform_indices = @transform_0, window_bounds = array<i64: 64, 16>}, {transform_indices = @transform_1, window_bounds = array<i64: 64, 16>}, {pipeline_mode = #tpu.pipeline_mode<synchronous>, transform_indices = @transform_2, window_bounds = array<i64: 16, 128>}, {pipeline_mode = #tpu.pipeline_mode<synchronous>, transform_indices = @transform_3, window_bounds = array<i64: 16, 128>}, {pipeline_mode = #tpu.pipeline_mode<synchronous>, transform_indices = @transform_4, window_bounds = array<i64: 1, 128>}, {transform_indices = @transform_5, window_bounds = array<i64: 64, 128>}]} {
    %c0 = arith.constant 0 : index
    %c0_0 = arith.constant 0 : index
    %0 = vector.load %arg1[%c0, %c0_0] : memref<64x16xbf16, #tpu.memory_space<vmem>>, vector<64x16xbf16>
    %cst = arith.constant 0.000000e+00 : bf16
    %1 = vector.broadcast %cst : bf16 to vector<64x16xbf16>
    %2 = arith.maximumf %0, %1 : vector<64x16xbf16>
    %c0_1 = arith.constant 0 : index
    %c0_2 = arith.constant 0 : index
    %3 = vector.load %arg2[%c0_1, %c0_2] : memref<64x16xbf16, #tpu.memory_space<vmem>>, vector<64x16xbf16>
    %cst_3 = arith.constant 0.000000e+00 : bf16
    %4 = vector.broadcast %cst_3 : bf16 to vector<64x16xbf16>
    %5 = arith.maximumf %3, %4 : vector<64x16xbf16>
    %c0_4 = arith.constant 0 : index
    %c0_5 = arith.constant 0 : index
    %6 = vector.load %arg3[%c0_4, %c0_5] : memref<16x128xbf16, #tpu.memory_space<vmem>>, vector<16x128xbf16>
    %cst_6 = arith.constant dense<0.000000e+00> : vector<64x128xf32>
    %7 = tpu.matmul %2, %6, %cst_6 {dimension_numbers = #tpu.dot_dimension_numbers<[1], [0], [0], [1], [0, 0, 1, 1], [], []>} : vector<64x16xbf16>, vector<16x128xbf16>, vector<64x128xf32> -> vector<64x128xf32>
    %c0_7 = arith.constant 0 : index
    %c0_8 = arith.constant 0 : index
    %8 = vector.load %arg4[%c0_7, %c0_8] : memref<16x128xbf16, #tpu.memory_space<vmem>>, vector<16x128xbf16>
    %cst_9 = arith.constant dense<0.000000e+00> : vector<64x128xf32>
    %9 = tpu.matmul %5, %8, %cst_9 {dimension_numbers = #tpu.dot_dimension_numbers<[1], [0], [0], [1], [0, 0, 1, 1], [], []>} : vector<64x16xbf16>, vector<16x128xbf16>, vector<64x128xf32> -> vector<64x128xf32>
    %10 = arith.addf %7, %9 : vector<64x128xf32>
    %c0_10 = arith.constant 0 : index
    %c0_11 = arith.constant 0 : index
    %11 = vector.load %arg5[%c0_10, %c0_11] : memref<1x128xf32, #tpu.memory_space<vmem>>, vector<1x128xf32>
    %12 = vector.broadcast %11 : vector<1x128xf32> to vector<64x128xf32>
    %13 = arith.mulf %10, %12 : vector<64x128xf32>
    %14 = arith.truncf %13 : vector<64x128xf32> to vector<64x128xbf16>
    %c0_12 = arith.constant 0 : index
    %c0_13 = arith.constant 0 : index
    %15 = vector.load %arg6[%c0_12, %c0_13] : memref<64x128xbf16, #tpu.memory_space<vmem>>, vector<64x128xbf16>
    tpu.vector_store %arg6[%c0_12, %c0_13], %14 {strides = array<i32>} : memref<64x128xbf16, #tpu.memory_space<vmem>>, vector<64x128xbf16>,
    return
  }
  func.func @transform_0(%arg0: i32) -> (i32, i32) {
    %c0_i32 = arith.constant 0 : i32
    %c0_i32_0 = arith.constant 0 : i32
    return %arg0, %c0_i32 : i32, i32
  }
  func.func @transform_1(%arg0: i32) -> (i32, i32) {
    %c0_i32 = arith.constant 0 : i32
    %c0_i32_0 = arith.constant 0 : i32
    return %arg0, %c0_i32 : i32, i32
  }
  func.func @transform_2(%arg0: i32) -> (i32, i32) {
    %c0_i32 = arith.constant 0 : i32
    %c0_i32_0 = arith.constant 0 : i32
    %c0_i32_1 = arith.constant 0 : i32
    return %c0_i32, %c0_i32_0 : i32, i32
  }
  func.func @transform_3(%arg0: i32) -> (i32, i32) {
    %c0_i32 = arith.constant 0 : i32
    %c0_i32_0 = arith.constant 0 : i32
    %c0_i32_1 = arith.constant 0 : i32
    return %c0_i32, %c0_i32_0 : i32, i32
  }
  func.func @transform_4(%arg0: i32) -> (i32, i32) {
    %c0_i32 = arith.constant 0 : i32
    %c0_i32_0 = arith.constant 0 : i32
    %c0_i32_1 = arith.constant 0 : i32
    return %c0_i32, %c0_i32_0 : i32, i32
  }
  func.func @transform_5(%arg0: i32) -> (i32, i32) {
    %c0_i32 = arith.constant 0 : i32
    %c0_i32_0 = arith.constant 0 : i32
    return %arg0, %c0_i32 : i32, i32
  }
}

module attributes {stable_mosaic.version = 11 : i64} {
  func.func @_mm2_scale_kernel(%arg0: i32, %arg1: memref<256x8xbf16, #tpu.memory_space<vmem>>, %arg2: memref<256x8xbf16, #tpu.memory_space<vmem>>, %arg3: memref<8x48xbf16, #tpu.memory_space<vmem>>, %arg4: memref<8x48xbf16, #tpu.memory_space<vmem>>, %arg5: memref<1x48xf32, #tpu.memory_space<vmem>>, %arg6: memref<256x48xbf16, #tpu.memory_space<vmem>>) attributes {dimension_semantics = [#tpu.dimension_semantics<parallel>], iteration_bounds = array<i64: 2>, scalar_prefetch = 0 : i64, scratch_operands = 0 : i64, tpu.core_type = #tpu.core_type<tc>, window_params = [{transform_indices = @transform_0, window_bounds = array<i64: 256, 8>}, {transform_indices = @transform_1, window_bounds = array<i64: 256, 8>}, {pipeline_mode = #tpu.pipeline_mode<synchronous>, transform_indices = @transform_2, window_bounds = array<i64: 8, 48>}, {pipeline_mode = #tpu.pipeline_mode<synchronous>, transform_indices = @transform_3, window_bounds = array<i64: 8, 48>}, {pipeline_mode = #tpu.pipeline_mode<synchronous>, transform_indices = @transform_4, window_bounds = array<i64: 1, 48>}, {transform_indices = @transform_5, window_bounds = array<i64: 256, 48>}]} {
    %c0 = arith.constant 0 : index
    %c0_0 = arith.constant 0 : index
    %0 = vector.load %arg1[%c0, %c0_0] : memref<256x8xbf16, #tpu.memory_space<vmem>>, vector<256x8xbf16>
    %cst = arith.constant 0.000000e+00 : bf16
    %1 = vector.broadcast %cst : bf16 to vector<256x8xbf16>
    %2 = arith.maximumf %0, %1 : vector<256x8xbf16>
    %c0_1 = arith.constant 0 : index
    %c0_2 = arith.constant 0 : index
    %3 = vector.load %arg2[%c0_1, %c0_2] : memref<256x8xbf16, #tpu.memory_space<vmem>>, vector<256x8xbf16>
    %cst_3 = arith.constant 0.000000e+00 : bf16
    %4 = vector.broadcast %cst_3 : bf16 to vector<256x8xbf16>
    %5 = arith.maximumf %3, %4 : vector<256x8xbf16>
    %c0_4 = arith.constant 0 : index
    %c0_5 = arith.constant 0 : index
    %6 = vector.load %arg3[%c0_4, %c0_5] : memref<8x48xbf16, #tpu.memory_space<vmem>>, vector<8x48xbf16>
    %cst_6 = arith.constant dense<0.000000e+00> : vector<256x48xf32>
    %7 = tpu.matmul %2, %6, %cst_6 {dimension_numbers = #tpu.dot_dimension_numbers<[1], [0], [0], [1], [0, 0, 1, 1], [], []>} : vector<256x8xbf16>, vector<8x48xbf16>, vector<256x48xf32> -> vector<256x48xf32>
    %c0_7 = arith.constant 0 : index
    %c0_8 = arith.constant 0 : index
    %8 = vector.load %arg4[%c0_7, %c0_8] : memref<8x48xbf16, #tpu.memory_space<vmem>>, vector<8x48xbf16>
    %cst_9 = arith.constant dense<0.000000e+00> : vector<256x48xf32>
    %9 = tpu.matmul %5, %8, %cst_9 {dimension_numbers = #tpu.dot_dimension_numbers<[1], [0], [0], [1], [0, 0, 1, 1], [], []>} : vector<256x8xbf16>, vector<8x48xbf16>, vector<256x48xf32> -> vector<256x48xf32>
    %10 = arith.addf %7, %9 : vector<256x48xf32>
    %c0_10 = arith.constant 0 : index
    %c0_11 = arith.constant 0 : index
    %11 = vector.load %arg5[%c0_10, %c0_11] : memref<1x48xf32, #tpu.memory_space<vmem>>, vector<1x48xf32>
    %12 = vector.broadcast %11 : vector<1x48xf32> to vector<256x48xf32>
    %13 = arith.mulf %10, %12 : vector<256x48xf32>
    %14 = arith.truncf %13 : vector<256x48xf32> to vector<256x48xbf16>
    %c0_12 = arith.constant 0 : index
    %c0_13 = arith.constant 0 : index
    %15 = vector.load %arg6[%c0_12, %c0_13] : memref<256x48xbf16, #tpu.memory_space<vmem>>, vector<256x48xbf16>
    tpu.vector_store %arg6[%c0_12, %c0_13], %14 {strides = array<i32>} : memref<256x48xbf16, #tpu.memory_space<vmem>>, vector<256x48xbf16>,
    return
  }
  func.func @transform_0(%arg0: i32) -> (i32, i32) {
    %c0_i32 = arith.constant 0 : i32
    %c0_i32_0 = arith.constant 0 : i32
    return %arg0, %c0_i32 : i32, i32
  }
  func.func @transform_1(%arg0: i32) -> (i32, i32) {
    %c0_i32 = arith.constant 0 : i32
    %c0_i32_0 = arith.constant 0 : i32
    return %arg0, %c0_i32 : i32, i32
  }
  func.func @transform_2(%arg0: i32) -> (i32, i32) {
    %c0_i32 = arith.constant 0 : i32
    %c0_i32_0 = arith.constant 0 : i32
    %c0_i32_1 = arith.constant 0 : i32
    return %c0_i32, %c0_i32_0 : i32, i32
  }
  func.func @transform_3(%arg0: i32) -> (i32, i32) {
    %c0_i32 = arith.constant 0 : i32
    %c0_i32_0 = arith.constant 0 : i32
    %c0_i32_1 = arith.constant 0 : i32
    return %c0_i32, %c0_i32_0 : i32, i32
  }
  func.func @transform_4(%arg0: i32) -> (i32, i32) {
    %c0_i32 = arith.constant 0 : i32
    %c0_i32_0 = arith.constant 0 : i32
    %c0_i32_1 = arith.constant 0 : i32
    return %c0_i32, %c0_i32_0 : i32, i32
  }
  func.func @transform_5(%arg0: i32) -> (i32, i32) {
    %c0_i32 = arith.constant 0 : i32
    %c0_i32_0 = arith.constant 0 : i32
    return %arg0, %c0_i32 : i32, i32
  }
}

</mosaic_0001>

<bundles_post_ra>
// kernel: tile.25
= control target key start
LH: loop header
LB: loop body
LE: loop exit
PB: predicated region body
PF: predicated region fallthrough
CT: control target
= control target key end

     0   :  { %s62_s8 = smov 96   ;;  %vm3_vm0 = vcmask 261120   ;;  %s64_s15 = smov 64   ;;  %vm9_vm1 = vcmask 1048320   ;;  %vm15_vm2 = vcmask 785920   ;;  %vm21_vm3 = vcmask 523520   ;;  %s99_s0 = inlined_call_operand.vmem [shape: f32[16,32], index: 0, kind: input, shape index: {}]   ;;  %s100_s1 = inlined_call_operand.vmem [shape: f32[1,512], index: 1, kind: output, shape index: {}]  }
   0x1   :  { %v53_v0 = vld [vmem:[%s99_s0 + $0x3] ss:$4 sm:$0xf]   ;;  %v54_v1 = vld [vmem:[%s99_s0 + $0x2] ss:$4 sm:$0xf]  }
   0x2   :  { %7 = vrot.lane.b32.xlu0 %v53_v0, %s62_s8  ;;  %v55_v2 = vld [vmem:[%s99_s0 + $0x1] ss:$4 sm:$0xf]   ;;  %v2_v3 = vld [vmem:[%s99_s0] ss:$4 sm:$0xf]  }
   0x3   :  { %s63_s0 = smov 32   ;;  %4 = vst.msk [vmem:[#allocation0] ss:$8 sm:$0xf] %vm3_vm0, %v2_v3  }
   0x4   :  { %19 = vrot.lane.b32.xlu1 %v55_v2, %s63_s0 }
   0x6   :  { %13 = vrot.lane.b32.xlu0 %v54_v1, %s64_s15 }
  0x74   :  { %v8_v4 = vpop.permute.xlu0 %7  }
  0x75   :  { %10 = vst.msk [vmem:[#allocation0] ss:$8 sm:$0xf] %vm9_vm1, %v8_v4  }
  0x76   :  { %v20_v5 = vpop.permute.xlu1 %19  }
  0x78   :  { %v14_v6 = vpop.permute.xlu0 %13  }
  0x79   :  { %16 = vst.msk [vmem:[#allocation0] ss:$8 sm:$0xf] %vm15_vm2, %v14_v6  }
  0x7a   :  { %22 = vst.msk [vmem:[#allocation0] ss:$8 sm:$0xf] %vm21_vm3, %v20_v5  }
  0x81   :  { %v27_v7 = vld [vmem:[#allocation0] sm:$0x1]  ;;  %v32_v8 = vld [vmem:[#allocation0 + $0x8] sm:$0x1]  ;;  %v38_v9 = vld [vmem:[#allocation0 + $0x10] sm:$0x1] }
  0x82   :  { %30 = vst [vmem:[%s100_s1] sm:$0x1] %v27_v7  ;;  %56 = vst [vmem:[%s100_s1 + $0x1] sm:$0x1] %v32_v8  ;;  %v45_v10 = vld [vmem:[#allocation0 + $0x18] sm:$0x1] }
  0x83   :  { %57 = vst [vmem:[%s100_s1 + $0x2] sm:$0x1] %v38_v9  ;;  %58 = vst [vmem:[%s100_s1 + $0x3] sm:$0x1] %v45_v10 }

// kernel: tile.21
= control target key start
LH: loop header
LB: loop body
LE: loop exit
PB: predicated region body
PF: predicated region fallthrough
CT: control target
= control target key end

     0   :  { %vm3_vm0 = vcmask 523264   ;;  %vm10_vm1 = vcmask 1048064   ;;  %s125_s0 = inlined_call_operand.vmem [shape: f32[16,64], index: 0, kind: input, shape index: {}]   ;;  %s126_s1 = inlined_call_operand.vmem [shape: f32[1,1024], index: 1, kind: output, shape index: {}]  }
   0x1   :  { %v75_v0 = vld [vmem:[%s125_s0 + $0x1] ss:$2 sm:$0xff]   ;;  %v2_v1 = vld [vmem:[%s125_s0] ss:$2 sm:$0xff]   ;;  %s84_s0 = smov 64  }
   0x2   :  { %8 = vrot.lane.b32.xlu0 %v75_v0, %s84_s0  ;;  %4 = vst.msk [vmem:[#allocation0] ss:$8 sm:$0xf] %vm3_vm0, %v2_v1   ;;  %5 = vst.msk [vmem:[#allocation0] ss:$8 sm:$0xf0] %vm3_vm0, %v2_v1  }
  0x74   :  { %v9_v2 = vpop.permute.xlu0 %8  }
  0x75   :  { %11 = vst.msk [vmem:[#allocation0] ss:$8 sm:$0xf] %vm10_vm1, %v9_v2   ;;  %12 = vst.msk [vmem:[#allocation0] ss:$8 sm:$0xf0] %vm10_vm1, %v9_v2  }
  0x7c   :  { %v17_v3 = vld [vmem:[#allocation0] sm:$0x1]  ;;  %v22_v4 = vld [vmem:[#allocation0 + $0x8] sm:$0x1]  ;;  %v28_v5 = vld [vmem:[#allocation0 + $0x10] sm:$0x1] }
  0x7d   :  { %20 = vst [vmem:[%s126_s1] sm:$0x1] %v17_v3  ;;  %76 = vst [vmem:[%s126_s1 + $0x1] sm:$0x1] %v22_v4  ;;  %v35_v6 = vld [vmem:[#allocation0 + $0x18] sm:$0x1] }
  0x7e   :  { %77 = vst [vmem:[%s126_s1 + $0x2] sm:$0x1] %v28_v5  ;;  %v42_v7 = vld [vmem:[#allocation0 + $0x20] sm:$0x1]  ;;  %v49_v8 = vld [vmem:[#allocation0 + $0x28] sm:$0x1] }
  0x7f   :  { %78 = vst [vmem:[%s126_s1 + $0x3] sm:$0x1] %v35_v6  ;;  %79 = vst [vmem:[%s126_s1 + $0x4] sm:$0x1] %v42_v7  ;;  %v56_v9 = vld [vmem:[#allocation0 + $0x30] sm:$0x1] }
  0x80   :  { %80 = vst [vmem:[%s126_s1 + $0x5] sm:$0x1] %v49_v8  ;;  %v63_v10 = vld [vmem:[#allocation0 + $0x38] sm:$0x1]  ;;  %81 = vst [vmem:[%s126_s1 + $0x6] sm:$0x1] %v56_v9 }
  0x81   :  { %82 = vst [vmem:[%s126_s1 + $0x7] sm:$0x1] %v63_v10 }

// kernel: tile.24
= control target key start
LH: loop header
LB: loop body
LE: loop exit
PB: predicated region body
PF: predicated region fallthrough
CT: control target
= control target key end

     0   :  { %2 = vsyncpa [#allocation1], 0  ;;  %s45_s6 = smov [#allocation0]   ;;  %s65_s0 = inlined_call_operand.hbm [shape: f32[32], index: 0, kind: input, shape index: {}]   ;;  %s66_s1 = inlined_call_operand.vmem [shape: f32[16,32], index: 1, kind: output, shape index: {}]  }
   0x1   :  { %s9_s7 = sshll.u32 %s45_s6, 4  ;;  %s10_s7 = int_to_ptr.vmem [resolvable:$true] %s9_s7 }
   0x2   :  { %s31_s8 = scalar_lea.vmem %s10_s7, 16  ;;  %s35_s9 = scalar_lea.vmem %s10_s7, 32 }
   0x3   :  { %p32_p0 = scmp.ne.s32.totalorder %s10_s7, %s31_s8  ;;  %p36_p1 = scmp.lt.s32.totalorder %s10_s7, %s10_s7 }
   0x4   :  { %p37_p2 = scmp.lt.s32.totalorder %s35_s9, %s31_s8 }
   0x6   :  { %p38_p3 = por %p37_p2, %p36_p1 }
   0x8   :  { %p39_p4 = pnand %p38_p3, %p32_p0 }
   0xa   :  { %42 = shalt.err (!%p39_p4)
}
   0xb   :  { %12 = dma.hbm_to_vmem [thread:$0]  %s65_s0, 16, %s10_s7, [#allocation1]  }
   0xc   :  { %43 = dma.done.wait [#allocation1], 16  }
   0xd   :  { %44 = vsyncadd [#allocation1], 4294967280  ;;  %v16_v0 = vld [vmem:[#allocation0] ss:$0 sm:$0xff] }
   0xe   :  { %17 = vst [vmem:[%s66_s1] sm:$0xff] %v16_v0  ;;  %21 = vst [vmem:[%s66_s1 + $0x8] sm:$0xff] %v16_v0 }
   0xf   :  { %20 = vsyncpa [#allocation1], 1 }

// kernel: tile.20
= control target key start
LH: loop header
LB: loop body
LE: loop exit
PB: predicated region body
PF: predicated region fallthrough
CT: control target
= control target key end

     0   :  { %2 = vsyncpa [#allocation1], 0  ;;  %s45_s6 = smov [#allocation0]   ;;  %s65_s0 = inlined_call_operand.hbm [shape: f32[64], index: 0, kind: input, shape index: {}]   ;;  %s66_s1 = inlined_call_operand.vmem [shape: f32[16,64], index: 1, kind: output, shape index: {}]  }
   0x1   :  { %s9_s7 = sshll.u32 %s45_s6, 4  ;;  %s10_s7 = int_to_ptr.vmem [resolvable:$true] %s9_s7 }
   0x2   :  { %s31_s8 = scalar_lea.vmem %s10_s7, 16  ;;  %s35_s9 = scalar_lea.vmem %s10_s7, 32 }
   0x3   :  { %p32_p0 = scmp.ne.s32.totalorder %s10_s7, %s31_s8  ;;  %p36_p1 = scmp.lt.s32.totalorder %s10_s7, %s10_s7 }
   0x4   :  { %p37_p2 = scmp.lt.s32.totalorder %s35_s9, %s31_s8 }
   0x6   :  { %p38_p3 = por %p37_p2, %p36_p1 }
   0x8   :  { %p39_p4 = pnand %p38_p3, %p32_p0 }
   0xa   :  { %42 = shalt.err (!%p39_p4)
}
   0xb   :  { %12 = dma.hbm_to_vmem [thread:$0]  %s65_s0, 16, %s10_s7, [#allocation1]  }
   0xc   :  { %43 = dma.done.wait [#allocation1], 16  }
   0xd   :  { %44 = vsyncadd [#allocation1], 4294967280  ;;  %v16_v0 = vld [vmem:[#allocation0] ss:$0 sm:$0xff] }
   0xe   :  { %17 = vst [vmem:[%s66_s1] sm:$0xff] %v16_v0  ;;  %21 = vst [vmem:[%s66_s1 + $0x8] sm:$0xff] %v16_v0 }
   0xf   :  { %20 = vsyncpa [#allocation1], 1 }

// kernel: tile.29
= control target key start
LH: loop header
LB: loop body
LE: loop exit
PB: predicated region body
PF: predicated region fallthrough
CT: control target
= control target key end

     0   :  { %s7_s6 = smov 3  ;;  %s21_s9 = smov 3  ;;  %vm4_vm0 = vcmask 130048   ;;  %vm11_vm1 = vcmask 1048448   ;;  %vm18_vm2 = vcmask 917248   ;;  %vm25_vm3 = vcmask 786048   ;;  %s131_s0 = inlined_call_operand.vmem [shape: f32[16,16], index: 0, kind: input, shape index: {}]   ;;  %s132_s1 = inlined_call_operand.vmem [shape: f32[1,256], index: 1, kind: output, shape index: {}]  }
   0x1   :  { %v69_v0 = vld [vmem:[%s131_s0 + $0x7] ss:$8 sm:%s7_s6]   ;;  %s84_s10 = smov 112   ;;  %v71_v1 = vld [vmem:[%s131_s0 + $0x5] ss:$8 sm:%s21_s9]   ;;  %s14_s13 = smov 3 }
   0x2   :  { %9 = vrot.lane.b32.xlu0 %v69_v0, %s84_s10  ;;  %s85_s14 = smov 80   ;;  %v70_v2 = vld [vmem:[%s131_s0 + $0x6] ss:$8 sm:%s14_s13]   ;;  %s28_s17 = smov 3  ;;  %vm32_vm4 = vcmask 654848   ;;  %vm39_vm5 = vcmask 523648  }
   0x3   :  { %23 = vrot.lane.b32.xlu1 %v71_v1, %s85_s14  ;;  %v72_v3 = vld [vmem:[%s131_s0 + $0x4] ss:$8 sm:%s28_s17]   ;;  %s35_s20 = smov 3  ;;  %s42_s21 = smov 3  ;;  %vm46_vm6 = vcmask 392448   ;;  %vm53_vm7 = vcmask 261248  }
   0x4   :  { %s86_s22 = smov 96   ;;  %s87_s23 = smov 64   ;;  %v73_v4 = vld [vmem:[%s131_s0 + $0x3] ss:$8 sm:%s35_s20]   ;;  %v74_v5 = vld [vmem:[%s131_s0 + $0x2] ss:$8 sm:%s42_s21]  }
   0x5   :  { %s2_s26 = smov 3  ;;  %s49_s29 = smov 3 }
   0x6   :  { %16 = vrot.lane.b32.xlu0 %v70_v2, %s86_s22  ;;  %v3_v6 = vld [vmem:[%s131_s0] ss:$8 sm:%s2_s26]   ;;  %s88_s3 = smov 48   ;;  %s89_s4 = smov 32  }
   0x7   :  { %30 = vrot.lane.b32.xlu1 %v72_v3, %s87_s23  ;;  %5 = vst.msk [vmem:[#allocation0] ss:$8 sm:$0x3] %vm4_vm0, %v3_v6   ;;  %v75_v7 = vld [vmem:[%s131_s0 + $0x1] ss:$8 sm:%s49_s29]   ;;  %s90_s0 = smov 16  }
   0xa   :  { %37 = vrot.lane.b32.xlu0 %v73_v4, %s88_s3 }
   0xb   :  { %44 = vrot.lane.b32.xlu1 %v74_v5, %s89_s4 }
   0xe   :  { %51 = vrot.lane.b32.xlu0 %v75_v7, %s90_s0 }
  0x74   :  { %v10_v8 = vpop.permute.xlu0 %9  }
  0x75   :  { %12 = vst.msk [vmem:[#allocation0] ss:$8 sm:$0x3] %vm11_vm1, %v10_v8   ;;  %v24_v9 = vpop.permute.xlu1 %23  }
  0x78   :  { %v17_v10 = vpop.permute.xlu0 %16  }
  0x79   :  { %19 = vst.msk [vmem:[#allocation0] ss:$8 sm:$0x3] %vm18_vm2, %v17_v10   ;;  %v31_v11 = vpop.permute.xlu1 %30  }
  0x7a   :  { %26 = vst.msk [vmem:[#allocation0] ss:$8 sm:$0x3] %vm25_vm3, %v24_v9  }
  0x7b   :  { %33 = vst.msk [vmem:[#allocation0] ss:$8 sm:$0x3] %vm32_vm4, %v31_v11  }
  0x7c   :  { %v38_v12 = vpop.permute.xlu0 %37  }
  0x7d   :  { %40 = vst.msk [vmem:[#allocation0] ss:$8 sm:$0x3] %vm39_vm5, %v38_v12   ;;  %v45_v13 = vpop.permute.xlu1 %44  }
  0x7e   :  { %47 = vst.msk [vmem:[#allocation0] ss:$8 sm:$0x3] %vm46_vm6, %v45_v13  }
  0x80   :  { %v52_v14 = vpop.permute.xlu0 %51  }
  0x81   :  { %54 = vst.msk [vmem:[#allocation0] ss:$8 sm:$0x3] %vm53_vm7, %v52_v14  }
  0x88   :  { %v59_v15 = vld [vmem:[#allocation0] sm:$0x1]  ;;  %v64_v16 = vld [vmem:[#allocation0 + $0x8] sm:$0x1] }
  0x89   :  { %62 = vst [vmem:[%s132_s1] sm:$0x1] %v59_v15  ;;  %76 = vst [vmem:[%s132_s1 + $0x1] sm:$0x1] %v64_v16 }

// kernel: tile.28
= control target key start
LH: loop header
LB: loop body
LE: loop exit
PB: predicated region body
PF: predicated region fallthrough
CT: control target
= control target key end

     0   :  { %2 = vsyncpa [#allocation1], 0  ;;  %s45_s6 = smov [#allocation0]   ;;  %s65_s0 = inlined_call_operand.hbm [shape: f32[16], index: 0, kind: input, shape index: {}]   ;;  %s66_s1 = inlined_call_operand.vmem [shape: f32[16,16], index: 1, kind: output, shape index: {}]  }
   0x1   :  { %s9_s7 = sshll.u32 %s45_s6, 4  ;;  %s10_s7 = int_to_ptr.vmem [resolvable:$true] %s9_s7 }
   0x2   :  { %s31_s8 = scalar_lea.vmem %s10_s7, 16  ;;  %s35_s9 = scalar_lea.vmem %s10_s7, 32 }
   0x3   :  { %p32_p0 = scmp.ne.s32.totalorder %s10_s7, %s31_s8  ;;  %p36_p1 = scmp.lt.s32.totalorder %s10_s7, %s10_s7 }
   0x4   :  { %p37_p2 = scmp.lt.s32.totalorder %s35_s9, %s31_s8 }
   0x6   :  { %p38_p3 = por %p37_p2, %p36_p1 }
   0x8   :  { %p39_p4 = pnand %p38_p3, %p32_p0 }
   0xa   :  { %42 = shalt.err (!%p39_p4)
}
   0xb   :  { %12 = dma.hbm_to_vmem [thread:$0]  %s65_s0, 16, %s10_s7, [#allocation1]  }
   0xc   :  { %43 = dma.done.wait [#allocation1], 16  }
   0xd   :  { %44 = vsyncadd [#allocation1], 4294967280  ;;  %v16_v0 = vld [vmem:[#allocation0] ss:$0 sm:$0xff] }
   0xe   :  { %17 = vst [vmem:[%s66_s1] sm:$0xff] %v16_v0  ;;  %21 = vst [vmem:[%s66_s1 + $0x8] sm:$0xff] %v16_v0 }
   0xf   :  { %20 = vsyncpa [#allocation1], 1 }

// kernel: tile.32
= control target key start
LH: loop header
LB: loop body
LE: loop exit
PB: predicated region body
PF: predicated region fallthrough
CT: control target
= control target key end

     0   :  { %2 = vsyncpa [#allocation1], 0  ;;  %s45_s6 = smov [#allocation0]   ;;  %s65_s0 = inlined_call_operand.hbm [shape: f32[8], index: 0, kind: input, shape index: {}]   ;;  %s66_s1 = inlined_call_operand.vmem [shape: f32[16,8], index: 1, kind: output, shape index: {}]  }
   0x1   :  { %s9_s7 = sshll.u32 %s45_s6, 4  ;;  %s10_s7 = int_to_ptr.vmem [resolvable:$true] %s9_s7 }
   0x2   :  { %s31_s8 = scalar_lea.vmem %s10_s7, 16  ;;  %s35_s9 = scalar_lea.vmem %s10_s7, 32 }
   0x3   :  { %p32_p0 = scmp.ne.s32.totalorder %s10_s7, %s31_s8  ;;  %p36_p1 = scmp.lt.s32.totalorder %s10_s7, %s10_s7 }
   0x4   :  { %p37_p2 = scmp.lt.s32.totalorder %s35_s9, %s31_s8 }
   0x6   :  { %p38_p3 = por %p37_p2, %p36_p1 }
   0x8   :  { %p39_p4 = pnand %p38_p3, %p32_p0 }
   0xa   :  { %42 = shalt.err (!%p39_p4)
}
   0xb   :  { %12 = dma.hbm_to_vmem [thread:$0]  %s65_s0, 16, %s10_s7, [#allocation1]  }
   0xc   :  { %43 = dma.done.wait [#allocation1], 16  }
   0xd   :  { %44 = vsyncadd [#allocation1], 4294967280  ;;  %v16_v0 = vld [vmem:[#allocation0] ss:$0 sm:$0xff] }
   0xe   :  { %17 = vst [vmem:[%s66_s1] sm:$0xff] %v16_v0  ;;  %21 = vst [vmem:[%s66_s1 + $0x8] sm:$0xff] %v16_v0 }
   0xf   :  { %20 = vsyncpa [#allocation1], 1 }

// kernel: tile.33
= control target key start
LH: loop header
LB: loop body
LE: loop exit
PB: predicated region body
PF: predicated region fallthrough
CT: control target
= control target key end

     0   :  { %s133_s10 = smov 120   ;;  %s134_s11 = smov 104   ;;  %vm3_vm0 = vcmask 64512   ;;  %vm9_vm1 = vcmask 1048512   ;;  %vm15_vm2 = vcmask 982912   ;;  %vm21_vm3 = vcmask 917312   ;;  %s209_s0 = inlined_call_operand.vmem [shape: f32[16,8], index: 0, kind: input, shape index: {}]   ;;  %s210_s1 = inlined_call_operand.vmem [shape: f32[1,128], index: 1, kind: output, shape index: {}]  }
   0x1   :  { %v103_v0 = vld [vmem:[%s209_s0 + $0xf] sm:$0x1]   ;;  %v105_v1 = vld [vmem:[%s209_s0 + $0xd] sm:$0x1]   ;;  %v104_v2 = vld [vmem:[%s209_s0 + $0xe] sm:$0x1]  }
   0x2   :  { %7 = vrot.lane.b32.xlu0 %v103_v0, %s133_s10  ;;  %19 = vrot.lane.b32.xlu1 %v105_v1, %s134_s11  ;;  %v106_v3 = vld [vmem:[%s209_s0 + $0xc] sm:$0x1]   ;;  %s135_s16 = smov 112   ;;  %s136_s17 = smov 96   ;;  %v107_v4 = vld [vmem:[%s209_s0 + $0xb] sm:$0x1]  }
   0x3   :  { %v108_v5 = vld [vmem:[%s209_s0 + $0xa] sm:$0x1]   ;;  %v2_v6 = vld [vmem:[%s209_s0] sm:$0x1]   ;;  %s137_s24 = smov 88   ;;  %s138_s25 = smov 80  }
   0x4   :  { %4 = vst.msk [vmem:[#allocation0] sm:$0x1] %vm3_vm0, %v2_v6   ;;  %v109_v7 = vld [vmem:[%s209_s0 + $0x9] sm:$0x1]   ;;  %v110_v8 = vld [vmem:[%s209_s0 + $0x8] sm:$0x1]  }
   0x5   :  { %s139_s30 = smov 72   ;;  %s140_s2 = smov 64   ;;  %v111_v9 = vld [vmem:[%s209_s0 + $0x7] sm:$0x1]   ;;  %v112_v10 = vld [vmem:[%s209_s0 + $0x6] sm:$0x1]  }
   0x6   :  { %13 = vrot.lane.b32.xlu0 %v104_v2, %s135_s16  ;;  %25 = vrot.lane.b32.xlu1 %v106_v3, %s136_s17  ;;  %s141_s7 = smov 56   ;;  %s142_s8 = smov 48   ;;  %v113_v11 = vld [vmem:[%s209_s0 + $0x5] sm:$0x1]   ;;  %v114_v12 = vld [vmem:[%s209_s0 + $0x4] sm:$0x1]  }
   0x7   :  { %s143_s13 = smov 40   ;;  %s144_s14 = smov 32   ;;  %v115_v13 = vld [vmem:[%s209_s0 + $0x3] sm:$0x1]   ;;  %v116_v14 = vld [vmem:[%s209_s0 + $0x2] sm:$0x1]  }
   0x8   :  { %s145_s19 = smov 24   ;;  %s146_s20 = smov 16   ;;  %v117_v15 = vld [vmem:[%s209_s0 + $0x1] sm:$0x1]   ;;  %vm27_vm4 = vcmask 851712   ;;  %vm33_vm5 = vcmask 786112  }
   0x9   :  { %s147_s0 = smov 8   ;;  %vm39_vm6 = vcmask 720512   ;;  %vm45_vm7 = vcmask 654912   ;;  %vm51_vm8 = vcmask 589312   ;;  %vm57_vm9 = vcmask 523712  }
   0xa   :  { %31 = vrot.lane.b32.xlu0 %v107_v4, %s137_s24  ;;  %37 = vrot.lane.b32.xlu1 %v108_v5, %s138_s25  ;;  %vm63_vm10 = vcmask 458112   ;;  %vm69_vm11 = vcmask 392512   ;;  %vm75_vm12 = vcmask 326912   ;;  %vm81_vm13 = vcmask 261312  }
   0xb   :  { %vm87_vm14 = vcmask 195712   ;;  %vm93_vm15 = vcmask 130112  }
   0xe   :  { %43 = vrot.lane.b32.xlu0 %v109_v7, %s139_s30  ;;  %49 = vrot.lane.b32.xlu1 %v110_v8, %s140_s2 }
  0x12   :  { %55 = vrot.lane.b32.xlu0 %v111_v9, %s141_s7  ;;  %61 = vrot.lane.b32.xlu1 %v112_v10, %s142_s8 }
  0x16   :  { %67 = vrot.lane.b32.xlu0 %v113_v11, %s143_s13  ;;  %73 = vrot.lane.b32.xlu1 %v114_v12, %s144_s14 }
  0x1a   :  { %79 = vrot.lane.b32.xlu0 %v115_v13, %s145_s19  ;;  %85 = vrot.lane.b32.xlu1 %v116_v14, %s146_s20 }
  0x1e   :  { %91 = vrot.lane.b32.xlu0 %v117_v15, %s147_s0 }
  0x74   :  { %v8_v16 = vpop.permute.xlu0 %7   ;;  %v20_v17 = vpop.permute.xlu1 %19  }
  0x75   :  { %10 = vst.msk [vmem:[#allocation0] sm:$0x1] %vm9_vm1, %v8_v16  }
  0x78   :  { %v14_v18 = vpop.permute.xlu0 %13   ;;  %v26_v19 = vpop.permute.xlu1 %25  }
  0x79   :  { %16 = vst.msk [vmem:[#allocation0] sm:$0x1] %vm15_vm2, %v14_v18  }
  0x7a   :  { %22 = vst.msk [vmem:[#allocation0] sm:$0x1] %vm21_vm3, %v20_v17  }
  0x7b   :  { %28 = vst.msk [vmem:[#allocation0] sm:$0x1] %vm27_vm4, %v26_v19  }
  0x7c   :  { %v32_v20 = vpop.permute.xlu0 %31   ;;  %v38_v21 = vpop.permute.xlu1 %37  }
  0x7d   :  { %34 = vst.msk [vmem:[#allocation0] sm:$0x1] %vm33_vm5, %v32_v20  }
  0x7e   :  { %40 = vst.msk [vmem:[#allocation0] sm:$0x1] %vm39_vm6, %v38_v21  }
  0x80   :  { %v44_v22 = vpop.permute.xlu0 %43   ;;  %v50_v23 = vpop.permute.xlu1 %49  }
  0x81   :  { %46 = vst.msk [vmem:[#allocation0] sm:$0x1] %vm45_vm7, %v44_v22  }
  0x82   :  { %52 = vst.msk [vmem:[#allocation0] sm:$0x1] %vm51_vm8, %v50_v23  }
  0x84   :  { %v56_v24 = vpop.permute.xlu0 %55   ;;  %v62_v25 = vpop.permute.xlu1 %61  }
  0x85   :  { %58 = vst.msk [vmem:[#allocation0] sm:$0x1] %vm57_vm9, %v56_v24  }
  0x86   :  { %64 = vst.msk [vmem:[#allocation0] sm:$0x1] %vm63_vm10, %v62_v25  }
  0x88   :  { %v68_v26 = vpop.permute.xlu0 %67   ;;  %v74_v27 = vpop.permute.xlu1 %73  }
  0x89   :  { %70 = vst.msk [vmem:[#allocation0] sm:$0x1] %vm69_vm11, %v68_v26  }
  0x8a   :  { %76 = vst.msk [vmem:[#allocation0] sm:$0x1] %vm75_vm12, %v74_v27  }
  0x8c   :  { %v80_v28 = vpop.permute.xlu0 %79   ;;  %v86_v29 = vpop.permute.xlu1 %85  }
  0x8d   :  { %82 = vst.msk [vmem:[#allocation0] sm:$0x1] %vm81_vm13, %v80_v28  }
  0x8e   :  { %88 = vst.msk [vmem:[#allocation0] sm:$0x1] %vm87_vm14, %v86_v29  }
  0x90   :  { %v92_v30 = vpop.permute.xlu0 %91  }
  0x91   :  { %94 = vst.msk [vmem:[#allocation0] sm:$0x1] %vm93_vm15, %v92_v30  }
  0x98   :  { %v99_v31 = vld [vmem:[#allocation0] sm:$0x1] }
  0x99   :  { %102 = vst [vmem:[%s210_s1] sm:$0x1] %v99_v31 }

// kernel: unet_forward.10
= control target key start
LH: loop header
LB: loop body
LE: loop exit
PB: predicated region body
PF: predicated region fallthrough
CT: control target
= control target key end

     0   :  { %s1239_s15 = smov 0   ;;  %s1241_s16 = smov 0   ;;  %s1461_s0 = inlined_call_operand.vmem [shape: bf16[1,512,128], index: 0, kind: input, shape index: {}]   ;;  %s1462_s1 = inlined_call_operand.vmem [shape: bf16[1,128,8], index: 1, kind: input, shape index: {}]   ;;  %s1463_s2 = inlined_call_operand.vmem [shape: f32[1,8], index: 2, kind: input, shape index: {}]   ;;  %s1464_s3 = inlined_call_operand.vmem [shape: f32[1,8], index: 3, kind: input, shape index: {}]   ;;  %s1465_s4 = inlined_call_operand.vmem [shape: bf16[1,512,8], index: 4, kind: output, shape index: {}]  }
   0x1   :  { %s1243_s17 = smov 0  }
   0x2 LB: > { %s23_s18 = sadd.s32 1, %s1208_s16  ;;  %p957_p0 = scmp.ge.s32.totalorder %s1212_s17, 1  ;;  %s1212_s17 = sphi %s1243_s17, %s14_s17   ;;  %s1208_s16 = sphi %s1241_s16, %s1467_s16   ;;  %s1204_s15 = sphi %s1239_s15, %s1466_s15  }
   0x3   : > { %p24_p1 = scmp.ge.s32.totalorder %s23_s18, 2  ;;  %p193_p2 = scmp.lt.s32.totalorder %s1212_s17, 3 }
   0x5   : > { %s1469_s18 = smov (%p24_p1, %s23_s18), 0  ;;  %p194_p3 = pnand %p957_p0, %p193_p2 }
   0x6   : > { %s958_s21 = sshll.u32 (!%p194_p3), %s1204_s15, 5 }
   0x7   : > { %197 = sbr.rel (%p194_p3) target bundleno = 275 (0x113), region = 36  ;;  %p235_p4 = scmp.lt.s32.totalorder (!%p194_p3), %s958_s21, 63 }
   0xc   : > { %v1166_v0 = vld [vmem:[%s1462_s1 + $0x38] sm:$0xff]   ;;  %v1167_v1 = vld [vmem:[%s1462_s1 + $0x30] sm:$0xff]   ;;  %s1471_s21 = smov (!%p235_p4, %s958_s21), 63  ;;  %v1168_v2 = vld [vmem:[%s1462_s1 + $0x28] sm:$0xff]   ;;  %vm817_vm0 = vcmask 60416  }
   0xd   : > { %1078 = vmatprep.subr.bf16.mxu0 %v1166_v0  ;;  %1126 = vmatprep.subr.bf16.mxu1 %v1166_v0  ;;  %s959_s26 = sshll.u32 %s1471_s21, 2  ;;  %v1169_v3 = vld [vmem:[%s1462_s1 + $0x20] sm:$0xff]   ;;  %v1170_v6 = vld [vmem:[%s1462_s1 + $0x18] sm:$0xff]   ;;  %v1171_v7 = vld [vmem:[%s1462_s1 + $0x10] sm:$0xff]  }
   0xe   : > { %1079 = vmatpush3.bf16.msra.mxu0 %v1166_v0  ;;  %1134 = vmatpush3.bf16.msra.mxu1 %v1166_v0  ;;  %s1274_s29 = scalar_lea.vmem %s1461_s0, %s959_s26  ;;  %v1172_v8 = vld [vmem:[%s1462_s1 + $0x8] sm:$0xff]   ;;  %v1173_v9 = vld [vmem:[%s1462_s1] sm:$0xff]   ;;  %s1328_s24 = scalar_lea.vmem %s1465_s4, %s959_s26 }
   0xf   : > { %1080 = vmatprep.subr.bf16.mxu0 %v1167_v1  ;;  %1127 = vmatprep.subr.bf16.mxu1 %v1167_v1  ;;  %v1174_v4 = vld [vmem:[%s1274_s29] sm:$0xff]   ;;  %v1176_v10 = vld [vmem:[%s1274_s29 + $0x8] sm:$0xff]   ;;  %v1178_v12 = vld [vmem:[%s1274_s29 + $0x10] sm:$0xff]  }
  0x10   : > { %v1175_v5 = vld [vmem:[%s1274_s29 + $0x40] sm:$0xff]   ;;  %1094 = vmatprep.mubr.bf16.mxu0 %v1174_v4  ;;  %v1177_v11 = vld [vmem:[%s1274_s29 + $0x48] sm:$0xff]   ;;  %v1179_v13 = vld [vmem:[%s1274_s29 + $0x50] sm:$0xff]  }
  0x11   : > { %1110 = vmatprep.mubr.bf16.mxu1 %v1175_v5  ;;  %v1180_v14 = vld [vmem:[%s1274_s29 + $0x18] sm:$0xff]   ;;  %v1182_v16 = vld [vmem:[%s1274_s29 + $0x20] sm:$0xff]   ;;  %v1184_v18 = vld [vmem:[%s1274_s29 + $0x28] sm:$0xff]  }
  0x12   : > { %1081 = vmatpush3.bf16.msra.mxu0 %v1167_v1  ;;  %1135 = vmatpush3.bf16.msra.mxu1 %v1167_v1  ;;  %v1181_v15 = vld [vmem:[%s1274_s29 + $0x58] sm:$0xff]   ;;  %v1183_v17 = vld [vmem:[%s1274_s29 + $0x60] sm:$0xff]   ;;  %v1185_v19 = vld [vmem:[%s1274_s29 + $0x68] sm:$0xff]  }
  0x13   : > { %1082 = vmatprep.subr.bf16.mxu0 %v1168_v2  ;;  %1128 = vmatprep.subr.bf16.mxu1 %v1168_v2  ;;  %v1186_v20 = vld [vmem:[%s1274_s29 + $0x30] sm:$0xff]   ;;  %v1188_v22 = vld [vmem:[%s1274_s29 + $0x38] sm:$0xff]   ;;  %v1310_v24 = vld [vmem:[%s1463_s2] ss:$0 sm:$0xff] }
  0x14   : > { %v1187_v21 = vld [vmem:[%s1274_s29 + $0x70] sm:$0xff]   ;;  %v1189_v23 = vld [vmem:[%s1274_s29 + $0x78] sm:$0xff]   ;;  %v1315_v26 = vld [vmem:[%s1464_s3] ss:$0 sm:$0xff] }
  0x16   : > { %1083 = vmatpush3.bf16.msra.mxu0 %v1168_v2  ;;  %1136 = vmatpush3.bf16.msra.mxu1 %v1168_v2 }
  0x17   : > { %1084 = vmatprep.subr.bf16.mxu0 %v1169_v3  ;;  %1129 = vmatprep.subr.bf16.mxu1 %v1169_v3 }
  0x1a   : > { %1085 = vmatpush3.bf16.msra.mxu0 %v1169_v3  ;;  %1137 = vmatpush3.bf16.msra.mxu1 %v1169_v3 }
  0x1b   : > { %1086 = vmatprep.subr.bf16.mxu0 %v1170_v6  ;;  %1130 = vmatprep.subr.bf16.mxu1 %v1170_v6 }
  0x1e   : > { %1087 = vmatpush3.bf16.msra.mxu0 %v1170_v6  ;;  %1138 = vmatpush3.bf16.msra.mxu1 %v1170_v6 }
  0x1f   : > { %1088 = vmatprep.subr.bf16.mxu0 %v1171_v7  ;;  %1131 = vmatprep.subr.bf16.mxu1 %v1171_v7 }
  0x22   : > { %1089 = vmatpush3.bf16.msra.mxu0 %v1171_v7  ;;  %1139 = vmatpush3.bf16.msra.mxu1 %v1171_v7 }
  0x23   : > { %1090 = vmatprep.subr.bf16.mxu0 %v1172_v8  ;;  %1132 = vmatprep.subr.bf16.mxu1 %v1172_v8 }
  0x26   : > { %1091 = vmatpush3.bf16.msra.mxu0 %v1172_v8  ;;  %1140 = vmatpush3.bf16.msra.mxu1 %v1172_v8 }
  0x27   : > { %1092 = vmatprep.subr.bf16.mxu0 %v1173_v9  ;;  %1133 = vmatprep.subr.bf16.mxu1 %v1173_v9 }
  0x2a   : > { %1093 = vmatpush3.bf16.msra.mxu0 %v1173_v9  ;;  %1141 = vmatpush3.bf16.msra.mxu1 %v1173_v9 }
  0x2d   : > { %1095 = vmatmul.mubr.bf16.vlgmr.msra.gmra.mxu0 %v1176_v10  ;;  %1111 = vmatmul.mubr.bf16.vlgmr.msra.gmra.mxu1 %v1177_v11 }
  0x2e   : > { %1098 = vmatprep.mubr.bf16.mxu0 %v1178_v12  ;;  %1114 = vmatprep.mubr.bf16.mxu1 %v1179_v13 }
  0x35   : > { %1099 = vmatmul.mubr.bf16.gmra.mxu0 %v1180_v14  ;;  %1115 = vmatmul.mubr.bf16.gmra.mxu1 %v1181_v15 }
  0x36   : > { %1102 = vmatprep.mubr.bf16.mxu0 %v1182_v16  ;;  %1118 = vmatprep.mubr.bf16.mxu1 %v1183_v17 }
  0x3d   : > { %1103 = vmatmul.mubr.bf16.gmra.mxu0 %v1184_v18  ;;  %1119 = vmatmul.mubr.bf16.gmra.mxu1 %v1185_v19 }
  0x3e   : > { %1106 = vmatprep.mubr.bf16.mxu0 %v1186_v20  ;;  %1122 = vmatprep.mubr.bf16.mxu1 %v1187_v21 }
  0x45   : > { %1107 = vmatmul.mubr.bf16.gmra.mxu0 %v1188_v22  ;;  %1123 = vmatmul.mubr.bf16.gmra.mxu1 %v1189_v23 }
  0xed   : > { %v1096_v25 = vpop.f32.mrf.mxu0  ;;  %v1112_v27 = vpop.f32.mrf.mxu1 }
  0xee   : > { %v620_v28 = vmul.f32 %v1096_v25, %v1310_v24  ;;  %v636_v29 = vmul.f32 %v1112_v27, %v1310_v24 }
  0xef   : > { %v484_v30 = vpop.f32.mrf.mxu0  ;;  %v548_v31 = vpop.f32.mrf.mxu1 }
  0xf0   : > { %v659_v32 = vadd.f32 %v1315_v26, %v620_v28  ;;  %v675_v33 = vadd.f32 %v1315_v26, %v636_v29  ;;  %v618_v34 = vmul.f32 %v1310_v24, %v484_v30  ;;  %v634_v35 = vmul.f32 %v1310_v24, %v548_v31 }
  0xf1   : > { %v1097_v36 = vpop.f32.mrf.mxu0  ;;  %v1113_v37 = vpop.f32.mrf.mxu1 }
  0xf2   : > { %v1024_v38 = vpack.c.bf16 %v659_v32, %v659_v32  ;;  %v1040_v39 = vpack.c.bf16 %v675_v33, %v675_v33  ;;  %v657_v40 = vadd.f32 %v1315_v26, %v618_v34  ;;  %v673_v41 = vadd.f32 %v1315_v26, %v634_v35 }
  0xf3   : > { %v621_v42 = vmul.f32 %v1097_v36, %v1310_v24  ;;  %v637_v43 = vmul.f32 %v1113_v37, %v1310_v24  ;;  %v487_v44 = vpop.f32.mrf.mxu0  ;;  %v551_v45 = vpop.f32.mrf.mxu1 }
  0xf4   : > { %820 = vst.msk [vmem:[%s1328_s24 + $0x8] sm:$0xf] %vm817_vm0, %v1024_v38  ;;  %836 = vst.msk [vmem:[%s1328_s24 + $0x48] sm:$0xf] %vm817_vm0, %v1040_v39  ;;  %v1022_v46 = vpack.c.bf16 %v657_v40, %v657_v40  ;;  %v1038_v47 = vpack.c.bf16 %v673_v41, %v673_v41  ;;  %v619_v48 = vmul.f32 %v1310_v24, %v487_v44 }
  0xf5   : > { %v635_v49 = vmul.f32 %v1310_v24, %v551_v45  ;;  %v660_v50 = vadd.f32 %v1315_v26, %v621_v42  ;;  %v676_v51 = vadd.f32 %v1315_v26, %v637_v43  ;;  %v1100_v52 = vpop.f32.mrf.mxu0  ;;  %v1116_v53 = vpop.f32.mrf.mxu1 }
  0xf6   : > { %818 = vst.msk [vmem:[%s1328_s24] sm:$0xf] %vm817_vm0, %v1022_v46  ;;  %834 = vst.msk [vmem:[%s1328_s24 + $0x40] sm:$0xf] %vm817_vm0, %v1038_v47  ;;  %v658_v54 = vadd.f32 %v1315_v26, %v619_v48  ;;  %v624_v56 = vmul.f32 %v1100_v52, %v1310_v24  ;;  %v640_v57 = vmul.f32 %v1116_v53, %v1310_v24 }
  0xf7   : > { %v674_v55 = vadd.f32 %v1315_v26, %v635_v49  ;;  %v1025_v58 = vpack.c.bf16 %v660_v50, %v660_v50  ;;  %v1041_v59 = vpack.c.bf16 %v676_v51, %v676_v51  ;;  %v500_v60 = vpop.f32.mrf.mxu0  ;;  %v564_v61 = vpop.f32.mrf.mxu1 }
  0xf8   : > { %v1023_v62 = vpack.c.bf16 %v658_v54, %v658_v54  ;;  %v663_v0 = vadd.f32 %v1315_v26, %v624_v56  ;;  %v679_v1 = vadd.f32 %v1315_v26, %v640_v57  ;;  %v622_v2 = vmul.f32 %v1310_v24, %v500_v60 }
  0xf9   : > { %v1039_v63 = vpack.c.bf16 %v674_v55, %v674_v55  ;;  %821 = vst.msk [vmem:[%s1328_s24 + $0xc] sm:$0xf] %vm817_vm0, %v1025_v58  ;;  %837 = vst.msk [vmem:[%s1328_s24 + $0x4c] sm:$0xf] %vm817_vm0, %v1041_v59  ;;  %v638_v3 = vmul.f32 %v1310_v24, %v564_v61  ;;  %v1101_v4 = vpop.f32.mrf.mxu0  ;;  %v1117_v5 = vpop.f32.mrf.mxu1 }
  0xfa   : > { %819 = vst.msk [vmem:[%s1328_s24 + $0x4] sm:$0xf] %vm817_vm0, %v1023_v62  ;;  %v1028_v6 = vpack.c.bf16 %v663_v0, %v663_v0  ;;  %v1044_v7 = vpack.c.bf16 %v679_v1, %v679_v1  ;;  %v625_v8 = vmul.f32 %v1101_v4, %v1310_v24  ;;  %v641_v9 = vmul.f32 %v1117_v5, %v1310_v24 }
  0xfb   : > { %835 = vst.msk [vmem:[%s1328_s24 + $0x44] sm:$0xf] %vm817_vm0, %v1039_v63  ;;  %v661_v10 = vadd.f32 %v1315_v26, %v622_v2  ;;  %v677_v11 = vadd.f32 %v1315_v26, %v638_v3  ;;  %v503_v12 = vpop.f32.mrf.mxu0  ;;  %v567_v13 = vpop.f32.mrf.mxu1 }
  0xfc   : > { %824 = vst.msk [vmem:[%s1328_s24 + $0x18] sm:$0xf] %vm817_vm0, %v1028_v6  ;;  %840 = vst.msk [vmem:[%s1328_s24 + $0x58] sm:$0xf] %vm817_vm0, %v1044_v7  ;;  %v664_v14 = vadd.f32 %v1315_v26, %v625_v8  ;;  %v680_v15 = vadd.f32 %v1315_v26, %v641_v9  ;;  %v623_v16 = vmul.f32 %v1310_v24, %v503_v12 }
  0xfd   : > { %v639_v17 = vmul.f32 %v1310_v24, %v567_v13  ;;  %v1026_v18 = vpack.c.bf16 %v661_v10, %v661_v10  ;;  %v1042_v19 = vpack.c.bf16 %v677_v11, %v677_v11  ;;  %v1104_v20 = vpop.f32.mrf.mxu0  ;;  %v1120_v21 = vpop.f32.mrf.mxu1 }
  0xfe   : > { %v1029_v22 = vpack.c.bf16 %v664_v14, %v664_v14  ;;  %v1045_v23 = vpack.c.bf16 %v680_v15, %v680_v15  ;;  %v662_v25 = vadd.f32 %v1315_v26, %v623_v16  ;;  %v628_v28 = vmul.f32 %v1104_v20, %v1310_v24 }
  0xff   : > { %v678_v27 = vadd.f32 %v1315_v26, %v639_v17  ;;  %822 = vst.msk [vmem:[%s1328_s24 + $0x10] sm:$0xf] %vm817_vm0, %v1026_v18  ;;  %838 = vst.msk [vmem:[%s1328_s24 + $0x50] sm:$0xf] %vm817_vm0, %v1042_v19  ;;  %v644_v29 = vmul.f32 %v1120_v21, %v1310_v24  ;;  %v516_v30 = vpop.f32.mrf.mxu0  ;;  %v580_v31 = vpop.f32.mrf.mxu1 }
 0x100   : > { %825 = vst.msk [vmem:[%s1328_s24 + $0x1c] sm:$0xf] %vm817_vm0, %v1029_v22  ;;  %841 = vst.msk [vmem:[%s1328_s24 + $0x5c] sm:$0xf] %vm817_vm0, %v1045_v23  ;;  %v1027_v32 = vpack.c.bf16 %v662_v25, %v662_v25  ;;  %v626_v34 = vmul.f32 %v1310_v24, %v516_v30  ;;  %v642_v35 = vmul.f32 %v1310_v24, %v580_v31 }
 0x101   : > { %v1043_v33 = vpack.c.bf16 %v678_v27, %v678_v27  ;;  %v667_v36 = vadd.f32 %v1315_v26, %v628_v28  ;;  %v683_v37 = vadd.f32 %v1315_v26, %v644_v29  ;;  %v1105_v38 = vpop.f32.mrf.mxu0  ;;  %v1121_v39 = vpop.f32.mrf.mxu1 }
 0x102   : > { %823 = vst.msk [vmem:[%s1328_s24 + $0x14] sm:$0xf] %vm817_vm0, %v1027_v32  ;;  %v665_v40 = vadd.f32 %v1315_v26, %v626_v34  ;;  %v681_v41 = vadd.f32 %v1315_v26, %v642_v35  ;;  %v629_v42 = vmul.f32 %v1105_v38, %v1310_v24  ;;  %v645_v43 = vmul.f32 %v1121_v39, %v1310_v24 }
 0x103   : > { %839 = vst.msk [vmem:[%s1328_s24 + $0x54] sm:$0xf] %vm817_vm0, %v1043_v33  ;;  %v1032_v44 = vpack.c.bf16 %v667_v36, %v667_v36  ;;  %v1048_v45 = vpack.c.bf16 %v683_v37, %v683_v37  ;;  %v519_v46 = vpop.f32.mrf.mxu0  ;;  %v583_v47 = vpop.f32.mrf.mxu1 }
 0x104   : > { %v1030_v48 = vpack.c.bf16 %v665_v40, %v665_v40  ;;  %v1046_v49 = vpack.c.bf16 %v681_v41, %v681_v41  ;;  %v668_v50 = vadd.f32 %v1315_v26, %v629_v42  ;;  %v684_v51 = vadd.f32 %v1315_v26, %v645_v43 }
 0x105   : > { %828 = vst.msk [vmem:[%s1328_s24 + $0x28] sm:$0xf] %vm817_vm0, %v1032_v44  ;;  %844 = vst.msk [vmem:[%s1328_s24 + $0x68] sm:$0xf] %vm817_vm0, %v1048_v45  ;;  %v627_v52 = vmul.f32 %v1310_v24, %v519_v46  ;;  %v643_v53 = vmul.f32 %v1310_v24, %v583_v47  ;;  %v1108_v54 = vpop.f32.mrf.mxu0  ;;  %v1124_v55 = vpop.f32.mrf.mxu1 }
 0x106   : > { %826 = vst.msk [vmem:[%s1328_s24 + $0x20] sm:$0xf] %vm817_vm0, %v1030_v48  ;;  %842 = vst.msk [vmem:[%s1328_s24 + $0x60] sm:$0xf] %vm817_vm0, %v1046_v49  ;;  %v1033_v56 = vpack.c.bf16 %v668_v50, %v668_v50  ;;  %v1049_v57 = vpack.c.bf16 %v684_v51, %v684_v51  ;;  %v632_v58 = vmul.f32 %v1108_v54, %v1310_v24 }
 0x107   : > { %v648_v59 = vmul.f32 %v1124_v55, %v1310_v24  ;;  %v666_v60 = vadd.f32 %v1315_v26, %v627_v52  ;;  %v682_v61 = vadd.f32 %v1315_v26, %v643_v53  ;;  %v532_v62 = vpop.f32.mrf.mxu0  ;;  %v596_v63 = vpop.f32.mrf.mxu1 }
 0x108   : > { %829 = vst.msk [vmem:[%s1328_s24 + $0x2c] sm:$0xf] %vm817_vm0, %v1033_v56  ;;  %845 = vst.msk [vmem:[%s1328_s24 + $0x6c] sm:$0xf] %vm817_vm0, %v1049_v57  ;;  %v671_v0 = vadd.f32 %v1315_v26, %v632_v58  ;;  %v630_v2 = vmul.f32 %v1310_v24, %v532_v62  ;;  %v646_v3 = vmul.f32 %v1310_v24, %v596_v63 }
 0x109   : > { %v687_v1 = vadd.f32 %v1315_v26, %v648_v59  ;;  %v1031_v4 = vpack.c.bf16 %v666_v60, %v666_v60  ;;  %v1047_v5 = vpack.c.bf16 %v682_v61, %v682_v61  ;;  %v1109_v6 = vpop.f32.mrf.mxu0  ;;  %v1125_v7 = vpop.f32.mrf.mxu1 }
 0x10a   : > { %v1036_v8 = vpack.c.bf16 %v671_v0, %v671_v0  ;;  %v669_v10 = vadd.f32 %v1315_v26, %v630_v2  ;;  %v685_v11 = vadd.f32 %v1315_v26, %v646_v3  ;;  %v633_v12 = vmul.f32 %v1109_v6, %v1310_v24 }
 0x10b   : > { %v1052_v9 = vpack.c.bf16 %v687_v1, %v687_v1  ;;  %827 = vst.msk [vmem:[%s1328_s24 + $0x24] sm:$0xf] %vm817_vm0, %v1031_v4  ;;  %843 = vst.msk [vmem:[%s1328_s24 + $0x64] sm:$0xf] %vm817_vm0, %v1047_v5  ;;  %v649_v13 = vmul.f32 %v1125_v7, %v1310_v24  ;;  %v535_v14 = vpop.f32.mrf.mxu0  ;;  %v599_v15 = vpop.f32.mrf.mxu1 }
 0x10c   : > { %832 = vst.msk [vmem:[%s1328_s24 + $0x38] sm:$0xf] %vm817_vm0, %v1036_v8  ;;  %v1034_v16 = vpack.c.bf16 %v669_v10, %v669_v10  ;;  %v1050_v17 = vpack.c.bf16 %v685_v11, %v685_v11  ;;  %v631_v18 = vmul.f32 %v1310_v24, %v535_v14  ;;  %v647_v19 = vmul.f32 %v1310_v24, %v599_v15 }
 0x10d   : > { %848 = vst.msk [vmem:[%s1328_s24 + $0x78] sm:$0xf] %vm817_vm0, %v1052_v9  ;;  %v672_v20 = vadd.f32 %v1315_v26, %v633_v12  ;;  %v688_v21 = vadd.f32 %v1315_v26, %v649_v13 }
 0x10e   : > { %830 = vst.msk [vmem:[%s1328_s24 + $0x30] sm:$0xf] %vm817_vm0, %v1034_v16  ;;  %846 = vst.msk [vmem:[%s1328_s24 + $0x70] sm:$0xf] %vm817_vm0, %v1050_v17  ;;  %v670_v22 = vadd.f32 %v1315_v26, %v631_v18  ;;  %v686_v23 = vadd.f32 %v1315_v26, %v647_v19 }
 0x10f   : > { %v1037_v25 = vpack.c.bf16 %v672_v20, %v672_v20  ;;  %v1053_v27 = vpack.c.bf16 %v688_v21, %v688_v21 }
 0x110   : > { %v1035_v28 = vpack.c.bf16 %v670_v22, %v670_v22  ;;  %v1051_v29 = vpack.c.bf16 %v686_v23, %v686_v23 }
 0x111   : > { %833 = vst.msk [vmem:[%s1328_s24 + $0x3c] sm:$0xf] %vm817_vm0, %v1037_v25  ;;  %849 = vst.msk [vmem:[%s1328_s24 + $0x7c] sm:$0xf] %vm817_vm0, %v1053_v27 }
 0x112   : > { %831 = vst.msk [vmem:[%s1328_s24 + $0x34] sm:$0xf] %vm817_vm0, %v1035_v28  ;;  %847 = vst.msk [vmem:[%s1328_s24 + $0x74] sm:$0xf] %vm817_vm0, %v1051_v29 }
 0x113 PF: > { %s14_s17 = sadd.s32 1, %s1212_s17   ;;  %s1466_s15 = smov %s1208_s16 }
 0x114   : > { %p11_p5 = scmp.ge.s32.totalorder %s14_s17, 4   ;;  %s1467_s16 = smov %s1469_s18 }
 0x116   :  { %13 = sbr.rel (!%p11_p5) target bundleno = 2 (0x2), region = 69 }

// kernel: unet_forward.11
= control target key start
LH: loop header
LB: loop body
LE: loop exit
PB: predicated region body
PF: predicated region fallthrough
CT: control target
= control target key end

     0   :  { %s771_s15 = smov 0   ;;  %s773_s16 = smov 0   ;;  %s865_s0 = inlined_call_operand.vmem [shape: bf16[1,128,128], index: 0, kind: input, shape index: {}]   ;;  %s866_s1 = inlined_call_operand.vmem [shape: bf16[1,128,16], index: 1, kind: input, shape index: {}]   ;;  %s867_s2 = inlined_call_operand.vmem [shape: f32[1,16], index: 2, kind: input, shape index: {}]   ;;  %s868_s3 = inlined_call_operand.vmem [shape: f32[1,16], index: 3, kind: input, shape index: {}]   ;;  %s869_s4 = inlined_call_operand.vmem [shape: bf16[1,128,16], index: 4, kind: output, shape index: {}]  }
   0x1   :  { %s775_s17 = smov 0  }
   0x2 LB: > { %s23_s18 = sadd.s32 1, %s740_s16  ;;  %p597_p0 = scmp.ge.s32.totalorder %s744_s17, 1  ;;  %s744_s17 = sphi %s775_s17, %s14_s17   ;;  %s740_s16 = sphi %s773_s16, %s871_s16   ;;  %s736_s15 = sphi %s771_s15, %s870_s15  }
   0x3   : > { %p24_p1 = scmp.ge.s32.totalorder %s23_s18, 2  ;;  %p193_p2 = scmp.lt.s32.totalorder %s744_s17, 3 }
   0x5   : > { %s873_s18 = smov (%p24_p1, %s23_s18), 0  ;;  %p194_p3 = pnand %p597_p0, %p193_p2 }
   0x6   : > { %s598_s21 = sshll.u32 (!%p194_p3), %s736_s15, 3 }
   0x7   : > { %197 = sbr.rel (%p194_p3) target bundleno = 252 (0xfc), region = 36  ;;  %p235_p4 = scmp.lt.s32.totalorder (!%p194_p3), %s598_s21, 15 }
   0xc   : > { %v710_v0 = vld [vmem:[%s866_s1 + $0x38] sm:$0xff]   ;;  %v711_v1 = vld [vmem:[%s866_s1 + $0x30] sm:$0xff]   ;;  %s875_s21 = smov (!%p235_p4, %s598_s21), 15  ;;  %v712_v2 = vld [vmem:[%s866_s1 + $0x28] sm:$0xff]   ;;  %vm481_vm0 = vcmask 125952  }
   0xd   : > { %646 = vmatprep.subr.bf16.mxu0 %v710_v0  ;;  %670 = vmatprep.subr.bf16.mxu1 %v710_v0  ;;  %s599_s26 = sshll.u32 %s875_s21, 2  ;;  %v713_v3 = vld [vmem:[%s866_s1 + $0x20] sm:$0xff]   ;;  %v714_v6 = vld [vmem:[%s866_s1 + $0x18] sm:$0xff]   ;;  %v715_v7 = vld [vmem:[%s866_s1 + $0x10] sm:$0xff]  }
   0xe   : > { %647 = vmatpush3.bf16.msra.mxu0 %v710_v0  ;;  %678 = vmatpush3.bf16.msra.mxu1 %v710_v0  ;;  %s806_s29 = scalar_lea.vmem %s865_s0, %s599_s26  ;;  %v716_v8 = vld [vmem:[%s866_s1 + $0x8] sm:$0xff]   ;;  %v717_v9 = vld [vmem:[%s866_s1] sm:$0xff]   ;;  %s838_s24 = scalar_lea.vmem %s869_s4, %s599_s26 }
   0xf   : > { %648 = vmatprep.subr.bf16.mxu0 %v711_v1  ;;  %671 = vmatprep.subr.bf16.mxu1 %v711_v1  ;;  %v718_v4 = vld [vmem:[%s806_s29] sm:$0xff]   ;;  %v719_v5 = vld [vmem:[%s806_s29 + $0x10] sm:$0xff]   ;;  %v720_v10 = vld [vmem:[%s806_s29 + $0x8] sm:$0xff]  }
  0x10   : > { %662 = vmatprep.mubr.bf16.mxu0 %v718_v4  ;;  %666 = vmatprep.mubr.bf16.mxu1 %v719_v5  ;;  %v721_v11 = vld [vmem:[%s806_s29 + $0x18] sm:$0xff]   ;;  %v614_v12 = vld [vmem:[%s867_s2] ss:$0 sm:$0xff] }
  0x11   : > { %v615_v14 = vld [vmem:[%s868_s3] ss:$0 sm:$0xff] }
  0x12   : > { %649 = vmatpush3.bf16.msra.mxu0 %v711_v1  ;;  %679 = vmatpush3.bf16.msra.mxu1 %v711_v1 }
  0x13   : > { %650 = vmatprep.subr.bf16.mxu0 %v712_v2  ;;  %672 = vmatprep.subr.bf16.mxu1 %v712_v2 }
  0x16   : > { %651 = vmatpush3.bf16.msra.mxu0 %v712_v2  ;;  %680 = vmatpush3.bf16.msra.mxu1 %v712_v2 }
  0x17   : > { %652 = vmatprep.subr.bf16.mxu0 %v713_v3  ;;  %673 = vmatprep.subr.bf16.mxu1 %v713_v3 }
  0x1a   : > { %653 = vmatpush3.bf16.msra.mxu0 %v713_v3  ;;  %681 = vmatpush3.bf16.msra.mxu1 %v713_v3 }
  0x1b   : > { %654 = vmatprep.subr.bf16.mxu0 %v714_v6  ;;  %674 = vmatprep.subr.bf16.mxu1 %v714_v6 }
  0x1e   : > { %655 = vmatpush3.bf16.msra.mxu0 %v714_v6  ;;  %682 = vmatpush3.bf16.msra.mxu1 %v714_v6 }
  0x1f   : > { %656 = vmatprep.subr.bf16.mxu0 %v715_v7  ;;  %675 = vmatprep.subr.bf16.mxu1 %v715_v7 }
  0x22   : > { %657 = vmatpush3.bf16.msra.mxu0 %v715_v7  ;;  %683 = vmatpush3.bf16.msra.mxu1 %v715_v7 }
  0x23   : > { %658 = vmatprep.subr.bf16.mxu0 %v716_v8  ;;  %676 = vmatprep.subr.bf16.mxu1 %v716_v8 }
  0x26   : > { %659 = vmatpush3.bf16.msra.mxu0 %v716_v8  ;;  %684 = vmatpush3.bf16.msra.mxu1 %v716_v8 }
  0x27   : > { %660 = vmatprep.subr.bf16.mxu0 %v717_v9  ;;  %677 = vmatprep.subr.bf16.mxu1 %v717_v9 }
  0x2a   : > { %661 = vmatpush3.bf16.msra.mxu0 %v717_v9  ;;  %685 = vmatpush3.bf16.msra.mxu1 %v717_v9 }
  0x2d   : > { %663 = vmatmul.mubr.bf16.vlgmr.msra.gmra.mxu0 %v720_v10  ;;  %667 = vmatmul.mubr.bf16.vlgmr.msra.gmra.mxu1 %v721_v11 }
  0xed   : > { %v664_v13 = vpop.f32.mrf.mxu0  ;;  %v668_v15 = vpop.f32.mrf.mxu1 }
  0xee   : > { %v428_v16 = vmul.f32 %v664_v13, %v614_v12  ;;  %v432_v17 = vmul.f32 %v668_v15, %v614_v12 }
  0xef   : > { %v388_v18 = vpop.f32.mrf.mxu0  ;;  %v404_v19 = vpop.f32.mrf.mxu1 }
  0xf0   : > { %v443_v20 = vadd.f32 %v615_v14, %v428_v16  ;;  %v447_v21 = vadd.f32 %v615_v14, %v432_v17  ;;  %v426_v22 = vmul.f32 %v614_v12, %v388_v18  ;;  %v430_v23 = vmul.f32 %v614_v12, %v404_v19 }
  0xf1   : > { %v665_v24 = vpop.f32.mrf.mxu0  ;;  %v669_v25 = vpop.f32.mrf.mxu1 }
  0xf2   : > { %v628_v26 = vpack.c.bf16 %v443_v20, %v443_v20  ;;  %v632_v27 = vpack.c.bf16 %v447_v21, %v447_v21  ;;  %v441_v28 = vadd.f32 %v615_v14, %v426_v22  ;;  %v445_v29 = vadd.f32 %v615_v14, %v430_v23 }
  0xf3   : > { %v429_v30 = vmul.f32 %v665_v24, %v614_v12  ;;  %v433_v31 = vmul.f32 %v669_v25, %v614_v12  ;;  %v391_v32 = vpop.f32.mrf.mxu0  ;;  %v407_v33 = vpop.f32.mrf.mxu1 }
  0xf4   : > { %484 = vst.msk [vmem:[%s838_s24 + $0x8] sm:$0xf] %vm481_vm0, %v628_v26  ;;  %488 = vst.msk [vmem:[%s838_s24 + $0x18] sm:$0xf] %vm481_vm0, %v632_v27  ;;  %v626_v34 = vpack.c.bf16 %v441_v28, %v441_v28  ;;  %v630_v35 = vpack.c.bf16 %v445_v29, %v445_v29  ;;  %v427_v36 = vmul.f32 %v614_v12, %v391_v32 }
  0xf5   : > { %v431_v37 = vmul.f32 %v614_v12, %v407_v33  ;;  %v444_v38 = vadd.f32 %v615_v14, %v429_v30  ;;  %v448_v39 = vadd.f32 %v615_v14, %v433_v31 }
  0xf6   : > { %482 = vst.msk [vmem:[%s838_s24] sm:$0xf] %vm481_vm0, %v626_v34  ;;  %486 = vst.msk [vmem:[%s838_s24 + $0x10] sm:$0xf] %vm481_vm0, %v630_v35  ;;  %v442_v40 = vadd.f32 %v615_v14, %v427_v36 }
  0xf7   : > { %v446_v41 = vadd.f32 %v615_v14, %v431_v37  ;;  %v629_v42 = vpack.c.bf16 %v444_v38, %v444_v38  ;;  %v633_v43 = vpack.c.bf16 %v448_v39, %v448_v39 }
  0xf8   : > { %v627_v44 = vpack.c.bf16 %v442_v40, %v442_v40 }
  0xf9   : > { %v631_v45 = vpack.c.bf16 %v446_v41, %v446_v41  ;;  %485 = vst.msk [vmem:[%s838_s24 + $0xc] sm:$0xf] %vm481_vm0, %v629_v42  ;;  %489 = vst.msk [vmem:[%s838_s24 + $0x1c] sm:$0xf] %vm481_vm0, %v633_v43 }
  0xfa   : > { %483 = vst.msk [vmem:[%s838_s24 + $0x4] sm:$0xf] %vm481_vm0, %v627_v44 }
  0xfb   : > { %487 = vst.msk [vmem:[%s838_s24 + $0x14] sm:$0xf] %vm481_vm0, %v631_v45 }
  0xfc PF: > { %s14_s17 = sadd.s32 1, %s744_s17   ;;  %s870_s15 = smov %s740_s16 }
  0xfd   : > { %p11_p5 = scmp.ge.s32.totalorder %s14_s17, 4   ;;  %s871_s16 = smov %s873_s18 }
  0xff   :  { %13 = sbr.rel (!%p11_p5) target bundleno = 2 (0x2), region = 69 }

// kernel: unet_forward.12
= control target key start
LH: loop header
LB: loop body
LE: loop exit
PB: predicated region body
PF: predicated region fallthrough
CT: control target
= control target key end

     0   :  { %s728_s15 = smov 0   ;;  %s730_s16 = smov 0   ;;  %s819_s0 = inlined_call_operand.vmem [shape: bf16[1,32,256], index: 0, kind: input, shape index: {}]   ;;  %s820_s1 = inlined_call_operand.vmem [shape: bf16[1,256,32], index: 1, kind: input, shape index: {}]   ;;  %s821_s2 = inlined_call_operand.vmem [shape: f32[1,32], index: 2, kind: input, shape index: {}]   ;;  %s822_s3 = inlined_call_operand.vmem [shape: f32[1,32], index: 3, kind: input, shape index: {}]   ;;  %s823_s4 = inlined_call_operand.vmem [shape: bf16[1,32,32], index: 4, kind: output, shape index: {}]  }
   0x1   :  { %s732_s17 = smov 0  }
   0x2 LB: > { %s23_s18 = sadd.s32 1, %s697_s16  ;;  %p581_p0 = scmp.ge.s32.totalorder %s701_s17, 1  ;;  %s701_s17 = sphi %s732_s17, %s14_s17   ;;  %s697_s16 = sphi %s730_s16, %s825_s16   ;;  %s693_s15 = sphi %s728_s15, %s824_s15  }
   0x3   : > { %p24_p1 = scmp.ge.s32.totalorder %s23_s18, 2  ;;  %p194_p2 = scmp.lt.s32.totalorder %s701_s17, 3 }
   0x5   : > { %s827_s18 = smov (%p24_p1, %s23_s18), 0  ;;  %p195_p3 = pnand %p581_p0, %p194_p2 }
   0x6   : > { %s582_s21 = sshll.u32 (!%p195_p3), %s693_s15, 1 }
   0x7   : > { %198 = sbr.rel (%p195_p3) target bundleno = 253 (0xfd), region = 36  ;;  %p237_p4 = scmp.lt.s32.totalorder (!%p195_p3), %s582_s21, 3 }
   0xc   : > { %v660_v0 = vld [vmem:[%s820_s1 + $0x78] sm:$0xff]   ;;  %v662_v2 = vld [vmem:[%s820_s1 + $0x70] sm:$0xff]   ;;  %v664_v4 = vld [vmem:[%s820_s1 + $0x68] sm:$0xff]   ;;  %s829_s21 = smov (!%p237_p4, %s582_s21), 3  ;;  %vm468_vm0 = vcmask 257024  }
   0xd   : > { %v661_v1 = vld [vmem:[%s820_s1 + $0x38] sm:$0xff]   ;;  %614 = vmatprep.subr.bf16.mxu0 %v660_v0  ;;  %v663_v3 = vld [vmem:[%s820_s1 + $0x30] sm:$0xff]   ;;  %v665_v5 = vld [vmem:[%s820_s1 + $0x28] sm:$0xff]   ;;  %s611_s10 = sshll.u32 %s829_s21, 3  ;;  %s586_s12 = sshll.u32 %s829_s21, 2 }
   0xe   : > { %615 = vmatpush3.bf16.msra.mxu0 %v661_v1  ;;  %v666_v6 = vld [vmem:[%s820_s1 + $0x60] sm:$0xff]   ;;  %v668_v8 = vld [vmem:[%s820_s1 + $0x58] sm:$0xff]   ;;  %s243_s15 = scalar_lea.vmem %s819_s0, %s611_s10  ;;  %v670_v10 = vld [vmem:[%s820_s1 + $0x50] sm:$0xff]  }
   0xf   : > { %616 = vmatprep.subr.bf16.mxu0 %v662_v2  ;;  %v667_v7 = vld [vmem:[%s820_s1 + $0x20] sm:$0xff]   ;;  %v669_v9 = vld [vmem:[%s820_s1 + $0x18] sm:$0xff]   ;;  %v671_v12 = vld [vmem:[%s820_s1 + $0x10] sm:$0xff]  }
  0x10   : > { %v678_v11 = vld [vmem:[%s243_s15 + $0x4] ss:$8 sps:$4 sm:$0xff]   ;;  %v676_v17 = vld [vmem:[%s243_s15] ss:$8 sps:$4 sm:$0xff]   ;;  %s258_s15 = scalar_lea.vmem %s823_s4, %s586_s12 }
  0x11   : > { %433 = vmatprep.mubr.bf16.mxu0 %v678_v11  ;;  %v672_v13 = vld [vmem:[%s820_s1 + $0x48] sm:$0xff]   ;;  %v674_v15 = vld [vmem:[%s820_s1 + $0x40] sm:$0xff]  }
  0x12   : > { %617 = vmatpush3.bf16.msra.mxu0 %v663_v3  ;;  %v673_v14 = vld [vmem:[%s820_s1 + $0x8] sm:$0xff]   ;;  %v675_v16 = vld [vmem:[%s820_s1] sm:$0xff]  }
  0x13   : > { %618 = vmatprep.subr.bf16.mxu0 %v664_v4  ;;  %v605_v20 = vld [vmem:[%s821_s2] ss:$0 sm:$0xff] }
  0x14   : > { %v606_v22 = vld [vmem:[%s822_s3] ss:$0 sm:$0xff] }
  0x16   : > { %619 = vmatpush3.bf16.msra.mxu0 %v665_v5 }
  0x17   : > { %620 = vmatprep.subr.bf16.mxu0 %v666_v6 }
  0x1a   : > { %621 = vmatpush3.bf16.msra.mxu0 %v667_v7 }
  0x1b   : > { %622 = vmatprep.subr.bf16.mxu0 %v668_v8 }
  0x1e   : > { %623 = vmatpush3.bf16.msra.mxu0 %v669_v9 }
  0x1f   : > { %624 = vmatprep.subr.bf16.mxu0 %v670_v10 }
  0x22   : > { %625 = vmatpush3.bf16.msra.mxu0 %v671_v12 }
  0x23   : > { %626 = vmatprep.subr.bf16.mxu0 %v672_v13 }
  0x26   : > { %627 = vmatpush3.bf16.msra.mxu0 %v673_v14 }
  0x27   : > { %628 = vmatprep.subr.bf16.mxu0 %v674_v15 }
  0x2a   : > { %629 = vmatpush3.bf16.msra.mxu0 %v675_v16 }
  0x2d   : > { %434 = vmatmul.mubr.bf16.vlgmr.msra.gmra.mxu0 %v676_v17 }
  0xed   : > { %v630_v18 = vpop.f32.mrf.mxu0 }
  0xef   : > { %v631_v19 = vpop.f32.mrf.mxu0 }
  0xf0   : > { %v632_v21 = vadd.f32 %v631_v19, %v630_v18 }
  0xf1   : > { %v633_v23 = vpop.f32.mrf.mxu0 }
  0xf2   : > { %v449_v24 = vmul.f32 %v632_v21, %v605_v20 }
  0xf3   : > { %v634_v25 = vpop.f32.mrf.mxu0 }
  0xf4   : > { %v458_v26 = vadd.f32 %v606_v22, %v449_v24  ;;  %v635_v27 = vadd.f32 %v634_v25, %v633_v23 }
  0xf6   : > { %v612_v28 = vpack.c.bf16 %v458_v26, %v458_v26  ;;  %v450_v29 = vmul.f32 %v635_v27, %v605_v20 }
  0xf8   : > { %469 = vst.msk [vmem:[%s258_s15] sm:$0xf] %vm468_vm0, %v612_v28  ;;  %v459_v30 = vadd.f32 %v606_v22, %v450_v29 }
  0xfa   : > { %v613_v31 = vpack.c.bf16 %v459_v30, %v459_v30 }
  0xfc   : > { %470 = vst.msk [vmem:[%s258_s15 + $0x4] sm:$0xf] %vm468_vm0, %v613_v31 }
  0xfd PF: > { %s14_s17 = sadd.s32 1, %s701_s17   ;;  %s824_s15 = smov %s697_s16 }
  0xfe   : > { %p11_p5 = scmp.ge.s32.totalorder %s14_s17, 4   ;;  %s825_s16 = smov %s827_s18 }
 0x100   :  { %13 = sbr.rel (!%p11_p5) target bundleno = 2 (0x2), region = 69 }

// kernel: squeeze.81
= control target key start
LH: loop header
LB: loop body
LE: loop exit
PB: predicated region body
PF: predicated region fallthrough
CT: control target
= control target key end

     0   :  { %vm131_vm0 = vcmask 523264   ;;  %vm186_vm1 = vcmask 1047556   ;;  %v315_v37 = vmov 0.0   ;;  %s400_s0 = inlined_call_operand.vmem [shape: bf16[1,2,1024], index: 0, kind: input, shape index: {}]   ;;  %s401_s1 = inlined_call_operand.vmem [shape: bf16[2,1,1,4,4,64], index: 1, kind: output, shape index: {}]  }
   0x1   :  { %v293_v0 = vld [vmem:[%s400_s0 + $0x7] sm:$0x1]  ;;  %v294_v1 = vld [vmem:[%s400_s0 + $0x6] sm:$0x1]  ;;  %v295_v2 = vld [vmem:[%s400_s0 + $0x5] sm:$0x1] }
   0x2   :  { %v18_v3 = vunpack.c.l.bf16 %v293_v0  ;;  %v34_v4 = vunpack.c.l.bf16 %v294_v1  ;;  %v50_v5 = vunpack.c.l.bf16 %v295_v2  ;;  %v296_v6 = vld [vmem:[%s400_s0 + $0x4] sm:$0x1]  ;;  %v297_v7 = vld [vmem:[%s400_s0 + $0x3] sm:$0x1]  ;;  %v298_v8 = vld [vmem:[%s400_s0 + $0x2] sm:$0x1] }
   0x3   :  { %v66_v9 = vunpack.c.l.bf16 %v296_v6  ;;  %v82_v10 = vunpack.c.l.bf16 %v297_v7  ;;  %v98_v11 = vunpack.c.l.bf16 %v298_v8  ;;  %v299_v12 = vld [vmem:[%s400_s0 + $0x1] sm:$0x1]  ;;  %v126_v13 = vld [vmem:[%s400_s0] sm:$0x1]  ;;  %s314_s0 = smov 64  }
   0x4   :  { %21 = vst [vmem:[#allocation1 + $0x38] sm:$0x3] %v18_v3  ;;  %37 = vst [vmem:[#allocation1 + $0x30] sm:$0x3] %v34_v4  ;;  %v113_v14 = vunpack.c.l.bf16 %v299_v12  ;;  %v127_v15 = vunpack.c.l.bf16 %v126_v13 }
   0x5   :  { %53 = vst [vmem:[#allocation1 + $0x28] sm:$0x3] %v50_v5  ;;  %69 = vst [vmem:[#allocation1 + $0x20] sm:$0x3] %v66_v9 }
   0x6   :  { %85 = vst [vmem:[#allocation1 + $0x18] sm:$0x3] %v82_v10  ;;  %101 = vst [vmem:[#allocation1 + $0x10] sm:$0x3] %v98_v11 }
   0x7   :  { %116 = vst [vmem:[#allocation1 + $0x8] sm:$0x3] %v113_v14  ;;  %129 = vst [vmem:[#allocation1] sm:$0x3] %v127_v15 }
   0xb   :  { %v171_v17 = vld [vmem:[#allocation1 + $0x30] sm:$0x3]   ;;  %v178_v18 = vld [vmem:[#allocation1 + $0x38] sm:$0x3]  }
   0xc   :  { %v164_v16 = vld [vmem:[#allocation1 + $0x28] sm:$0x3]   ;;  %v157_v21 = vld [vmem:[#allocation1 + $0x20] sm:$0x3]   ;;  %174 = vst.msk [vmem:[#allocation0 + $0x18] sm:$0x1] %vm131_vm0, %v171_v17  }
   0xd   :  { %v143_v19 = vld [vmem:[#allocation1 + $0x10] sm:$0x3]   ;;  %v150_v20 = vld [vmem:[#allocation1 + $0x18] sm:$0x3]   ;;  %167 = vst.msk [vmem:[#allocation0 + $0x12] sm:$0x1] %vm131_vm0, %v164_v16  }
   0xe   :  { %169 = vst.msk [vmem:[#allocation0 + $0x31] sm:$0x2] %vm131_vm0, %v164_v16   ;;  %176 = vst.msk [vmem:[#allocation0 + $0x37] sm:$0x2] %vm131_vm0, %v171_v17   ;;  %v130_v22 = vld [vmem:[#allocation1] sm:$0x3]  }
   0xf   :  { %181 = vst.msk [vmem:[#allocation0 + $0x1a] sm:$0x1] %vm131_vm0, %v178_v18   ;;  %183 = vst.msk [vmem:[#allocation0 + $0x39] sm:$0x2] %vm131_vm0, %v178_v18   ;;  %v136_v23 = vld [vmem:[#allocation1 + $0x8] sm:$0x3]  }
  0x10   :  { %146 = vst.msk [vmem:[#allocation0 + $0x8] sm:$0x1] %vm131_vm0, %v143_v19   ;;  %148 = vst.msk [vmem:[#allocation0 + $0x27] sm:$0x2] %vm131_vm0, %v143_v19  }
  0x11   :  { %153 = vst.msk [vmem:[#allocation0 + $0xa] sm:$0x1] %vm131_vm0, %v150_v20   ;;  %155 = vst.msk [vmem:[#allocation0 + $0x29] sm:$0x2] %vm131_vm0, %v150_v20  }
  0x12   :  { %160 = vst.msk [vmem:[#allocation0 + $0x10] sm:$0x1] %vm131_vm0, %v157_v21   ;;  %162 = vst.msk [vmem:[#allocation0 + $0x2f] sm:$0x2] %vm131_vm0, %v157_v21  }
  0x13   :  { %132 = vst.msk [vmem:[#allocation0] sm:$0x1] %vm131_vm0, %v130_v22   ;;  %134 = vst.msk [vmem:[#allocation0 + $0x1f] sm:$0x2] %vm131_vm0, %v130_v22  }
  0x14   :  { %139 = vst.msk [vmem:[#allocation0 + $0x2] sm:$0x1] %vm131_vm0, %v136_v23   ;;  %141 = vst.msk [vmem:[#allocation0 + $0x21] sm:$0x2] %vm131_vm0, %v136_v23  }
  0x15   :  { %v184_v24 = vld [vmem:[#allocation1] ss:$8 sm:$0xf]   ;;  %v200_v27 = vld [vmem:[#allocation1 + $0x1] ss:$8 sm:$0xf]  }
  0x16   :  { %v185_v25 = vld [vmem:[#allocation1] ss:$8 sm:$0xf0]   ;;  %v202_v28 = vld [vmem:[#allocation1 + $0x1] ss:$8 sm:$0xf0]  }
  0x17   :  { %v187_v26 = vsel %vm186_vm1, %v185_v25, %v184_v24  ;;  %v204_v29 = vsel %vm186_vm1, %v202_v28, %v200_v27 }
  0x18   :  { %v309_v30 = vpack.i.bf16 %v204_v29, %v187_v26 }
  0x1a   :  { %310 = vrot.lane.b32.xlu0 %v309_v30, %s314_s0 }
  0x8c   :  { %v311_v31 = vpop.permute.xlu0 %310 }
  0x8d   :  { %v313_v32 = vunpack.i.h.bf16 %v311_v31  ;;  %v312_v33 = vunpack.i.l.bf16 %v311_v31 }
  0x8f   :  { %209 = vst.msk [vmem:[#allocation0 + $0x21] ss:$2 sm:$0x3] %vm131_vm0, %v313_v32   ;;  %211 = vst.msk [vmem:[#allocation0 + $0x25] ss:$2 sm:$0xc] %vm131_vm0, %v313_v32  }
  0x90   :  { %213 = vst.msk [vmem:[#allocation0 + $0x29] ss:$2 sm:$0x30] %vm131_vm0, %v313_v32   ;;  %215 = vst.msk [vmem:[#allocation0 + $0x2d] ss:$2 sm:$0xc0] %vm131_vm0, %v313_v32  }
  0x91   :  { %192 = vst.msk [vmem:[#allocation0 + $0x1] ss:$2 sm:$0x3] %vm131_vm0, %v312_v33   ;;  %194 = vst.msk [vmem:[#allocation0 + $0x5] ss:$2 sm:$0xc] %vm131_vm0, %v312_v33  }
  0x92   :  { %196 = vst.msk [vmem:[#allocation0 + $0x9] ss:$2 sm:$0x30] %vm131_vm0, %v312_v33   ;;  %198 = vst.msk [vmem:[#allocation0 + $0xd] ss:$2 sm:$0xc0] %vm131_vm0, %v312_v33  }
  0x96   :  { %v250_v34 = vld [vmem:[#allocation0 + $0x20] sm:$0xf]  ;;  %v258_v35 = vld [vmem:[#allocation0 + $0x28] sm:$0xf] }
  0x97   :  { %v266_v36 = vld [vmem:[#allocation0 + $0x30] sm:$0xf]  ;;  %v251_v38 = vpack.c.bf16 %v315_v37, %v250_v34  ;;  %v259_v39 = vpack.c.bf16 %v315_v37, %v258_v35  ;;  %v274_v48 = vld [vmem:[#allocation0 + $0x38] sm:$0xf] }
  0x98   :  { %v267_v40 = vpack.c.bf16 %v315_v37, %v266_v36  ;;  %v221_v41 = vld [vmem:[#allocation0] sm:$0xf]  ;;  %v227_v42 = vld [vmem:[#allocation0 + $0x8] sm:$0xf]  ;;  %v275_v50 = vpack.c.bf16 %v315_v37, %v274_v48 }
  0x99   :  { %v234_v43 = vld [vmem:[#allocation0 + $0x10] sm:$0xf]  ;;  %v222_v44 = vpack.c.bf16 %v315_v37, %v221_v41  ;;  %v228_v45 = vpack.c.bf16 %v315_v37, %v227_v42  ;;  %v242_v47 = vld [vmem:[#allocation0 + $0x18] sm:$0xf]  ;;  %303 = vst [vmem:[%s401_s1 + $0x8] sm:$0x3] %v251_v38 }
  0x9a   :  { %v235_v46 = vpack.c.bf16 %v315_v37, %v234_v43  ;;  %304 = vst [vmem:[%s401_s1 + $0xa] sm:$0x3] %v259_v39  ;;  %305 = vst [vmem:[%s401_s1 + $0xc] sm:$0x3] %v267_v40  ;;  %v243_v49 = vpack.c.bf16 %v315_v37, %v242_v47 }
  0x9b   :  { %225 = vst [vmem:[%s401_s1] sm:$0x3] %v222_v44  ;;  %300 = vst [vmem:[%s401_s1 + $0x2] sm:$0x3] %v228_v45 }
  0x9c   :  { %301 = vst [vmem:[%s401_s1 + $0x4] sm:$0x3] %v235_v46  ;;  %302 = vst [vmem:[%s401_s1 + $0x6] sm:$0x3] %v243_v49 }
  0x9d   :  { %306 = vst [vmem:[%s401_s1 + $0xe] sm:$0x3] %v275_v50 }

// kernel: unet_forward.13
= control target key start
LH: loop header
LB: loop body
LE: loop exit
PB: predicated region body
PF: predicated region fallthrough
CT: control target
= control target key end

     0   :  { %vm387_vm0 = vcmask 519168   ;;  %s647_s1 = inlined_call_operand.vmem [shape: bf16[1,512,64], index: 1, kind: input, shape index: {}]   ;;  %s648_s0 = inlined_call_operand.vmem [shape: bf16[1,8,512], index: 0, kind: input, shape index: {}]   ;;  %s649_s2 = inlined_call_operand.vmem [shape: f32[1,64], index: 2, kind: input, shape index: {}]   ;;  %s650_s3 = inlined_call_operand.vmem [shape: f32[1,64], index: 3, kind: input, shape index: {}]   ;;  %s651_s4 = inlined_call_operand.vmem [shape: bf16[1,8,64], index: 4, kind: output, shape index: {}]  }
   0x1   :  { %v475_v0 = vld [vmem:[%s647_s1 + $0x78] sm:$0xff]   ;;  %v479_v4 = vld [vmem:[%s647_s1 + $0x70] sm:$0xff]   ;;  %v483_v8 = vld [vmem:[%s647_s1 + $0x68] sm:$0xff]  }
   0x2   :  { %v476_v1 = vld [vmem:[%s647_s1 + $0xf8] sm:$0xff]   ;;  %431 = vmatprep.subr.bf16.mxu0 %v475_v0  ;;  %v480_v5 = vld [vmem:[%s647_s1 + $0xf0] sm:$0xff]   ;;  %v484_v9 = vld [vmem:[%s647_s1 + $0xe8] sm:$0xff]  }
   0x3   :  { %v477_v2 = vld [vmem:[%s647_s1 + $0x38] sm:$0xff]   ;;  %453 = vmatprep.subr.bf16.mxu1 %v476_v1  ;;  %v481_v6 = vld [vmem:[%s647_s1 + $0x30] sm:$0xff]   ;;  %v485_v10 = vld [vmem:[%s647_s1 + $0x28] sm:$0xff]  }
   0x4   :  { %v478_v3 = vld [vmem:[%s647_s1 + $0xb8] sm:$0xff]   ;;  %432 = vmatpush3.bf16.msra.mxu0 %v477_v2  ;;  %v482_v7 = vld [vmem:[%s647_s1 + $0xb0] sm:$0xff]   ;;  %v486_v11 = vld [vmem:[%s647_s1 + $0xa8] sm:$0xff]  }
   0x5   :  { %454 = vmatpush3.bf16.msra.mxu1 %v478_v3  ;;  %433 = vmatprep.subr.bf16.mxu0 %v479_v4  ;;  %v487_v12 = vld [vmem:[%s647_s1 + $0x60] sm:$0xff]   ;;  %v491_v16 = vld [vmem:[%s647_s1 + $0x58] sm:$0xff]   ;;  %v495_v20 = vld [vmem:[%s647_s1 + $0x50] sm:$0xff]  }
   0x6   :  { %455 = vmatprep.subr.bf16.mxu1 %v480_v5  ;;  %v488_v13 = vld [vmem:[%s647_s1 + $0xe0] sm:$0xff]   ;;  %v492_v17 = vld [vmem:[%s647_s1 + $0xd8] sm:$0xff]   ;;  %v496_v21 = vld [vmem:[%s647_s1 + $0xd0] sm:$0xff]  }
   0x7   :  { %v489_v14 = vld [vmem:[%s647_s1 + $0x20] sm:$0xff]   ;;  %v493_v18 = vld [vmem:[%s647_s1 + $0x18] sm:$0xff]   ;;  %v497_v22 = vld [vmem:[%s647_s1 + $0x10] sm:$0xff]  }
   0x8   :  { %434 = vmatpush3.bf16.msra.mxu0 %v481_v6  ;;  %v490_v15 = vld [vmem:[%s647_s1 + $0xa0] sm:$0xff]   ;;  %v494_v19 = vld [vmem:[%s647_s1 + $0x98] sm:$0xff]   ;;  %v498_v23 = vld [vmem:[%s647_s1 + $0x90] sm:$0xff]  }
   0x9   :  { %456 = vmatpush3.bf16.msra.mxu1 %v482_v7  ;;  %435 = vmatprep.subr.bf16.mxu0 %v483_v8  ;;  %v499_v24 = vld [vmem:[%s647_s1 + $0x48] sm:$0xff]   ;;  %v503_v28 = vld [vmem:[%s647_s1 + $0x40] sm:$0xff]  }
   0xa   :  { %457 = vmatprep.subr.bf16.mxu1 %v484_v9  ;;  %v500_v25 = vld [vmem:[%s647_s1 + $0xc8] sm:$0xff]   ;;  %v504_v29 = vld [vmem:[%s647_s1 + $0xc0] sm:$0xff]  }
   0xb   :  { %v501_v26 = vld [vmem:[%s647_s1 + $0x8] sm:$0xff]   ;;  %v505_v30 = vld [vmem:[%s647_s1] sm:$0xff]  }
   0xc   :  { %436 = vmatpush3.bf16.msra.mxu0 %v485_v10  ;;  %v502_v27 = vld [vmem:[%s647_s1 + $0x88] sm:$0xff]   ;;  %v506_v31 = vld [vmem:[%s647_s1 + $0x80] sm:$0xff]  }
   0xd   :  { %458 = vmatpush3.bf16.msra.mxu1 %v486_v11  ;;  %437 = vmatprep.subr.bf16.mxu0 %v487_v12  ;;  %v18_v32 = vld [vmem:[%s648_s0] sm:$0xff]  ;;  %v19_v33 = vld [vmem:[%s648_s0 + $0x8] sm:$0xff] }
   0xe   :  { %459 = vmatprep.subr.bf16.mxu1 %v488_v13  ;;  %v393_v34 = vcombine.low %v18_v32, %v18_v32  ;;  %v394_v35 = vcombine.high %v18_v32, %v18_v32  ;;  %v395_v36 = vcombine.low %v19_v33, %v19_v33  ;;  %v396_v37 = vcombine.high %v19_v33, %v19_v33  ;;  %v429_v44 = vld [vmem:[%s649_s2] ss:$0 sm:$0xff] }
   0xf   :  { %v430_v48 = vld [vmem:[%s650_s3] ss:$0 sm:$0xff] }
  0x10   :  { %438 = vmatpush3.bf16.msra.mxu0 %v489_v14  ;;  %322 = vmatprep.mubr.bf16.mxu0 %v394_v35 }
  0x11   :  { %460 = vmatpush3.bf16.msra.mxu1 %v490_v15  ;;  %439 = vmatprep.subr.bf16.mxu0 %v491_v16 }
  0x12   :  { %461 = vmatprep.subr.bf16.mxu1 %v492_v17  ;;  %362 = vmatprep.mubr.bf16.mxu1 %v396_v37 }
  0x14   :  { %440 = vmatpush3.bf16.msra.mxu0 %v493_v18 }
  0x15   :  { %462 = vmatpush3.bf16.msra.mxu1 %v494_v19  ;;  %441 = vmatprep.subr.bf16.mxu0 %v495_v20 }
  0x16   :  { %463 = vmatprep.subr.bf16.mxu1 %v496_v21 }
  0x18   :  { %442 = vmatpush3.bf16.msra.mxu0 %v497_v22 }
  0x19   :  { %464 = vmatpush3.bf16.msra.mxu1 %v498_v23  ;;  %443 = vmatprep.subr.bf16.mxu0 %v499_v24 }
  0x1a   :  { %465 = vmatprep.subr.bf16.mxu1 %v500_v25 }
  0x1c   :  { %444 = vmatpush3.bf16.msra.mxu0 %v501_v26 }
  0x1d   :  { %466 = vmatpush3.bf16.msra.mxu1 %v502_v27  ;;  %445 = vmatprep.subr.bf16.mxu0 %v503_v28 }
  0x1e   :  { %467 = vmatprep.subr.bf16.mxu1 %v504_v29 }
  0x20   :  { %446 = vmatpush3.bf16.msra.mxu0 %v505_v30 }
  0x21   :  { %468 = vmatpush3.bf16.msra.mxu1 %v506_v31 }
  0x23   :  { %323 = vmatmul.mubr.bf16.vlgmr.msra.gmra.mxu0 %v393_v34 }
  0x24   :  { %363 = vmatmul.mubr.bf16.vlgmr.msra.gmra.mxu1 %v395_v36 }
  0xe3   :  { %v447_v38 = vpop.f32.mrf.mxu0 }
  0xe4   :  { %v469_v39 = vpop.f32.mrf.mxu1 }
  0xe5   :  { %v448_v40 = vpop.f32.mrf.mxu0 }
  0xe6   :  { %v470_v41 = vpop.f32.mrf.mxu1  ;;  %v449_v42 = vadd.f32 %v448_v40, %v447_v38 }
  0xe7   :  { %v471_v43 = vadd.f32 %v470_v41, %v469_v39  ;;  %v450_v45 = vpop.f32.mrf.mxu0 }
  0xe8   :  { %v472_v46 = vpop.f32.mrf.mxu1 }
  0xe9   :  { %v365_v47 = vadd.f32 %v471_v43, %v449_v42  ;;  %v451_v49 = vpop.f32.mrf.mxu0 }
  0xea   :  { %v473_v50 = vpop.f32.mrf.mxu1 }
  0xeb   :  { %v377_v51 = vmul.f32 %v429_v44, %v365_v47 }
  0xed   :  { %v385_v52 = vadd.f32 %v430_v48, %v377_v51 }
  0xef   :  { %v386_v53 = vpack.c.bf16 %v385_v52, %v385_v52 }
  0xf1   :  { %388 = vst.msk [vmem:[%s651_s4] sm:$0xf] %vm387_vm0, %v386_v53 }

// kernel: unet_forward.15
= control target key start
LH: loop header
LB: loop body
LE: loop exit
PB: predicated region body
PF: predicated region fallthrough
CT: control target
= control target key end

     0   :  { %v781_v3 = vmov 0   ;;  %s1031_s1 = inlined_call_operand.vmem [shape: bf16[1,128,1024], index: 1, kind: input, shape index: {}]   ;;  %s1032_s0 = inlined_call_operand.vmem [shape: bf16[1,8,128], index: 0, kind: input, shape index: {}]   ;;  %s1033_s2 = inlined_call_operand.vmem [shape: f32[1,1024], index: 2, kind: input, shape index: {}]   ;;  %s1034_s3 = inlined_call_operand.vmem [shape: f32[1,1024], index: 3, kind: input, shape index: {}]   ;;  %s1035_s4 = inlined_call_operand.vmem [shape: bf16[1,8,1024], index: 4, kind: output, shape index: {}]  }
   0x1   :  { %v76_v0 = vld [vmem:[%s1031_s1 + $0x1c0] sm:$0xff]  ;;  %v77_v2 = vld [vmem:[%s1031_s1 + $0x1c8] sm:$0xff]  ;;  %436 = vmatprep.mubr.bf16.mxu0 %v781_v3  ;;  %477 = vmatprep.mubr.bf16.mxu1 %v781_v3  ;;  %v78_v63 = vld [vmem:[%s1031_s1 + $0x1d0] sm:$0xff] }
   0x2   :  { %v80_v1 = vld [vmem:[%s1031_s1 + $0x1e0] sm:$0xff]  ;;  %v81_v5 = vld [vmem:[%s1031_s1 + $0x1e8] sm:$0xff] }
   0x3   :  { %v765_v4 = vcombine.high %v76_v0, %v80_v1  ;;  %v764_v6 = vcombine.low %v76_v0, %v80_v1  ;;  %v68_v7 = vld [vmem:[%s1031_s1 + $0x180] sm:$0xff]  ;;  %v767_v9 = vcombine.high %v77_v2, %v81_v5  ;;  %v766_v10 = vcombine.low %v77_v2, %v81_v5  ;;  %v69_v12 = vld [vmem:[%s1031_s1 + $0x188] sm:$0xff]  ;;  %v82_v0 = vld [vmem:[%s1031_s1 + $0x1f0] sm:$0xff] }
   0x4   :  { %v72_v8 = vld [vmem:[%s1031_s1 + $0x1a0] sm:$0xff]  ;;  %v73_v13 = vld [vmem:[%s1031_s1 + $0x1a8] sm:$0xff]  ;;  %v79_v1 = vld [vmem:[%s1031_s1 + $0x1d8] sm:$0xff] }
   0x5   :  { %v757_v11 = vcombine.high %v68_v7, %v72_v8  ;;  %v60_v14 = vld [vmem:[%s1031_s1 + $0x140] sm:$0xff]  ;;  %404 = vmatprep.subr.bf16.mxu0 %v765_v4  ;;  %v759_v15 = vcombine.high %v69_v12, %v73_v13  ;;  %v61_v17 = vld [vmem:[%s1031_s1 + $0x148] sm:$0xff]  ;;  %445 = vmatprep.subr.bf16.mxu1 %v767_v9  ;;  %v756_v19 = vcombine.low %v68_v7, %v72_v8  ;;  %v83_v2 = vld [vmem:[%s1031_s1 + $0x1f8] sm:$0xff] }
   0x6   :  { %v64_v16 = vld [vmem:[%s1031_s1 + $0x160] sm:$0xff]  ;;  %v65_v18 = vld [vmem:[%s1031_s1 + $0x168] sm:$0xff]  ;;  %405 = vmatpush1.bf16.msra.mxu0 %v764_v6  ;;  %446 = vmatpush1.bf16.msra.mxu1 %v766_v10  ;;  %v758_v20 = vcombine.low %v69_v12, %v73_v13  ;;  %v769_v7 = vcombine.high %v78_v63, %v82_v0  ;;  %v771_v8 = vcombine.high %v79_v1, %v83_v2  ;;  %v70_v9 = vld [vmem:[%s1031_s1 + $0x190] sm:$0xff] }
   0x7   :  { %406 = vmatprep.subr.bf16.mxu0 %v757_v11  ;;  %v749_v21 = vcombine.high %v60_v14, %v64_v16  ;;  %447 = vmatprep.subr.bf16.mxu1 %v759_v15  ;;  %v751_v22 = vcombine.high %v61_v17, %v65_v18  ;;  %v52_v23 = vld [vmem:[%s1031_s1 + $0x100] sm:$0xff]  ;;  %v53_v25 = vld [vmem:[%s1031_s1 + $0x108] sm:$0xff]  ;;  %v748_v27 = vcombine.low %v60_v14, %v64_v16  ;;  %v74_v10 = vld [vmem:[%s1031_s1 + $0x1b0] sm:$0xff] }
   0x8   :  { %v56_v24 = vld [vmem:[%s1031_s1 + $0x120] sm:$0xff]  ;;  %v57_v26 = vld [vmem:[%s1031_s1 + $0x128] sm:$0xff]  ;;  %v750_v28 = vcombine.low %v61_v17, %v65_v18  ;;  %v71_v12 = vld [vmem:[%s1031_s1 + $0x198] sm:$0xff]  ;;  %v768_v14 = vcombine.low %v78_v63, %v82_v0  ;;  %v770_v15 = vcombine.low %v79_v1, %v83_v2  ;;  %v761_v16 = vcombine.high %v70_v9, %v74_v10 }
   0x9   :  { %v741_v29 = vcombine.high %v52_v23, %v56_v24  ;;  %v743_v30 = vcombine.high %v53_v25, %v57_v26  ;;  %v44_v31 = vld [vmem:[%s1031_s1 + $0xc0] sm:$0xff]  ;;  %v45_v33 = vld [vmem:[%s1031_s1 + $0xc8] sm:$0xff]  ;;  %v740_v35 = vcombine.low %v52_v23, %v56_v24  ;;  %v742_v36 = vcombine.low %v53_v25, %v57_v26  ;;  %v75_v13 = vld [vmem:[%s1031_s1 + $0x1b8] sm:$0xff] }
   0xa   :  { %407 = vmatpush1.bf16.msra.mxu0 %v756_v19  ;;  %448 = vmatpush1.bf16.msra.mxu1 %v758_v20  ;;  %v48_v32 = vld [vmem:[%s1031_s1 + $0xe0] sm:$0xff]  ;;  %v49_v34 = vld [vmem:[%s1031_s1 + $0xe8] sm:$0xff]  ;;  %v763_v17 = vcombine.high %v71_v12, %v75_v13  ;;  %v62_v18 = vld [vmem:[%s1031_s1 + $0x150] sm:$0xff]  ;;  %v762_v23 = vcombine.low %v71_v12, %v75_v13 }
   0xb   :  { %408 = vmatprep.subr.bf16.mxu0 %v749_v21  ;;  %449 = vmatprep.subr.bf16.mxu1 %v751_v22  ;;  %v733_v37 = vcombine.high %v44_v31, %v48_v32  ;;  %v735_v38 = vcombine.high %v45_v33, %v49_v34  ;;  %v36_v39 = vld [vmem:[%s1031_s1 + $0x80] sm:$0xff]  ;;  %v37_v41 = vld [vmem:[%s1031_s1 + $0x88] sm:$0xff]  ;;  %v732_v43 = vcombine.low %v44_v31, %v48_v32  ;;  %v66_v19 = vld [vmem:[%s1031_s1 + $0x170] sm:$0xff] }
   0xc   :  { %v40_v40 = vld [vmem:[%s1031_s1 + $0xa0] sm:$0xff]  ;;  %v41_v42 = vld [vmem:[%s1031_s1 + $0xa8] sm:$0xff]  ;;  %v734_v44 = vcombine.low %v45_v33, %v49_v34  ;;  %v63_v20 = vld [vmem:[%s1031_s1 + $0x158] sm:$0xff]  ;;  %v760_v22 = vcombine.low %v70_v9, %v74_v10  ;;  %v753_v24 = vcombine.high %v62_v18, %v66_v19 }
   0xd   :  { %v725_v45 = vcombine.high %v36_v39, %v40_v40  ;;  %v727_v46 = vcombine.high %v37_v41, %v41_v42  ;;  %v28_v47 = vld [vmem:[%s1031_s1 + $0x40] sm:$0xff]  ;;  %v29_v49 = vld [vmem:[%s1031_s1 + $0x48] sm:$0xff]  ;;  %v724_v51 = vcombine.low %v36_v39, %v40_v40  ;;  %v726_v52 = vcombine.low %v37_v41, %v41_v42  ;;  %v67_v21 = vld [vmem:[%s1031_s1 + $0x178] sm:$0xff] }
   0xe   :  { %409 = vmatpush1.bf16.msra.mxu0 %v748_v27  ;;  %450 = vmatpush1.bf16.msra.mxu1 %v750_v28  ;;  %v32_v48 = vld [vmem:[%s1031_s1 + $0x60] sm:$0xff]  ;;  %v33_v50 = vld [vmem:[%s1031_s1 + $0x68] sm:$0xff]  ;;  %v755_v25 = vcombine.high %v63_v20, %v67_v21  ;;  %v54_v26 = vld [vmem:[%s1031_s1 + $0x110] sm:$0xff]  ;;  %v754_v31 = vcombine.low %v63_v20, %v67_v21 }
   0xf   :  { %410 = vmatprep.subr.bf16.mxu0 %v741_v29  ;;  %451 = vmatprep.subr.bf16.mxu1 %v743_v30  ;;  %v717_v53 = vcombine.high %v28_v47, %v32_v48  ;;  %v719_v54 = vcombine.high %v29_v49, %v33_v50  ;;  %v20_v55 = vld [vmem:[%s1031_s1] sm:$0xff]  ;;  %v21_v57 = vld [vmem:[%s1031_s1 + $0x8] sm:$0xff]  ;;  %v716_v59 = vcombine.low %v28_v47, %v32_v48  ;;  %v58_v27 = vld [vmem:[%s1031_s1 + $0x130] sm:$0xff] }
  0x10   :  { %v24_v56 = vld [vmem:[%s1031_s1 + $0x20] sm:$0xff]  ;;  %v25_v58 = vld [vmem:[%s1031_s1 + $0x28] sm:$0xff]  ;;  %v718_v60 = vcombine.low %v29_v49, %v33_v50  ;;  %v55_v28 = vld [vmem:[%s1031_s1 + $0x118] sm:$0xff]  ;;  %v752_v30 = vcombine.low %v62_v18, %v66_v19  ;;  %v745_v32 = vcombine.high %v54_v26, %v58_v27 }
  0x11   :  { %v709_v61 = vcombine.high %v20_v55, %v24_v56  ;;  %v711_v62 = vcombine.high %v21_v57, %v25_v58  ;;  %v708_v4 = vcombine.low %v20_v55, %v24_v56  ;;  %v18_v5 = vld [vmem:[%s1032_s0] sm:$0xf]  ;;  %v710_v6 = vcombine.low %v21_v57, %v25_v58  ;;  %v59_v29 = vld [vmem:[%s1031_s1 + $0x138] sm:$0xff]  ;;  %v46_v34 = vld [vmem:[%s1031_s1 + $0xd0] sm:$0xff] }
  0x12   :  { %411 = vmatpush1.bf16.msra.mxu0 %v740_v35  ;;  %452 = vmatpush1.bf16.msra.mxu1 %v742_v36  ;;  %v927_v11 = vmax.bf16 %v781_v3, %v18_v5  ;;  %v747_v33 = vcombine.high %v55_v28, %v59_v29  ;;  %v50_v35 = vld [vmem:[%s1031_s1 + $0xf0] sm:$0xff]  ;;  %v51_v36 = vld [vmem:[%s1031_s1 + $0xf8] sm:$0xff]  ;;  %v618_v10 = vld [vmem:[%s1034_s3] sm:$0xff] }
  0x13   :  { %412 = vmatprep.subr.bf16.mxu0 %v733_v37  ;;  %453 = vmatprep.subr.bf16.mxu1 %v735_v38  ;;  %v744_v37 = vcombine.low %v54_v26, %v58_v27  ;;  %v746_v38 = vcombine.low %v55_v28, %v59_v29  ;;  %v737_v39 = vcombine.high %v46_v34, %v50_v35  ;;  %v38_v41 = vld [vmem:[%s1031_s1 + $0x90] sm:$0xff] }
  0x14   :  { %v42_v42 = vld [vmem:[%s1031_s1 + $0xb0] sm:$0xff] }
  0x15   :  { %v729_v47 = vcombine.high %v38_v41, %v42_v42  ;;  %v30_v49 = vld [vmem:[%s1031_s1 + $0x50] sm:$0xff] }
  0x16   :  { %413 = vmatpush1.bf16.msra.mxu0 %v732_v43  ;;  %454 = vmatpush1.bf16.msra.mxu1 %v734_v44  ;;  %v39_v43 = vld [vmem:[%s1031_s1 + $0x98] sm:$0xff]  ;;  %v34_v50 = vld [vmem:[%s1031_s1 + $0x70] sm:$0xff] }
  0x17   :  { %414 = vmatprep.subr.bf16.mxu0 %v725_v45  ;;  %455 = vmatprep.subr.bf16.mxu1 %v727_v46  ;;  %v43_v44 = vld [vmem:[%s1031_s1 + $0xb8] sm:$0xff]  ;;  %v736_v45 = vcombine.low %v46_v34, %v50_v35  ;;  %v721_v55 = vcombine.high %v30_v49, %v34_v50  ;;  %v22_v57 = vld [vmem:[%s1031_s1 + $0x10] sm:$0xff] }
  0x18   :  { %v731_v48 = vcombine.high %v39_v43, %v43_v44  ;;  %v26_v58 = vld [vmem:[%s1031_s1 + $0x30] sm:$0xff] }
  0x19   :  { %v713_v63 = vcombine.high %v22_v57, %v26_v58  ;;  %v712_v1 = vcombine.low %v22_v57, %v26_v58 }
  0x1a   :  { %415 = vmatpush1.bf16.msra.mxu0 %v724_v51  ;;  %456 = vmatpush1.bf16.msra.mxu1 %v726_v52  ;;  %v31_v51 = vld [vmem:[%s1031_s1 + $0x58] sm:$0xff] }
  0x1b   :  { %416 = vmatprep.subr.bf16.mxu0 %v717_v53  ;;  %457 = vmatprep.subr.bf16.mxu1 %v719_v54  ;;  %v35_v52 = vld [vmem:[%s1031_s1 + $0x78] sm:$0xff]  ;;  %v728_v53 = vcombine.low %v38_v41, %v42_v42  ;;  %v730_v54 = vcombine.low %v39_v43, %v43_v44 }
  0x1c   :  { %v723_v56 = vcombine.high %v31_v51, %v35_v52 }
  0x1e   :  { %417 = vmatpush1.bf16.msra.mxu0 %v716_v59  ;;  %458 = vmatpush1.bf16.msra.mxu1 %v718_v60  ;;  %v23_v59 = vld [vmem:[%s1031_s1 + $0x18] sm:$0xff] }
  0x1f   :  { %418 = vmatprep.subr.bf16.mxu0 %v709_v61  ;;  %459 = vmatprep.subr.bf16.mxu1 %v711_v62  ;;  %v27_v60 = vld [vmem:[%s1031_s1 + $0x38] sm:$0xff]  ;;  %v720_v61 = vcombine.low %v30_v49, %v34_v50  ;;  %v722_v62 = vcombine.low %v31_v51, %v35_v52 }
  0x20   :  { %v715_v0 = vcombine.high %v23_v59, %v27_v60  ;;  %v714_v2 = vcombine.low %v23_v59, %v27_v60 }
  0x22   :  { %419 = vmatpush1.bf16.msra.mxu0 %v708_v4  ;;  %460 = vmatpush1.bf16.msra.mxu1 %v710_v6  ;;  %v570_v4 = vlaneseq }
  0x23   :  { %486 = vmatprep.subr.bf16.mxu0 %v769_v7  ;;  %527 = vmatprep.subr.bf16.mxu1 %v771_v8  ;;  %v568_v7 = vld [vmem:[%s1033_s2] sm:$0xff] }
  0x24   :  { %v571_v5 = vshrl.u32 %v570_v4, 7 }
  0x25   :  { %437 = vmatmul.mubr.bf16.vlgmr.msra.gmra.mxu0 %v927_v11  ;;  %478 = vmatmul.mubr.bf16.vlgmr.msra.gmra.mxu1 %v927_v11 }
  0x26   :  { %487 = vmatpush1.bf16.msra.mxu0 %v768_v14  ;;  %528 = vmatpush1.bf16.msra.mxu1 %v770_v15  ;;  %v572_v6 = vsub.s32 0, %v571_v5  ;;  %v580_v8 = vsub.s32 2, %v571_v5  ;;  %v576_v9 = vsub.s32 1, %v571_v5  ;;  %v584_v12 = vsub.s32 3, %v571_v5 }
  0x27   :  { %488 = vmatprep.subr.bf16.mxu0 %v761_v16  ;;  %529 = vmatprep.subr.bf16.mxu1 %v763_v17 }
  0x28   :  { %518 = vmatprep.mubr.bf16.mxu0 %v781_v3  ;;  %559 = vmatprep.mubr.bf16.mxu1 %v781_v3  ;;  %v47_v3 = vld [vmem:[%s1031_s1 + $0xd8] sm:$0xff]  ;;  %v573_v13 = vrot.slane %v568_v7, %v572_v6  ;;  %v581_v14 = vrot.slane %v568_v7, %v580_v8  ;;  %v623_v15 = vrot.slane %v618_v10, %v572_v6 }
  0x29   :  { %v739_v40 = vcombine.high %v47_v3, %v51_v36  ;;  %v738_v46 = vcombine.low %v47_v3, %v51_v36  ;;  %v577_v16 = vrot.slane %v568_v7, %v576_v9  ;;  %v585_v18 = vrot.slane %v568_v7, %v584_v12 }
  0x2a   :  { %489 = vmatpush1.bf16.msra.mxu0 %v760_v22  ;;  %530 = vmatpush1.bf16.msra.mxu1 %v762_v23  ;;  %v627_v21 = vrot.slane %v618_v10, %v576_v9 }
  0x2b   :  { %490 = vmatprep.subr.bf16.mxu0 %v753_v24  ;;  %531 = vmatprep.subr.bf16.mxu1 %v755_v25  ;;  %v635_v24 = vrot.slane %v618_v10, %v584_v12 }
  0x2e   :  { %491 = vmatpush1.bf16.msra.mxu0 %v752_v30  ;;  %532 = vmatpush1.bf16.msra.mxu1 %v754_v31 }
  0x2f   :  { %492 = vmatprep.subr.bf16.mxu0 %v745_v32  ;;  %533 = vmatprep.subr.bf16.mxu1 %v747_v33 }
  0x32   :  { %493 = vmatpush1.bf16.msra.mxu0 %v744_v37  ;;  %534 = vmatpush1.bf16.msra.mxu1 %v746_v38  ;;  %v588_v37 = vsub.s32 4, %v571_v5  ;;  %v596_v38 = vsub.s32 6, %v571_v5 }
  0x33   :  { %494 = vmatprep.subr.bf16.mxu0 %v737_v39  ;;  %535 = vmatprep.subr.bf16.mxu1 %v739_v40  ;;  %v592_v39 = vsub.s32 5, %v571_v5  ;;  %v600_v40 = vsub.s32 7, %v571_v5 }
  0x34   :  { %v589_v41 = vrot.slane %v568_v7, %v588_v37  ;;  %v597_v42 = vrot.slane %v568_v7, %v596_v38  ;;  %v647_v51 = vrot.slane %v618_v10, %v596_v38 }
  0x35   :  { %v593_v43 = vrot.slane %v568_v7, %v592_v39  ;;  %v643_v49 = vrot.slane %v618_v10, %v592_v39 }
  0x36   :  { %495 = vmatpush1.bf16.msra.mxu0 %v736_v45  ;;  %536 = vmatpush1.bf16.msra.mxu1 %v738_v46  ;;  %v601_v45 = vrot.slane %v568_v7, %v600_v40 }
  0x37   :  { %496 = vmatprep.subr.bf16.mxu0 %v729_v47  ;;  %537 = vmatprep.subr.bf16.mxu1 %v731_v48  ;;  %v639_v47 = vrot.slane %v618_v10, %v588_v37 }
  0x3a   :  { %497 = vmatpush1.bf16.msra.mxu0 %v728_v53  ;;  %538 = vmatpush1.bf16.msra.mxu1 %v730_v54  ;;  %v651_v53 = vrot.slane %v618_v10, %v600_v40 }
  0x3b   :  { %498 = vmatprep.subr.bf16.mxu0 %v721_v55  ;;  %539 = vmatprep.subr.bf16.mxu1 %v723_v56 }
  0x3e   :  { %499 = vmatpush1.bf16.msra.mxu0 %v720_v61  ;;  %540 = vmatpush1.bf16.msra.mxu1 %v722_v62 }
  0x3f   :  { %500 = vmatprep.subr.bf16.mxu0 %v713_v63  ;;  %541 = vmatprep.subr.bf16.mxu1 %v715_v0 }
  0x42   :  { %501 = vmatpush1.bf16.msra.mxu0 %v712_v1  ;;  %542 = vmatpush1.bf16.msra.mxu1 %v714_v2 }
  0x45   :  { %519 = vmatmul.mubr.bf16.vlgmr.msra.gmra.mxu0 %v927_v11  ;;  %560 = vmatmul.mubr.bf16.vlgmr.msra.gmra.mxu1 %v927_v11  ;;  %v631_v11 = vrot.slane %v618_v10, %v580_v8 }
  0xe5   :  { %v438_v17 = vpop.f32.mrf.mxu0  ;;  %v479_v20 = vpop.f32.mrf.mxu1 }
  0xe6   :  { %v610_v19 = vmul.f32 %v573_v13, %v438_v17  ;;  %v612_v22 = vmul.f32 %v581_v14, %v479_v20 }
  0xe7   :  { %v440_v23 = vpop.f32.mrf.mxu0  ;;  %v481_v27 = vpop.f32.mrf.mxu1 }
  0xe8   :  { %v660_v25 = vadd.f32 %v623_v15, %v610_v19  ;;  %v611_v26 = vmul.f32 %v577_v16, %v440_v23  ;;  %v662_v28 = vadd.f32 %v631_v11, %v612_v22  ;;  %v613_v29 = vmul.f32 %v585_v18, %v481_v27 }
  0xe9   :  { %v442_v30 = vpop.f32.mrf.mxu0  ;;  %v483_v32 = vpop.f32.mrf.mxu1 }
  0xea   :  { %v661_v31 = vadd.f32 %v627_v21, %v611_v26  ;;  %v663_v33 = vadd.f32 %v635_v24, %v613_v29 }
  0xeb   :  { %v443_v34 = vpop.f32.mrf.mxu0  ;;  %v484_v3 = vpop.f32.mrf.mxu1 }
  0xec   :  { %v776_v35 = vpack.c.bf16 %v661_v31, %v660_v25  ;;  %v777_v36 = vpack.c.bf16 %v663_v33, %v662_v28 }
  0xee   :  { %700 = vst [vmem:[%s1035_s4] sm:$0xff] %v776_v35  ;;  %701 = vst [vmem:[%s1035_s4 + $0x8] sm:$0xff] %v777_v36 }
 0x105   :  { %v520_v44 = vpop.f32.mrf.mxu0  ;;  %v561_v48 = vpop.f32.mrf.mxu1 }
 0x106   :  { %v614_v46 = vmul.f32 %v589_v41, %v520_v44  ;;  %v616_v50 = vmul.f32 %v597_v42, %v561_v48 }
 0x107   :  { %v522_v52 = vpop.f32.mrf.mxu0  ;;  %v563_v55 = vpop.f32.mrf.mxu1 }
 0x108   :  { %v615_v54 = vmul.f32 %v593_v43, %v522_v52  ;;  %v617_v56 = vmul.f32 %v601_v45, %v563_v55  ;;  %v664_v58 = vadd.f32 %v639_v47, %v614_v46  ;;  %v666_v61 = vadd.f32 %v647_v51, %v616_v50 }
 0x109   :  { %v524_v57 = vpop.f32.mrf.mxu0  ;;  %v565_v60 = vpop.f32.mrf.mxu1 }
 0x10a   :  { %v665_v59 = vadd.f32 %v643_v49, %v615_v54  ;;  %v667_v62 = vadd.f32 %v651_v53, %v617_v56 }
 0x10b   :  { %v525_v63 = vpop.f32.mrf.mxu0  ;;  %v566_v1 = vpop.f32.mrf.mxu1 }
 0x10c   :  { %v778_v0 = vpack.c.bf16 %v665_v59, %v664_v58  ;;  %v779_v2 = vpack.c.bf16 %v667_v62, %v666_v61 }
 0x10e   :  { %702 = vst [vmem:[%s1035_s4 + $0x10] sm:$0xff] %v778_v0  ;;  %703 = vst [vmem:[%s1035_s4 + $0x18] sm:$0xff] %v779_v2 }

// kernel: unet_forward.14
= control target key start
LH: loop header
LB: loop body
LE: loop exit
PB: predicated region body
PF: predicated region fallthrough
CT: control target
= control target key end

     0   :  { %vm739_vm0 = vcmask 519168   ;;  %s1217_s1 = inlined_call_operand.vmem [shape: bf16[1,1024,64], index: 1, kind: input, shape index: {}]   ;;  %s1218_s0 = inlined_call_operand.vmem [shape: bf16[1,8,1024], index: 0, kind: input, shape index: {}]   ;;  %s1219_s2 = inlined_call_operand.vmem [shape: f32[1,64], index: 2, kind: input, shape index: {}]   ;;  %s1220_s3 = inlined_call_operand.vmem [shape: f32[1,64], index: 3, kind: input, shape index: {}]   ;;  %s1221_s4 = inlined_call_operand.vmem [shape: bf16[1,8,64], index: 4, kind: output, shape index: {}]  }
   0x1   :  { %v907_v0 = vld [vmem:[%s1217_s1 + $0x78] sm:$0xff]   ;;  %v911_v4 = vld [vmem:[%s1217_s1 + $0x70] sm:$0xff]   ;;  %v915_v8 = vld [vmem:[%s1217_s1 + $0x68] sm:$0xff]  }
   0x2   :  { %v908_v1 = vld [vmem:[%s1217_s1 + $0xf8] sm:$0xff]   ;;  %819 = vmatprep.subr.bf16.mxu0 %v907_v0  ;;  %v912_v5 = vld [vmem:[%s1217_s1 + $0xf0] sm:$0xff]   ;;  %v916_v9 = vld [vmem:[%s1217_s1 + $0xe8] sm:$0xff]  }
   0x3   :  { %v909_v2 = vld [vmem:[%s1217_s1 + $0x38] sm:$0xff]   ;;  %841 = vmatprep.subr.bf16.mxu1 %v908_v1  ;;  %v913_v6 = vld [vmem:[%s1217_s1 + $0x30] sm:$0xff]   ;;  %v917_v10 = vld [vmem:[%s1217_s1 + $0x28] sm:$0xff]  }
   0x4   :  { %v910_v3 = vld [vmem:[%s1217_s1 + $0xb8] sm:$0xff]   ;;  %820 = vmatpush3.bf16.msra.mxu0 %v909_v2  ;;  %v914_v7 = vld [vmem:[%s1217_s1 + $0xb0] sm:$0xff]   ;;  %v918_v11 = vld [vmem:[%s1217_s1 + $0xa8] sm:$0xff]  }
   0x5   :  { %842 = vmatpush3.bf16.msra.mxu1 %v910_v3  ;;  %821 = vmatprep.subr.bf16.mxu0 %v911_v4  ;;  %v919_v12 = vld [vmem:[%s1217_s1 + $0x60] sm:$0xff]   ;;  %v923_v16 = vld [vmem:[%s1217_s1 + $0x58] sm:$0xff]   ;;  %v927_v20 = vld [vmem:[%s1217_s1 + $0x50] sm:$0xff]  }
   0x6   :  { %843 = vmatprep.subr.bf16.mxu1 %v912_v5  ;;  %v920_v13 = vld [vmem:[%s1217_s1 + $0xe0] sm:$0xff]   ;;  %v924_v17 = vld [vmem:[%s1217_s1 + $0xd8] sm:$0xff]   ;;  %v928_v21 = vld [vmem:[%s1217_s1 + $0xd0] sm:$0xff]  }
   0x7   :  { %v921_v14 = vld [vmem:[%s1217_s1 + $0x20] sm:$0xff]   ;;  %v925_v18 = vld [vmem:[%s1217_s1 + $0x18] sm:$0xff]   ;;  %v929_v22 = vld [vmem:[%s1217_s1 + $0x10] sm:$0xff]  }
   0x8   :  { %822 = vmatpush3.bf16.msra.mxu0 %v913_v6  ;;  %v922_v15 = vld [vmem:[%s1217_s1 + $0xa0] sm:$0xff]   ;;  %v926_v19 = vld [vmem:[%s1217_s1 + $0x98] sm:$0xff]   ;;  %v930_v23 = vld [vmem:[%s1217_s1 + $0x90] sm:$0xff]  }
   0x9   :  { %844 = vmatpush3.bf16.msra.mxu1 %v914_v7  ;;  %823 = vmatprep.subr.bf16.mxu0 %v915_v8  ;;  %v931_v24 = vld [vmem:[%s1217_s1 + $0x48] sm:$0xff]   ;;  %v935_v28 = vld [vmem:[%s1217_s1 + $0x40] sm:$0xff]   ;;  %v943_v38 = vld [vmem:[%s1217_s1 + $0x178] sm:$0xff]  }
   0xa   :  { %845 = vmatprep.subr.bf16.mxu1 %v916_v9  ;;  %v932_v25 = vld [vmem:[%s1217_s1 + $0xc8] sm:$0xff]   ;;  %v936_v29 = vld [vmem:[%s1217_s1 + $0xc0] sm:$0xff]   ;;  %v944_v39 = vld [vmem:[%s1217_s1 + $0x1f8] sm:$0xff]  }
   0xb   :  { %v933_v26 = vld [vmem:[%s1217_s1 + $0x8] sm:$0xff]   ;;  %v937_v30 = vld [vmem:[%s1217_s1] sm:$0xff]   ;;  %v945_v40 = vld [vmem:[%s1217_s1 + $0x138] sm:$0xff]  }
   0xc   :  { %824 = vmatpush3.bf16.msra.mxu0 %v917_v10  ;;  %v934_v27 = vld [vmem:[%s1217_s1 + $0x88] sm:$0xff]   ;;  %v938_v31 = vld [vmem:[%s1217_s1 + $0x80] sm:$0xff]   ;;  %v946_v41 = vld [vmem:[%s1217_s1 + $0x1b8] sm:$0xff]  }
   0xd   :  { %846 = vmatpush3.bf16.msra.mxu1 %v918_v11  ;;  %825 = vmatprep.subr.bf16.mxu0 %v919_v12  ;;  %v18_v32 = vld [vmem:[%s1218_s0] sm:$0xff]  ;;  %v19_v33 = vld [vmem:[%s1218_s0 + $0x8] sm:$0xff]  ;;  %v947_v42 = vld [vmem:[%s1217_s1 + $0x170] sm:$0xff]  }
   0xe   :  { %847 = vmatprep.subr.bf16.mxu1 %v920_v13  ;;  %v745_v34 = vcombine.low %v18_v32, %v18_v32  ;;  %v746_v35 = vcombine.high %v18_v32, %v18_v32  ;;  %v747_v36 = vcombine.low %v19_v33, %v19_v33  ;;  %v748_v37 = vcombine.high %v19_v33, %v19_v33  ;;  %v948_v43 = vld [vmem:[%s1217_s1 + $0x1f0] sm:$0xff]   ;;  %v951_v46 = vld [vmem:[%s1217_s1 + $0x168] sm:$0xff]   ;;  %v955_v50 = vld [vmem:[%s1217_s1 + $0x160] sm:$0xff]  }
   0xf   :  { %v949_v44 = vld [vmem:[%s1217_s1 + $0x130] sm:$0xff]   ;;  %v952_v47 = vld [vmem:[%s1217_s1 + $0x1e8] sm:$0xff]   ;;  %v956_v51 = vld [vmem:[%s1217_s1 + $0x1e0] sm:$0xff]  }
  0x10   :  { %826 = vmatpush3.bf16.msra.mxu0 %v921_v14  ;;  %594 = vmatprep.mubr.bf16.mxu0 %v746_v35  ;;  %v950_v45 = vld [vmem:[%s1217_s1 + $0x1b0] sm:$0xff]   ;;  %v953_v48 = vld [vmem:[%s1217_s1 + $0x128] sm:$0xff]   ;;  %v957_v52 = vld [vmem:[%s1217_s1 + $0x120] sm:$0xff]  }
  0x11   :  { %848 = vmatpush3.bf16.msra.mxu1 %v922_v15  ;;  %827 = vmatprep.subr.bf16.mxu0 %v923_v16  ;;  %v954_v49 = vld [vmem:[%s1217_s1 + $0x1a8] sm:$0xff]   ;;  %v958_v53 = vld [vmem:[%s1217_s1 + $0x1a0] sm:$0xff]   ;;  %v959_v54 = vld [vmem:[%s1217_s1 + $0x158] sm:$0xff]  }
  0x12   :  { %849 = vmatprep.subr.bf16.mxu1 %v924_v17  ;;  %634 = vmatprep.mubr.bf16.mxu1 %v748_v37  ;;  %v960_v55 = vld [vmem:[%s1217_s1 + $0x1d8] sm:$0xff]   ;;  %v963_v58 = vld [vmem:[%s1217_s1 + $0x150] sm:$0xff]   ;;  %v967_v62 = vld [vmem:[%s1217_s1 + $0x148] sm:$0xff]  }
  0x13   :  { %v961_v56 = vld [vmem:[%s1217_s1 + $0x118] sm:$0xff]   ;;  %v964_v59 = vld [vmem:[%s1217_s1 + $0x1d0] sm:$0xff]   ;;  %v968_v63 = vld [vmem:[%s1217_s1 + $0x1c8] sm:$0xff]  }
  0x14   :  { %828 = vmatpush3.bf16.msra.mxu0 %v925_v18  ;;  %v962_v57 = vld [vmem:[%s1217_s1 + $0x198] sm:$0xff]   ;;  %v965_v60 = vld [vmem:[%s1217_s1 + $0x110] sm:$0xff]   ;;  %v969_v0 = vld [vmem:[%s1217_s1 + $0x108] sm:$0xff]  }
  0x15   :  { %850 = vmatpush3.bf16.msra.mxu1 %v926_v19  ;;  %829 = vmatprep.subr.bf16.mxu0 %v927_v20  ;;  %v966_v61 = vld [vmem:[%s1217_s1 + $0x190] sm:$0xff]   ;;  %v970_v1 = vld [vmem:[%s1217_s1 + $0x188] sm:$0xff]   ;;  %v971_v2 = vld [vmem:[%s1217_s1 + $0x140] sm:$0xff]  }
  0x16   :  { %851 = vmatprep.subr.bf16.mxu1 %v928_v21  ;;  %v972_v3 = vld [vmem:[%s1217_s1 + $0x1c0] sm:$0xff]   ;;  %v20_v6 = vld [vmem:[%s1218_s0 + $0x10] sm:$0xff]  ;;  %v21_v9 = vld [vmem:[%s1218_s0 + $0x18] sm:$0xff] }
  0x17   :  { %v973_v4 = vld [vmem:[%s1217_s1 + $0x100] sm:$0xff]   ;;  %v749_v7 = vcombine.low %v20_v6, %v20_v6  ;;  %v750_v8 = vcombine.high %v20_v6, %v20_v6  ;;  %v751_v10 = vcombine.low %v21_v9, %v21_v9  ;;  %v752_v11 = vcombine.high %v21_v9, %v21_v9 }
  0x18   :  { %830 = vmatpush3.bf16.msra.mxu0 %v929_v22  ;;  %v974_v5 = vld [vmem:[%s1217_s1 + $0x180] sm:$0xff]  }
  0x19   :  { %852 = vmatpush3.bf16.msra.mxu1 %v930_v23  ;;  %831 = vmatprep.subr.bf16.mxu0 %v931_v24  ;;  %v817_v32 = vld [vmem:[%s1219_s2] ss:$0 sm:$0xff] }
  0x1a   :  { %853 = vmatprep.subr.bf16.mxu1 %v932_v25 }
  0x1c   :  { %832 = vmatpush3.bf16.msra.mxu0 %v933_v26 }
  0x1d   :  { %854 = vmatpush3.bf16.msra.mxu1 %v934_v27  ;;  %833 = vmatprep.subr.bf16.mxu0 %v935_v28 }
  0x1e   :  { %855 = vmatprep.subr.bf16.mxu1 %v936_v29 }
  0x20   :  { %834 = vmatpush3.bf16.msra.mxu0 %v937_v30 }
  0x21   :  { %856 = vmatpush3.bf16.msra.mxu1 %v938_v31  ;;  %863 = vmatprep.subr.bf16.mxu0 %v943_v38 }
  0x22   :  { %885 = vmatprep.subr.bf16.mxu1 %v944_v39 }
  0x23   :  { %595 = vmatmul.mubr.bf16.vlgmr.msra.gmra.mxu0 %v745_v34 }
  0x24   :  { %635 = vmatmul.mubr.bf16.vlgmr.msra.gmra.mxu1 %v747_v36  ;;  %864 = vmatpush3.bf16.msra.mxu0 %v945_v40  ;;  %v818_v36 = vld [vmem:[%s1220_s3] ss:$0 sm:$0xff] }
  0x25   :  { %886 = vmatpush3.bf16.msra.mxu1 %v946_v41  ;;  %865 = vmatprep.subr.bf16.mxu0 %v947_v42 }
  0x26   :  { %887 = vmatprep.subr.bf16.mxu1 %v948_v43  ;;  %674 = vmatprep.mubr.bf16.mxu0 %v750_v8 }
  0x27   :  { %714 = vmatprep.mubr.bf16.mxu1 %v752_v11 }
  0x28   :  { %866 = vmatpush3.bf16.msra.mxu0 %v949_v44 }
  0x29   :  { %888 = vmatpush3.bf16.msra.mxu1 %v950_v45  ;;  %867 = vmatprep.subr.bf16.mxu0 %v951_v46 }
  0x2a   :  { %889 = vmatprep.subr.bf16.mxu1 %v952_v47 }
  0x2c   :  { %868 = vmatpush3.bf16.msra.mxu0 %v953_v48 }
  0x2d   :  { %890 = vmatpush3.bf16.msra.mxu1 %v954_v49  ;;  %869 = vmatprep.subr.bf16.mxu0 %v955_v50 }
  0x2e   :  { %891 = vmatprep.subr.bf16.mxu1 %v956_v51 }
  0x30   :  { %870 = vmatpush3.bf16.msra.mxu0 %v957_v52 }
  0x31   :  { %892 = vmatpush3.bf16.msra.mxu1 %v958_v53  ;;  %871 = vmatprep.subr.bf16.mxu0 %v959_v54 }
  0x32   :  { %893 = vmatprep.subr.bf16.mxu1 %v960_v55 }
  0x34   :  { %872 = vmatpush3.bf16.msra.mxu0 %v961_v56 }
  0x35   :  { %894 = vmatpush3.bf16.msra.mxu1 %v962_v57  ;;  %873 = vmatprep.subr.bf16.mxu0 %v963_v58 }
  0x36   :  { %895 = vmatprep.subr.bf16.mxu1 %v964_v59 }
  0x38   :  { %874 = vmatpush3.bf16.msra.mxu0 %v965_v60 }
  0x39   :  { %896 = vmatpush3.bf16.msra.mxu1 %v966_v61  ;;  %875 = vmatprep.subr.bf16.mxu0 %v967_v62 }
  0x3a   :  { %897 = vmatprep.subr.bf16.mxu1 %v968_v63 }
  0x3c   :  { %876 = vmatpush3.bf16.msra.mxu0 %v969_v0 }
  0x3d   :  { %898 = vmatpush3.bf16.msra.mxu1 %v970_v1  ;;  %877 = vmatprep.subr.bf16.mxu0 %v971_v2 }
  0x3e   :  { %899 = vmatprep.subr.bf16.mxu1 %v972_v3 }
  0x40   :  { %878 = vmatpush3.bf16.msra.mxu0 %v973_v4 }
  0x41   :  { %900 = vmatpush3.bf16.msra.mxu1 %v974_v5 }
  0x43   :  { %675 = vmatmul.mubr.bf16.vlgmr.msra.gmra.mxu0 %v749_v7 }
  0x44   :  { %715 = vmatmul.mubr.bf16.vlgmr.msra.gmra.mxu1 %v751_v10 }
  0xe3   :  { %v835_v12 = vpop.f32.mrf.mxu0 }
  0xe4   :  { %v857_v13 = vpop.f32.mrf.mxu1 }
  0xe5   :  { %v836_v14 = vpop.f32.mrf.mxu0 }
  0xe6   :  { %v858_v15 = vpop.f32.mrf.mxu1  ;;  %v837_v20 = vadd.f32 %v836_v14, %v835_v12 }
  0xe7   :  { %v838_v16 = vpop.f32.mrf.mxu0  ;;  %v859_v21 = vadd.f32 %v858_v15, %v857_v13 }
  0xe8   :  { %v860_v17 = vpop.f32.mrf.mxu1 }
  0xe9   :  { %v839_v18 = vpop.f32.mrf.mxu0  ;;  %v637_v26 = vadd.f32 %v859_v21, %v837_v20 }
  0xea   :  { %v861_v19 = vpop.f32.mrf.mxu1 }
 0x103   :  { %v879_v22 = vpop.f32.mrf.mxu0 }
 0x104   :  { %v901_v23 = vpop.f32.mrf.mxu1 }
 0x105   :  { %v880_v24 = vpop.f32.mrf.mxu0 }
 0x106   :  { %v902_v25 = vpop.f32.mrf.mxu1  ;;  %v881_v27 = vadd.f32 %v880_v24, %v879_v22 }
 0x107   :  { %v882_v28 = vpop.f32.mrf.mxu0  ;;  %v903_v31 = vadd.f32 %v902_v25, %v901_v23 }
 0x108   :  { %v904_v29 = vpop.f32.mrf.mxu1  ;;  %v677_v30 = vadd.f32 %v881_v27, %v637_v26 }
 0x109   :  { %v883_v33 = vpop.f32.mrf.mxu0 }
 0x10a   :  { %v905_v34 = vpop.f32.mrf.mxu1  ;;  %v717_v35 = vadd.f32 %v903_v31, %v677_v30 }
 0x10c   :  { %v729_v37 = vmul.f32 %v817_v32, %v717_v35 }
 0x10e   :  { %v737_v38 = vadd.f32 %v818_v36, %v729_v37 }
 0x110   :  { %v738_v39 = vpack.c.bf16 %v737_v38, %v737_v38 }
 0x112   :  { %740 = vst.msk [vmem:[%s1221_s4] sm:$0xf] %vm739_vm0, %v738_v39 }

// kernel: unet_forward.16
= control target key start
LH: loop header
LB: loop body
LE: loop exit
PB: predicated region body
PF: predicated region fallthrough
CT: control target
= control target key end

     0   :  { %v525_v1 = vmov 0   ;;  %vm137_vm0 = vcmask 523264   ;;  %v390_v43 = vlaneseq  ;;  %s677_s3 = inlined_call_operand.vmem [shape: bf16[64,512], index: 3, kind: input, shape index: {}]   ;;  %s678_s1 = inlined_call_operand.vmem [shape: bf16[8,64], index: 1, kind: input, shape index: {}]   ;;  %s679_s2 = inlined_call_operand.vmem [shape: bf16[64,512], index: 2, kind: input, shape index: {}]   ;;  %s680_s0 = inlined_call_operand.vmem [shape: bf16[8,64], index: 0, kind: input, shape index: {}]   ;;  %s681_s4 = inlined_call_operand.vmem [shape: f32[1,512], index: 4, kind: input, shape index: {}]   ;;  %s682_s5 = inlined_call_operand.vmem [shape: bf16[8,512], index: 5, kind: output, shape index: {}]  }
   0x1   :  { %v477_v0 = vld [vmem:[%s677_s3 + $0x64] ss:$16 sps:$4 sm:$0xff]   ;;  %173 = vmatprep.mubr.bf16.mxu0 %v525_v1  ;;  %214 = vmatprep.mubr.bf16.mxu1 %v525_v1  ;;  %v479_v2 = vld [vmem:[%s677_s3 + $0x6c] ss:$16 sps:$4 sm:$0xff]   ;;  %v481_v3 = vld [vmem:[%s677_s3 + $0x60] ss:$16 sps:$4 sm:$0xff]  }
   0x2   :  { %149 = vmatprep.subr.bf16.mxu0 %v477_v0  ;;  %v482_v4 = vld [vmem:[%s677_s3 + $0x68] ss:$16 sps:$4 sm:$0xff]   ;;  %190 = vmatprep.subr.bf16.mxu1 %v479_v2  ;;  %v483_v5 = vld [vmem:[%s677_s3 + $0x44] ss:$16 sps:$4 sm:$0xff]   ;;  %v485_v6 = vld [vmem:[%s677_s3 + $0x4c] ss:$16 sps:$4 sm:$0xff]  }
   0x3   :  { %150 = vmatpush1.bf16.msra.mxu0 %v481_v3  ;;  %191 = vmatpush1.bf16.msra.mxu1 %v482_v4  ;;  %v487_v7 = vld [vmem:[%s677_s3 + $0x40] ss:$16 sps:$4 sm:$0xff]   ;;  %v488_v8 = vld [vmem:[%s677_s3 + $0x48] ss:$16 sps:$4 sm:$0xff]   ;;  %v489_v9 = vld [vmem:[%s677_s3 + $0x24] ss:$16 sps:$4 sm:$0xff]  }
   0x4   :  { %151 = vmatprep.subr.bf16.mxu0 %v483_v5  ;;  %192 = vmatprep.subr.bf16.mxu1 %v485_v6  ;;  %v491_v10 = vld [vmem:[%s677_s3 + $0x2c] ss:$16 sps:$4 sm:$0xff]   ;;  %v493_v11 = vld [vmem:[%s677_s3 + $0x20] ss:$16 sps:$4 sm:$0xff]   ;;  %v494_v12 = vld [vmem:[%s677_s3 + $0x28] ss:$16 sps:$4 sm:$0xff]  }
   0x5   :  { %v495_v13 = vld [vmem:[%s677_s3 + $0x4] ss:$16 sps:$4 sm:$0xff]   ;;  %v497_v14 = vld [vmem:[%s677_s3 + $0xc] ss:$16 sps:$4 sm:$0xff]   ;;  %v499_v15 = vld [vmem:[%s677_s3] ss:$16 sps:$4 sm:$0xff]  }
   0x6   :  { %v500_v16 = vld [vmem:[%s677_s3 + $0x8] ss:$16 sps:$4 sm:$0xff]   ;;  %v23_v17 = vld [vmem:[%s678_s1] sm:$0xf]  ;;  %v503_v18 = vld [vmem:[%s679_s2 + $0x64] ss:$16 sps:$4 sm:$0xff]  }
   0x7   :  { %152 = vmatpush1.bf16.msra.mxu0 %v487_v7  ;;  %193 = vmatpush1.bf16.msra.mxu1 %v488_v8  ;;  %v506_v19 = vld [vmem:[%s679_s2 + $0x6c] ss:$16 sps:$4 sm:$0xff]   ;;  %v24_v20 = vmax.bf16 %v525_v1, %v23_v17  ;;  %v501_v21 = vld [vmem:[%s679_s2 + $0x60] ss:$16 sps:$4 sm:$0xff]   ;;  %v504_v22 = vld [vmem:[%s679_s2 + $0x68] ss:$16 sps:$4 sm:$0xff]  }
   0x8   :  { %153 = vmatprep.subr.bf16.mxu0 %v489_v9  ;;  %194 = vmatprep.subr.bf16.mxu1 %v491_v10  ;;  %v509_v23 = vld [vmem:[%s679_s2 + $0x44] ss:$16 sps:$4 sm:$0xff]   ;;  %v512_v24 = vld [vmem:[%s679_s2 + $0x4c] ss:$16 sps:$4 sm:$0xff]   ;;  %v507_v25 = vld [vmem:[%s679_s2 + $0x40] ss:$16 sps:$4 sm:$0xff]  }
   0x9   :  { %v510_v26 = vld [vmem:[%s679_s2 + $0x48] ss:$16 sps:$4 sm:$0xff]   ;;  %v515_v27 = vld [vmem:[%s679_s2 + $0x24] ss:$16 sps:$4 sm:$0xff]   ;;  %v518_v28 = vld [vmem:[%s679_s2 + $0x2c] ss:$16 sps:$4 sm:$0xff]  }
   0xa   :  { %v513_v29 = vld [vmem:[%s679_s2 + $0x20] ss:$16 sps:$4 sm:$0xff]   ;;  %v516_v30 = vld [vmem:[%s679_s2 + $0x28] ss:$16 sps:$4 sm:$0xff]   ;;  %v521_v31 = vld [vmem:[%s679_s2 + $0x4] ss:$16 sps:$4 sm:$0xff]  }
   0xb   :  { %154 = vmatpush1.bf16.msra.mxu0 %v493_v11  ;;  %195 = vmatpush1.bf16.msra.mxu1 %v494_v12  ;;  %v524_v32 = vld [vmem:[%s679_s2 + $0xc] ss:$16 sps:$4 sm:$0xff]   ;;  %v519_v33 = vld [vmem:[%s679_s2] ss:$16 sps:$4 sm:$0xff]   ;;  %v522_v34 = vld [vmem:[%s679_s2 + $0x8] ss:$16 sps:$4 sm:$0xff]  }
   0xc   :  { %155 = vmatprep.subr.bf16.mxu0 %v495_v13  ;;  %196 = vmatprep.subr.bf16.mxu1 %v497_v14  ;;  %v21_v35 = vld [vmem:[%s680_s0] sm:$0xf]  ;;  %v391_v46 = vshrl.u32 %v390_v43, 7 }
   0xd   :  { %v22_v36 = vmax.bf16 %v525_v1, %v21_v35  ;;  %v388_v49 = vld [vmem:[%s681_s4] sm:$0xf] }
   0xe   :  { %v392_v47 = vsub.s32 0, %v391_v46  ;;  %v400_v48 = vsub.s32 2, %v391_v46  ;;  %v396_v50 = vsub.s32 1, %v391_v46  ;;  %v404_v51 = vsub.s32 3, %v391_v46 }
   0xf   :  { %156 = vmatpush1.bf16.msra.mxu0 %v499_v15  ;;  %197 = vmatpush1.bf16.msra.mxu1 %v500_v16 }
  0x10   :  { %314 = vmatprep.subr.bf16.mxu0 %v503_v18  ;;  %355 = vmatprep.subr.bf16.mxu1 %v506_v19  ;;  %v393_v53 = vrot.slane %v388_v49, %v392_v47  ;;  %v401_v55 = vrot.slane %v388_v49, %v400_v48  ;;  %v397_v58 = vrot.slane %v388_v49, %v396_v50 }
  0x11   :  { %v405_v59 = vrot.slane %v388_v49, %v404_v51 }
  0x12   :  { %452 = vmatmul.mubr.msk.bf16.vlgmr.msra.gmra.mxu0 %vm137_vm0, %v24_v20  ;;  %453 = vmatmul.mubr.msk.bf16.vlgmr.msra.gmra.mxu1 %vm137_vm0, %v24_v20 }
  0x13   :  { %315 = vmatpush1.bf16.msra.mxu0 %v501_v21  ;;  %356 = vmatpush1.bf16.msra.mxu1 %v504_v22 }
  0x14   :  { %316 = vmatprep.subr.bf16.mxu0 %v509_v23  ;;  %357 = vmatprep.subr.bf16.mxu1 %v512_v24 }
  0x15   :  { %338 = vmatprep.mubr.bf16.mxu0 %v525_v1  ;;  %379 = vmatprep.mubr.bf16.mxu1 %v525_v1 }
  0x17   :  { %317 = vmatpush1.bf16.msra.mxu0 %v507_v25  ;;  %358 = vmatpush1.bf16.msra.mxu1 %v510_v26 }
  0x18   :  { %318 = vmatprep.subr.bf16.mxu0 %v515_v27  ;;  %359 = vmatprep.subr.bf16.mxu1 %v518_v28 }
  0x1b   :  { %319 = vmatpush1.bf16.msra.mxu0 %v513_v29  ;;  %360 = vmatpush1.bf16.msra.mxu1 %v516_v30 }
  0x1c   :  { %320 = vmatprep.subr.bf16.mxu0 %v521_v31  ;;  %361 = vmatprep.subr.bf16.mxu1 %v524_v32 }
  0x1f   :  { %321 = vmatpush1.bf16.msra.mxu0 %v519_v33  ;;  %362 = vmatpush1.bf16.msra.mxu1 %v522_v34 }
  0x22   :  { %470 = vmatmul.mubr.msk.bf16.vlgmr.msra.gmra.mxu0 %vm137_vm0, %v22_v36  ;;  %471 = vmatmul.mubr.msk.bf16.vlgmr.msra.gmra.mxu1 %vm137_vm0, %v22_v36 }
  0xd2   :  { %v175_v37 = vpop.f32.mrf.mxu0  ;;  %v216_v38 = vpop.f32.mrf.mxu1 }
  0xd4   :  { %v177_v39 = vpop.f32.mrf.mxu0  ;;  %v218_v40 = vpop.f32.mrf.mxu1 }
  0xd6   :  { %v179_v41 = vpop.f32.mrf.mxu0  ;;  %v220_v42 = vpop.f32.mrf.mxu1 }
  0xd8   :  { %v180_v44 = vpop.f32.mrf.mxu0  ;;  %v221_v45 = vpop.f32.mrf.mxu1 }
  0xe2   :  { %v340_v52 = vpop.f32.mrf.mxu0  ;;  %v381_v54 = vpop.f32.mrf.mxu1 }
  0xe3   :  { %v341_v56 = vadd.f32 %v340_v52, %v175_v37  ;;  %v382_v57 = vadd.f32 %v381_v54, %v216_v38 }
  0xe4   :  { %v342_v60 = vpop.f32.mrf.mxu0  ;;  %v383_v61 = vpop.f32.mrf.mxu1 }
  0xe5   :  { %v343_v62 = vadd.f32 %v342_v60, %v177_v39  ;;  %v384_v63 = vadd.f32 %v383_v61, %v218_v40  ;;  %v410_v2 = vmul.f32 %v393_v53, %v341_v56  ;;  %v412_v3 = vmul.f32 %v401_v55, %v382_v57 }
  0xe6   :  { %v344_v0 = vpop.f32.mrf.mxu0  ;;  %v385_v1 = vpop.f32.mrf.mxu1 }
  0xe7   :  { %v411_v4 = vmul.f32 %v397_v58, %v343_v62  ;;  %v413_v5 = vmul.f32 %v405_v59, %v384_v63 }
  0xe8   :  { %v345_v6 = vpop.f32.mrf.mxu0  ;;  %v386_v7 = vpop.f32.mrf.mxu1 }
  0xe9   :  { %v474_v8 = vpack.c.bf16 %v411_v4, %v410_v2  ;;  %v475_v9 = vpack.c.bf16 %v413_v5, %v412_v3 }
  0xeb   :  { %430 = vst [vmem:[%s682_s5] sm:$0xff] %v474_v8  ;;  %431 = vst [vmem:[%s682_s5 + $0x8] sm:$0xff] %v475_v9 }

// kernel: unet_forward.17
= control target key start
LH: loop header
LB: loop body
LE: loop exit
PB: predicated region body
PF: predicated region fallthrough
CT: control target
= control target key end

     0   :  { %s603_s18 = smov 0   ;;  %s654_s0 = inlined_call_operand.vmem [shape: bf16[32,32], index: 0, kind: input, shape index: {}]   ;;  %s655_s1 = inlined_call_operand.vmem [shape: bf16[32,32], index: 1, kind: input, shape index: {}]   ;;  %s656_s2 = inlined_call_operand.vmem [shape: bf16[32,256], index: 2, kind: input, shape index: {}]   ;;  %s657_s3 = inlined_call_operand.vmem [shape: bf16[32,256], index: 3, kind: input, shape index: {}]   ;;  %s658_s4 = inlined_call_operand.vmem [shape: f32[1,256], index: 4, kind: input, shape index: {}]   ;;  %s659_s5 = inlined_call_operand.vmem [shape: bf16[32,256], index: 5, kind: output, shape index: {}]  }
   0x1 LB: > { %s512_s19 = sadd.s32 4294967295, %s570_s18   ;;  %p516_p0 = scmp.ge.s32.totalorder %s570_s18, 1  ;;  %s570_s18 = sphi %s603_s18, %s15_s18  }
   0x2   : > { %p199_p1 = scmp.lt.s32.totalorder %s570_s18, 3 }
   0x4   : > { %p200_p2 = pnand %p516_p0, %p199_p1 }
   0x5   : > { %s517_s22 = sshll.u32 (!%p200_p2), %s512_s19, 1 }
   0x6   : > { %203 = sbr.rel (%p200_p2) target bundleno = 227 (0xe3), region = 40  ;;  %p234_p3 = scmp.lt.s32.totalorder (!%p200_p2), %s517_s22, 3 }
   0xb   : > { %v552_v0 = vld [vmem:[%s657_s3 + $0x14] ss:$8 sps:$4 sm:$0xff]   ;;  %v572_v2 = vmov 0   ;;  %v556_v3 = vld [vmem:[%s657_s3 + $0x10] ss:$8 sps:$4 sm:$0xff]   ;;  %s661_s22 = smov (!%p234_p3, %s517_s22), 3  ;;  %v414_v19 = vlaneseq }
   0xc   : > { %v554_v1 = vld [vmem:[%s656_s2 + $0x14] ss:$8 sps:$4 sm:$0xff]   ;;  %330 = vmatprep.mubr.bf16.mxu0 %v572_v2  ;;  %401 = vmatprep.mubr.bf16.mxu1 %v572_v2  ;;  %v557_v4 = vld [vmem:[%s656_s2 + $0x10] ss:$8 sps:$4 sm:$0xff]   ;;  %v558_v5 = vld [vmem:[%s657_s3 + $0x4] ss:$8 sps:$4 sm:$0xff]  }
   0xd   : > { %310 = vmatprep.subr.bf16.mxu0 %v552_v0  ;;  %381 = vmatprep.subr.bf16.mxu1 %v554_v1  ;;  %v560_v6 = vld [vmem:[%s656_s2 + $0x4] ss:$8 sps:$4 sm:$0xff]   ;;  %v562_v7 = vld [vmem:[%s657_s3] ss:$8 sps:$4 sm:$0xff]   ;;  %s518_s12 = sshll.u32 %s661_s22, 2  ;;  %vm294_vm0 = vcmask 261120  }
   0xe   : > { %311 = vmatpush1.bf16.msra.mxu0 %v556_v3  ;;  %382 = vmatpush1.bf16.msra.mxu1 %v557_v4  ;;  %v563_v8 = vld [vmem:[%s656_s2] ss:$8 sps:$4 sm:$0xff]   ;;  %s243_s15 = scalar_lea.vmem %s655_s1, %s518_s12  ;;  %s237_s19 = scalar_lea.vmem %s654_s0, %s518_s12  ;;  %v415_v20 = vshrl.u32 %v414_v19, 7 }
   0xf   : > { %312 = vmatprep.subr.bf16.mxu0 %v558_v5  ;;  %383 = vmatprep.subr.bf16.mxu1 %v560_v6  ;;  %v257_v9 = vld [vmem:[%s243_s15] sm:$0xf]  ;;  %v258_v10 = vld [vmem:[%s243_s15 + $0x4] sm:$0xf]  ;;  %s540_s23 = sshll.u32 %s661_s22, 3 }
  0x10   : > { %v253_v11 = vld [vmem:[%s237_s19] sm:$0xf]  ;;  %v259_v12 = vmax.bf16 %v572_v2, %v257_v9  ;;  %v260_v13 = vmax.bf16 %v572_v2, %v258_v10  ;;  %v254_v14 = vld [vmem:[%s237_s19 + $0x4] sm:$0xf]  ;;  %v416_v21 = vsub.s32 0, %v415_v20  ;;  %v420_v22 = vsub.s32 1, %v415_v20  ;;  %s250_s26 = scalar_lea.vmem %s659_s5, %s540_s23 }
  0x11   : > { %v255_v15 = vmax.bf16 %v572_v2, %v253_v11  ;;  %v256_v16 = vmax.bf16 %v572_v2, %v254_v14  ;;  %v412_v23 = vld [vmem:[%s658_s4] sm:$0x3] }
  0x12   : > { %313 = vmatpush1.bf16.msra.mxu0 %v562_v7  ;;  %384 = vmatpush1.bf16.msra.mxu1 %v563_v8  ;;  %v524_v17 = vcombine.low %v259_v12, %v260_v13  ;;  %v417_v27 = vrot.slane %v412_v23, %v416_v21  ;;  %v421_v29 = vrot.slane %v412_v23, %v420_v22 }
  0x13   : > { %v530_v18 = vcombine.low %v255_v15, %v256_v16 }
  0x15   : > { %529 = vmatmul.mubr.msk.bf16.vlgmr.msra.gmra.mxu0 %vm294_vm0, %v524_v17  ;;  %535 = vmatmul.mubr.msk.bf16.vlgmr.msra.gmra.mxu1 %vm294_vm0, %v530_v18 }
  0xd5   : > { %v332_v24 = vpop.f32.mrf.mxu0  ;;  %v403_v25 = vpop.f32.mrf.mxu1 }
  0xd6   : > { %v404_v26 = vadd.f32 %v403_v25, %v332_v24 }
  0xd7   : > { %v334_v28 = vpop.f32.mrf.mxu0  ;;  %v405_v30 = vpop.f32.mrf.mxu1 }
  0xd8   : > { %v406_v31 = vadd.f32 %v405_v30, %v334_v28  ;;  %v424_v34 = vmul.f32 %v417_v27, %v404_v26 }
  0xd9   : > { %v336_v32 = vpop.f32.mrf.mxu0  ;;  %v407_v33 = vpop.f32.mrf.mxu1 }
  0xda   : > { %v425_v35 = vmul.f32 %v421_v29, %v406_v31  ;;  %v408_v36 = vadd.f32 %v407_v33, %v336_v32 }
  0xdb   : > { %v338_v37 = vpop.f32.mrf.mxu0  ;;  %v409_v38 = vpop.f32.mrf.mxu1 }
  0xdc   : > { %v541_v39 = vpack.c.bf16 %v425_v35, %v424_v34  ;;  %v410_v40 = vadd.f32 %v409_v38, %v338_v37  ;;  %v426_v41 = vmul.f32 %v417_v27, %v408_v36 }
  0xde   : > { %440 = vst [vmem:[%s250_s26] sm:$0xff] %v541_v39  ;;  %v427_v42 = vmul.f32 %v421_v29, %v410_v40 }
  0xe0   : > { %v542_v43 = vpack.c.bf16 %v427_v42, %v426_v41 }
  0xe2   : > { %441 = vst [vmem:[%s250_s26 + $0x8] sm:$0xff] %v542_v43 }
  0xe3 PF: > { %s15_s18 = sadd.s32 1, %s570_s18  }
  0xe4   : > { %p12_p4 = scmp.ge.s32.totalorder %s15_s18, 4  }
  0xe6   :  { %14 = sbr.rel (!%p12_p4) target bundleno = 1 (0x1), region = 73 }

// kernel: unet_forward.18
= control target key start
LH: loop header
LB: loop body
LE: loop exit
PB: predicated region body
PF: predicated region fallthrough
CT: control target
= control target key end

     0   :  { %s768_s18 = smov 0   ;;  %s830_s0 = inlined_call_operand.vmem [shape: bf16[128,16], index: 0, kind: input, shape index: {}]   ;;  %s831_s1 = inlined_call_operand.vmem [shape: bf16[128,16], index: 1, kind: input, shape index: {}]   ;;  %s832_s2 = inlined_call_operand.vmem [shape: bf16[16,128], index: 2, kind: input, shape index: {}]   ;;  %s833_s3 = inlined_call_operand.vmem [shape: bf16[16,128], index: 3, kind: input, shape index: {}]   ;;  %s834_s4 = inlined_call_operand.vmem [shape: f32[1,128], index: 4, kind: input, shape index: {}]   ;;  %s835_s5 = inlined_call_operand.vmem [shape: bf16[128,128], index: 5, kind: output, shape index: {}]  }
   0x1 LB: > { %s617_s19 = sadd.s32 4294967295, %s735_s18   ;;  %p621_p0 = scmp.ge.s32.totalorder %s735_s18, 1  ;;  %s735_s18 = sphi %s768_s18, %s15_s18  }
   0x2   : > { %p199_p1 = scmp.lt.s32.totalorder %s735_s18, 3 }
   0x4   : > { %p200_p2 = pnand %p621_p0, %p199_p1 }
   0x5   : > { %s622_s22 = sshll.u32 (!%p200_p2), %s617_s19, 3 }
   0x6   : > { %203 = sbr.rel (%p200_p2) target bundleno = 235 (0xeb), region = 40  ;;  %p233_p3 = scmp.lt.s32.totalorder (!%p200_p2), %s622_s22, 15 }
   0xb   : > { %v727_v0 = vld [vmem:[%s833_s3] sm:$0xff]   ;;  %s837_s22 = smov (!%p233_p3, %s622_s22), 15  ;;  %vm313_vm0 = vcmask 130048   ;;  %v737_v5 = vmov 0  }
   0xc   : > { %v728_v1 = vld [vmem:[%s832_s2] sm:$0xff]   ;;  %698 = vmatprep.subr.bf16.mxu0 %v727_v0  ;;  %s782_s25 = sshll.u32 %s837_s22, 2 }
   0xd   : > { %708 = vmatprep.subr.bf16.mxu1 %v728_v1  ;;  %699 = vmatpush3.bf16.msra.mxu0 %v727_v0  ;;  %s788_s28 = scalar_lea.vmem %s831_s1, %s782_s25  ;;  %s794_s6 = scalar_lea.vmem %s830_s0, %s782_s25  ;;  %v646_v49 = vld [vmem:[%s834_s4] ss:$0 sm:$0xff] }
   0xe   : > { %709 = vmatpush3.bf16.msra.mxu1 %v728_v1  ;;  %v267_v2 = vld [vmem:[%s788_s28] sm:$0xf]  ;;  %v268_v3 = vld [vmem:[%s788_s28 + $0x4] sm:$0xf]  ;;  %v269_v10 = vld [vmem:[%s788_s28 + $0x8] sm:$0xf]  ;;  %s248_s11 = scalar_lea.vmem %s835_s5, %s782_s25 }
   0xf   : > { %v251_v4 = vld [vmem:[%s794_s6] sm:$0xf]  ;;  %v275_v6 = vmax.bf16 %v737_v5, %v267_v2  ;;  %v276_v7 = vmax.bf16 %v737_v5, %v268_v3  ;;  %v252_v8 = vld [vmem:[%s794_s6 + $0x4] sm:$0xf]  ;;  %v270_v11 = vld [vmem:[%s788_s28 + $0xc] sm:$0xf]  ;;  %v277_v13 = vmax.bf16 %v737_v5, %v269_v10 }
  0x10   : > { %v259_v9 = vmax.bf16 %v737_v5, %v251_v4  ;;  %v260_v12 = vmax.bf16 %v737_v5, %v252_v8  ;;  %v278_v14 = vmax.bf16 %v737_v5, %v270_v11  ;;  %v253_v15 = vld [vmem:[%s794_s6 + $0x8] sm:$0xf]  ;;  %v254_v16 = vld [vmem:[%s794_s6 + $0xc] sm:$0xf]  ;;  %v271_v17 = vld [vmem:[%s788_s28 + $0x10] sm:$0xf] }
  0x11   : > { %v628_v18 = vcombine.low %v275_v6, %v276_v7  ;;  %v261_v19 = vmax.bf16 %v737_v5, %v253_v15  ;;  %v262_v20 = vmax.bf16 %v737_v5, %v254_v16  ;;  %v272_v21 = vld [vmem:[%s788_s28 + $0x14] sm:$0xf]  ;;  %v279_v22 = vmax.bf16 %v737_v5, %v271_v17  ;;  %v255_v23 = vld [vmem:[%s794_s6 + $0x10] sm:$0xf]  ;;  %v273_v29 = vld [vmem:[%s788_s28 + $0x18] sm:$0xf] }
  0x12   : > { %v256_v24 = vld [vmem:[%s794_s6 + $0x14] sm:$0xf]  ;;  %v637_v25 = vcombine.low %v259_v9, %v260_v12  ;;  %v629_v26 = vcombine.low %v277_v13, %v278_v14  ;;  %v280_v27 = vmax.bf16 %v737_v5, %v272_v21  ;;  %v263_v28 = vmax.bf16 %v737_v5, %v255_v23  ;;  %v274_v30 = vld [vmem:[%s788_s28 + $0x1c] sm:$0xf]  ;;  %v257_v31 = vld [vmem:[%s794_s6 + $0x18] sm:$0xf] }
  0x13   : > { %700 = vmatprep.mubr.msk.bf16.mxu0 %vm313_vm0, %v628_v18  ;;  %v638_v32 = vcombine.low %v261_v19, %v262_v20  ;;  %v264_v33 = vmax.bf16 %v737_v5, %v256_v24  ;;  %v258_v34 = vld [vmem:[%s794_s6 + $0x1c] sm:$0xf]  ;;  %v281_v36 = vmax.bf16 %v737_v5, %v273_v29  ;;  %v282_v37 = vmax.bf16 %v737_v5, %v274_v30 }
  0x14   : > { %710 = vmatprep.mubr.msk.bf16.mxu1 %vm313_vm0, %v637_v25  ;;  %701 = vmatmul.mubr.msk.bf16.vlgmr.msra.gmra.mxu0 %vm313_vm0, %v629_v26  ;;  %v630_v35 = vcombine.low %v279_v22, %v280_v27  ;;  %v265_v39 = vmax.bf16 %v737_v5, %v257_v31  ;;  %v266_v40 = vmax.bf16 %v737_v5, %v258_v34 }
  0x15   : > { %711 = vmatmul.mubr.msk.bf16.vlgmr.msra.gmra.mxu1 %vm313_vm0, %v638_v32  ;;  %v639_v38 = vcombine.low %v263_v28, %v264_v33  ;;  %v631_v41 = vcombine.low %v281_v36, %v282_v37 }
  0x16   : > { %704 = vmatprep.mubr.msk.bf16.mxu0 %vm313_vm0, %v630_v35  ;;  %v640_v42 = vcombine.low %v265_v39, %v266_v40 }
  0x17   : > { %714 = vmatprep.mubr.msk.bf16.mxu1 %vm313_vm0, %v639_v38 }
  0x1c   : > { %705 = vmatmul.mubr.msk.bf16.gmra.mxu0 %vm313_vm0, %v631_v41 }
  0x1d   : > { %715 = vmatmul.mubr.msk.bf16.gmra.mxu1 %vm313_vm0, %v640_v42 }
  0xd4   : > { %v702_v43 = vpop.f32.mrf.mxu0 }
  0xd5   : > { %v712_v44 = vpop.f32.mrf.mxu1 }
  0xd6   : > { %v360_v45 = vpop.f32.mrf.mxu0  ;;  %v472_v47 = vadd.f32 %v712_v44, %v702_v43 }
  0xd7   : > { %v463_v46 = vpop.f32.mrf.mxu1 }
  0xd8   : > { %v703_v48 = vpop.f32.mrf.mxu0  ;;  %v464_v51 = vadd.f32 %v463_v46, %v360_v45  ;;  %v503_v55 = vmul.f32 %v646_v49, %v472_v47 }
  0xd9   : > { %v713_v50 = vpop.f32.mrf.mxu1 }
  0xda   : > { %v475_v52 = vadd.f32 %v713_v50, %v703_v48  ;;  %v363_v53 = vpop.f32.mrf.mxu0  ;;  %v501_v60 = vmul.f32 %v646_v49, %v464_v51 }
  0xdb   : > { %v466_v54 = vpop.f32.mrf.mxu1 }
  0xdc   : > { %v504_v56 = vmul.f32 %v646_v49, %v475_v52  ;;  %v467_v57 = vadd.f32 %v466_v54, %v363_v53  ;;  %v706_v58 = vpop.f32.mrf.mxu0 }
  0xdd   : > { %v716_v59 = vpop.f32.mrf.mxu1 }
  0xde   : > { %v673_v61 = vpack.c.bf16 %v504_v56, %v503_v55  ;;  %v502_v62 = vmul.f32 %v646_v49, %v467_v57  ;;  %v376_v63 = vpop.f32.mrf.mxu0  ;;  %v488_v2 = vadd.f32 %v716_v59, %v706_v58 }
  0xdf   : > { %v479_v0 = vpop.f32.mrf.mxu1 }
  0xe0   : > { %685 = vst [vmem:[%s248_s11 + $0x8] sm:$0xff] %v673_v61   ;;  %v668_v1 = vpack.c.bf16 %v502_v62, %v501_v60  ;;  %v707_v3 = vpop.f32.mrf.mxu0  ;;  %v480_v5 = vadd.f32 %v479_v0, %v376_v63  ;;  %v507_v9 = vmul.f32 %v646_v49, %v488_v2 }
  0xe1   : > { %v717_v4 = vpop.f32.mrf.mxu1 }
  0xe2   : > { %669 = vst [vmem:[%s248_s11] sm:$0xff] %v668_v1   ;;  %v491_v6 = vadd.f32 %v717_v4, %v707_v3  ;;  %v379_v7 = vpop.f32.mrf.mxu0  ;;  %v505_v12 = vmul.f32 %v646_v49, %v480_v5 }
  0xe3   : > { %v482_v8 = vpop.f32.mrf.mxu1 }
  0xe4   : > { %v508_v10 = vmul.f32 %v646_v49, %v491_v6  ;;  %v483_v11 = vadd.f32 %v482_v8, %v379_v7 }
  0xe6   : > { %v683_v13 = vpack.c.bf16 %v508_v10, %v507_v9  ;;  %v506_v14 = vmul.f32 %v646_v49, %v483_v11 }
  0xe8   : > { %687 = vst [vmem:[%s248_s11 + $0x18] sm:$0xff] %v683_v13   ;;  %v678_v15 = vpack.c.bf16 %v506_v14, %v505_v12 }
  0xea   : > { %686 = vst [vmem:[%s248_s11 + $0x10] sm:$0xff] %v678_v15  }
  0xeb PF: > { %s15_s18 = sadd.s32 1, %s735_s18  }
  0xec   : > { %p12_p4 = scmp.ge.s32.totalorder %s15_s18, 4  }
  0xee   :  { %14 = sbr.rel (!%p12_p4) target bundleno = 1 (0x1), region = 73 }

// kernel: tile.17
= control target key start
LH: loop header
LB: loop body
LE: loop exit
PB: predicated region body
PF: predicated region fallthrough
CT: control target
= control target key end

     0   :  { %s20_s0 = inlined_call_operand.<no memory space> [shape: f32[], index: 0, kind: input, shape index: {}]   ;;  %s21_s1 = inlined_call_operand.vmem [shape: f32[1,48], index: 1, kind: output, shape index: {}]  }
   0x1   :  { %v2_v0 = vstv %s20_s0 }
   0x2   :  { %3 = vst [vmem:[%s21_s1] sm:$0x1] %v2_v0 }

// kernel: unet_forward.19
= control target key start
LH: loop header
LB: loop body
LE: loop exit
PB: predicated region body
PF: predicated region fallthrough
CT: control target
= control target key end

     0   :  { %s1529_s18 = smov 0   ;;  %s1827_s0 = inlined_call_operand.vmem [shape: bf16[512,8], index: 0, kind: input, shape index: {}]   ;;  %s1828_s1 = inlined_call_operand.vmem [shape: bf16[512,8], index: 1, kind: input, shape index: {}]   ;;  %s1829_s2 = inlined_call_operand.vmem [shape: bf16[8,48], index: 2, kind: input, shape index: {}]   ;;  %s1830_s3 = inlined_call_operand.vmem [shape: bf16[8,48], index: 3, kind: input, shape index: {}]   ;;  %s1831_s4 = inlined_call_operand.vmem [shape: f32[1,48], index: 4, kind: input, shape index: {}]   ;;  %s1832_s5 = inlined_call_operand.vmem [shape: bf16[512,48], index: 5, kind: output, shape index: {}]  }
   0x1 LB: > { %s1235_s19 = sadd.s32 4294967295, %s1496_s18   ;;  %p1239_p0 = scmp.ge.s32.totalorder %s1496_s18, 1  ;;  %s1496_s18 = sphi %s1529_s18, %s15_s18  }
   0x2   : > { %p199_p1 = scmp.lt.s32.totalorder %s1496_s18, 3 }
   0x4   : > { %p200_p2 = pnand %p1239_p0, %p199_p1 }
   0x5   : > { %s1240_s24 = sshll.u32 (!%p200_p2), %s1235_s19, 5 }
   0x6   : > { %203 = sbr.rel (%p200_p2) target bundleno = 283 (0x11b), region = 40  ;;  %p233_p3 = scmp.lt.s32.totalorder (!%p200_p2), %s1240_s24, 63 }
   0xb   : > { %v380_v0 = vld [vmem:[%s1830_s3] sm:$0xf]  ;;  %vm510_vm0 = vcmask 1043456   ;;  %s1834_s24 = smov (!%p233_p3, %s1240_s24), 63  ;;  %vm461_vm1 = vcmask 64512   ;;  %v1498_v7 = vmov 0  }
   0xc   : > { %v379_v1 = vld [vmem:[%s1829_s2] sm:$0xf]  ;;  %1479 = vmatprep.subr.msk.bf16.mxu0 %vm510_vm0, %v380_v0  ;;  %v512_v2 = vsel %vm510_vm0, %v380_v0, 0  ;;  %s1543_s25 = sshll.u32 %s1834_s24, 2  ;;  %vm1134_vm2 = vcmask 388096  }
   0xd   : > { %1480 = vmatprep.subr.msk.bf16.mxu1 %vm510_vm0, %v379_v1  ;;  %v804_v3 = vsel %vm510_vm0, %v379_v1, 0  ;;  %1412 = vmatpush3.bf16.msra.mxu0 %v512_v2  ;;  %s1549_s28 = scalar_lea.vmem %s1828_s1, %s1543_s25  ;;  %s1555_s6 = scalar_lea.vmem %s1827_s0, %s1543_s25 }
   0xe   : > { %1446 = vmatpush3.bf16.msra.mxu1 %v804_v3  ;;  %v315_v4 = vld [vmem:[%s1549_s28] sm:$0xf]  ;;  %v316_v5 = vld [vmem:[%s1549_s28 + $0x4] sm:$0xf]  ;;  %v317_v12 = vld [vmem:[%s1549_s28 + $0x8] sm:$0xf]  ;;  %s1727_s11 = scalar_lea.vmem %s1832_s5, %s1543_s25 }
   0xf   : > { %v251_v6 = vld [vmem:[%s1555_s6] sm:$0xf]  ;;  %v347_v8 = vmax.bf16 %v1498_v7, %v315_v4  ;;  %v348_v9 = vmax.bf16 %v1498_v7, %v316_v5  ;;  %v252_v10 = vld [vmem:[%s1555_s6 + $0x4] sm:$0xf]  ;;  %v318_v13 = vld [vmem:[%s1549_s28 + $0xc] sm:$0xf]  ;;  %v349_v15 = vmax.bf16 %v1498_v7, %v317_v12 }
  0x10   : > { %v283_v11 = vmax.bf16 %v1498_v7, %v251_v6  ;;  %v284_v14 = vmax.bf16 %v1498_v7, %v252_v10  ;;  %v350_v16 = vmax.bf16 %v1498_v7, %v318_v13  ;;  %v253_v17 = vld [vmem:[%s1555_s6 + $0x8] sm:$0xf]  ;;  %v254_v18 = vld [vmem:[%s1555_s6 + $0xc] sm:$0xf]  ;;  %v319_v19 = vld [vmem:[%s1549_s28 + $0x10] sm:$0xf] }
  0x11   : > { %v1246_v20 = vcombine.low %v347_v8, %v348_v9  ;;  %v285_v21 = vmax.bf16 %v1498_v7, %v253_v17  ;;  %v286_v22 = vmax.bf16 %v1498_v7, %v254_v18  ;;  %v320_v23 = vld [vmem:[%s1549_s28 + $0x14] sm:$0xf]  ;;  %v351_v24 = vmax.bf16 %v1498_v7, %v319_v19  ;;  %v255_v25 = vld [vmem:[%s1555_s6 + $0x10] sm:$0xf]  ;;  %v321_v31 = vld [vmem:[%s1549_s28 + $0x18] sm:$0xf] }
  0x12   : > { %v256_v26 = vld [vmem:[%s1555_s6 + $0x14] sm:$0xf]  ;;  %v1278_v27 = vcombine.low %v283_v11, %v284_v14  ;;  %v1247_v28 = vcombine.low %v349_v15, %v350_v16  ;;  %v352_v29 = vmax.bf16 %v1498_v7, %v320_v23  ;;  %v287_v30 = vmax.bf16 %v1498_v7, %v255_v25  ;;  %v322_v32 = vld [vmem:[%s1549_s28 + $0x1c] sm:$0xf]  ;;  %v257_v33 = vld [vmem:[%s1555_s6 + $0x18] sm:$0xf] }
  0x13   : > { %1413 = vmatprep.mubr.msk.bf16.mxu0 %vm461_vm1, %v1246_v20  ;;  %v1279_v34 = vcombine.low %v285_v21, %v286_v22  ;;  %v288_v35 = vmax.bf16 %v1498_v7, %v256_v26  ;;  %v353_v36 = vmax.bf16 %v1498_v7, %v321_v31  ;;  %v258_v37 = vld [vmem:[%s1555_s6 + $0x1c] sm:$0xf]  ;;  %v323_v38 = vld [vmem:[%s1549_s28 + $0x20] sm:$0xf]  ;;  %v324_v39 = vld [vmem:[%s1549_s28 + $0x24] sm:$0xf]  ;;  %v354_v41 = vmax.bf16 %v1498_v7, %v322_v32 }
  0x14   : > { %1447 = vmatprep.mubr.msk.bf16.mxu1 %vm461_vm1, %v1278_v27  ;;  %1414 = vmatmul.mubr.msk.bf16.vlgmr.msra.gmra.mxu0 %vm461_vm1, %v1247_v28  ;;  %v1248_v40 = vcombine.low %v351_v24, %v352_v29  ;;  %v289_v42 = vmax.bf16 %v1498_v7, %v257_v33  ;;  %v259_v43 = vld [vmem:[%s1555_s6 + $0x20] sm:$0xf]  ;;  %v260_v44 = vld [vmem:[%s1555_s6 + $0x24] sm:$0xf]  ;;  %v290_v46 = vmax.bf16 %v1498_v7, %v258_v37  ;;  %v325_v54 = vld [vmem:[%s1549_s28 + $0x28] sm:$0xf] }
  0x15   : > { %1448 = vmatmul.mubr.msk.bf16.vlgmr.msra.gmra.mxu1 %vm461_vm1, %v1279_v34  ;;  %v1280_v45 = vcombine.low %v287_v30, %v288_v35  ;;  %v355_v47 = vmax.bf16 %v1498_v7, %v323_v38  ;;  %v356_v48 = vmax.bf16 %v1498_v7, %v324_v39  ;;  %v291_v49 = vmax.bf16 %v1498_v7, %v259_v43  ;;  %v326_v55 = vld [vmem:[%s1549_s28 + $0x2c] sm:$0xf]  ;;  %v261_v56 = vld [vmem:[%s1555_s6 + $0x28] sm:$0xf]  ;;  %v327_v59 = vld [vmem:[%s1549_s28 + $0x30] sm:$0xf] }
  0x16   : > { %1417 = vmatprep.mubr.msk.bf16.mxu0 %vm461_vm1, %v1248_v40  ;;  %v292_v50 = vmax.bf16 %v1498_v7, %v260_v44  ;;  %v1249_v51 = vcombine.low %v353_v36, %v354_v41  ;;  %v1281_v52 = vcombine.low %v289_v42, %v290_v46  ;;  %v262_v58 = vld [vmem:[%s1555_s6 + $0x2c] sm:$0xf]  ;;  %v328_v60 = vld [vmem:[%s1549_s28 + $0x34] sm:$0xf]  ;;  %v263_v61 = vld [vmem:[%s1555_s6 + $0x30] sm:$0xf]  ;;  %v357_v63 = vmax.bf16 %v1498_v7, %v325_v54 }
  0x17   : > { %1451 = vmatprep.mubr.msk.bf16.mxu1 %vm461_vm1, %v1280_v45  ;;  %v1250_v53 = vcombine.low %v355_v47, %v356_v48  ;;  %v264_v62 = vld [vmem:[%s1555_s6 + $0x34] sm:$0xf]  ;;  %v358_v0 = vmax.bf16 %v1498_v7, %v326_v55  ;;  %v293_v1 = vmax.bf16 %v1498_v7, %v261_v56  ;;  %v294_v2 = vmax.bf16 %v1498_v7, %v262_v58  ;;  %v329_v11 = vld [vmem:[%s1549_s28 + $0x38] sm:$0xf]  ;;  %v330_v12 = vld [vmem:[%s1549_s28 + $0x3c] sm:$0xf] }
  0x18   : > { %v1282_v57 = vcombine.low %v291_v49, %v292_v50  ;;  %v359_v3 = vmax.bf16 %v1498_v7, %v327_v59  ;;  %v360_v4 = vmax.bf16 %v1498_v7, %v328_v60  ;;  %v295_v5 = vmax.bf16 %v1498_v7, %v263_v61  ;;  %v265_v13 = vld [vmem:[%s1555_s6 + $0x38] sm:$0xf]  ;;  %v266_v15 = vld [vmem:[%s1555_s6 + $0x3c] sm:$0xf]  ;;  %v331_v16 = vld [vmem:[%s1549_s28 + $0x40] sm:$0xf] }
  0x19   : > { %v296_v6 = vmax.bf16 %v1498_v7, %v264_v62  ;;  %v1251_v8 = vcombine.low %v357_v63, %v358_v0  ;;  %v1283_v9 = vcombine.low %v293_v1, %v294_v2  ;;  %v332_v17 = vld [vmem:[%s1549_s28 + $0x44] sm:$0xf]  ;;  %v267_v18 = vld [vmem:[%s1555_s6 + $0x40] sm:$0xf]  ;;  %v361_v20 = vmax.bf16 %v1498_v7, %v329_v11  ;;  %v333_v31 = vld [vmem:[%s1549_s28 + $0x48] sm:$0xf] }
  0x1a   : > { %v1252_v10 = vcombine.low %v359_v3, %v360_v4  ;;  %v268_v19 = vld [vmem:[%s1555_s6 + $0x44] sm:$0xf]  ;;  %v362_v21 = vmax.bf16 %v1498_v7, %v330_v12  ;;  %v297_v22 = vmax.bf16 %v1498_v7, %v265_v13  ;;  %v298_v23 = vmax.bf16 %v1498_v7, %v266_v15  ;;  %v334_v32 = vld [vmem:[%s1549_s28 + $0x4c] sm:$0xf]  ;;  %v269_v33 = vld [vmem:[%s1555_s6 + $0x48] sm:$0xf] }
  0x1b   : > { %v1284_v14 = vcombine.low %v295_v5, %v296_v6  ;;  %v363_v24 = vmax.bf16 %v1498_v7, %v331_v16  ;;  %v364_v25 = vmax.bf16 %v1498_v7, %v332_v17  ;;  %v299_v26 = vmax.bf16 %v1498_v7, %v267_v18  ;;  %v270_v35 = vld [vmem:[%s1555_s6 + $0x4c] sm:$0xf]  ;;  %v335_v36 = vld [vmem:[%s1549_s28 + $0x50] sm:$0xf]  ;;  %v336_v37 = vld [vmem:[%s1549_s28 + $0x54] sm:$0xf] }
  0x1c   : > { %1418 = vmatmul.mubr.msk.bf16.gmra.mxu0 %vm461_vm1, %v1249_v51  ;;  %v300_v27 = vmax.bf16 %v1498_v7, %v268_v19  ;;  %v1253_v28 = vcombine.low %v361_v20, %v362_v21  ;;  %v1285_v29 = vcombine.low %v297_v22, %v298_v23  ;;  %v271_v38 = vld [vmem:[%s1555_s6 + $0x50] sm:$0xf]  ;;  %v272_v39 = vld [vmem:[%s1555_s6 + $0x54] sm:$0xf]  ;;  %v365_v40 = vmax.bf16 %v1498_v7, %v333_v31  ;;  %v337_v51 = vld [vmem:[%s1549_s28 + $0x58] sm:$0xf] }
  0x1d   : > { %1452 = vmatmul.mubr.msk.bf16.gmra.mxu1 %vm461_vm1, %v1281_v52  ;;  %1421 = vmatprep.mubr.msk.bf16.mxu0 %vm461_vm1, %v1250_v53  ;;  %v1254_v30 = vcombine.low %v363_v24, %v364_v25  ;;  %v366_v41 = vmax.bf16 %v1498_v7, %v334_v32  ;;  %v301_v42 = vmax.bf16 %v1498_v7, %v269_v33  ;;  %v338_v52 = vld [vmem:[%s1549_s28 + $0x5c] sm:$0xf]  ;;  %v273_v53 = vld [vmem:[%s1555_s6 + $0x58] sm:$0xf]  ;;  %v339_v56 = vld [vmem:[%s1549_s28 + $0x60] sm:$0xf] }
  0x1e   : > { %1455 = vmatprep.mubr.msk.bf16.mxu1 %vm461_vm1, %v1282_v57  ;;  %v1286_v34 = vcombine.low %v299_v26, %v300_v27  ;;  %v302_v43 = vmax.bf16 %v1498_v7, %v270_v35  ;;  %v367_v44 = vmax.bf16 %v1498_v7, %v335_v36  ;;  %v368_v45 = vmax.bf16 %v1498_v7, %v336_v37  ;;  %v274_v55 = vld [vmem:[%s1555_s6 + $0x5c] sm:$0xf]  ;;  %v340_v57 = vld [vmem:[%s1549_s28 + $0x64] sm:$0xf]  ;;  %v275_v58 = vld [vmem:[%s1555_s6 + $0x60] sm:$0xf] }
  0x1f   : > { %v303_v46 = vmax.bf16 %v1498_v7, %v271_v38  ;;  %v304_v47 = vmax.bf16 %v1498_v7, %v272_v39  ;;  %v1255_v48 = vcombine.low %v365_v40, %v366_v41  ;;  %v276_v59 = vld [vmem:[%s1555_s6 + $0x64] sm:$0xf]  ;;  %v369_v60 = vmax.bf16 %v1498_v7, %v337_v51  ;;  %v278_v12 = vld [vmem:[%s1555_s6 + $0x6c] sm:$0xf]  ;;  %v343_v13 = vld [vmem:[%s1549_s28 + $0x70] sm:$0xf] }
  0x20   : > { %v1287_v49 = vcombine.low %v301_v42, %v302_v43  ;;  %v1256_v50 = vcombine.low %v367_v44, %v368_v45  ;;  %v370_v61 = vmax.bf16 %v1498_v7, %v338_v52  ;;  %v305_v62 = vmax.bf16 %v1498_v7, %v273_v53  ;;  %v279_v15 = vld [vmem:[%s1555_s6 + $0x70] sm:$0xf]  ;;  %v280_v16 = vld [vmem:[%s1555_s6 + $0x74] sm:$0xf]  ;;  %v281_v31 = vld [vmem:[%s1555_s6 + $0x78] sm:$0xf] }
  0x21   : > { %v1288_v54 = vcombine.low %v303_v46, %v304_v47  ;;  %v306_v63 = vmax.bf16 %v1498_v7, %v274_v55  ;;  %v371_v0 = vmax.bf16 %v1498_v7, %v339_v56  ;;  %v372_v1 = vmax.bf16 %v1498_v7, %v340_v57  ;;  %v282_v32 = vld [vmem:[%s1555_s6 + $0x7c] sm:$0xf]  ;;  %v1720_v41 = vld [vmem:[%s1831_s4] ss:$0 sm:$0xff] }
  0x22   : > { %v307_v2 = vmax.bf16 %v1498_v7, %v275_v58  ;;  %v308_v3 = vmax.bf16 %v1498_v7, %v276_v59  ;;  %v1257_v4 = vcombine.low %v369_v60, %v370_v61  ;;  %v310_v20 = vmax.bf16 %v1498_v7, %v278_v12 }
  0x23   : > { %v1289_v5 = vcombine.low %v305_v62, %v306_v63  ;;  %v1258_v6 = vcombine.low %v371_v0, %v372_v1  ;;  %v375_v21 = vmax.bf16 %v1498_v7, %v343_v13  ;;  %v311_v23 = vmax.bf16 %v1498_v7, %v279_v15 }
  0x24   : > { %1422 = vmatmul.mubr.msk.bf16.gmra.mxu0 %vm461_vm1, %v1251_v8  ;;  %v341_v8 = vld [vmem:[%s1549_s28 + $0x68] sm:$0xf]  ;;  %v1290_v11 = vcombine.low %v307_v2, %v308_v3  ;;  %v312_v24 = vmax.bf16 %v1498_v7, %v280_v16  ;;  %v313_v35 = vmax.bf16 %v1498_v7, %v281_v31  ;;  %v314_v36 = vmax.bf16 %v1498_v7, %v282_v32 }
  0x25   : > { %1456 = vmatmul.mubr.msk.bf16.gmra.mxu1 %vm461_vm1, %v1283_v9  ;;  %1425 = vmatprep.mubr.msk.bf16.mxu0 %vm461_vm1, %v1252_v10  ;;  %v342_v9 = vld [vmem:[%s1549_s28 + $0x6c] sm:$0xf]  ;;  %v277_v10 = vld [vmem:[%s1555_s6 + $0x68] sm:$0xf]  ;;  %v373_v17 = vmax.bf16 %v1498_v7, %v341_v8 }
  0x26   : > { %1459 = vmatprep.mubr.msk.bf16.mxu1 %vm461_vm1, %v1284_v14  ;;  %v344_v14 = vld [vmem:[%s1549_s28 + $0x74] sm:$0xf]  ;;  %v374_v18 = vmax.bf16 %v1498_v7, %v342_v9  ;;  %v309_v19 = vmax.bf16 %v1498_v7, %v277_v10  ;;  %v1293_v38 = vcombine.low %v313_v35, %v314_v36 }
  0x27   : > { %v376_v22 = vmax.bf16 %v1498_v7, %v344_v14 }
  0x28   : > { %v1259_v25 = vcombine.low %v373_v17, %v374_v18  ;;  %v1291_v26 = vcombine.low %v309_v19, %v310_v20 }
  0x29   : > { %v1260_v27 = vcombine.low %v375_v21, %v376_v22 }
  0x2c   : > { %1426 = vmatmul.mubr.msk.bf16.gmra.mxu0 %vm461_vm1, %v1253_v28  ;;  %v345_v28 = vld [vmem:[%s1549_s28 + $0x78] sm:$0xf] }
  0x2d   : > { %1460 = vmatmul.mubr.msk.bf16.gmra.mxu1 %vm461_vm1, %v1285_v29  ;;  %1429 = vmatprep.mubr.msk.bf16.mxu0 %vm461_vm1, %v1254_v30  ;;  %v346_v29 = vld [vmem:[%s1549_s28 + $0x7c] sm:$0xf]  ;;  %v1292_v30 = vcombine.low %v311_v23, %v312_v24  ;;  %v377_v33 = vmax.bf16 %v1498_v7, %v345_v28 }
  0x2e   : > { %1463 = vmatprep.mubr.msk.bf16.mxu1 %vm461_vm1, %v1286_v34  ;;  %v378_v34 = vmax.bf16 %v1498_v7, %v346_v29 }
  0x30   : > { %v1261_v37 = vcombine.low %v377_v33, %v378_v34 }
  0x34   : > { %1430 = vmatmul.mubr.msk.bf16.gmra.mxu0 %vm461_vm1, %v1255_v48 }
  0x35   : > { %1464 = vmatmul.mubr.msk.bf16.gmra.mxu1 %vm461_vm1, %v1287_v49  ;;  %1433 = vmatprep.mubr.msk.bf16.mxu0 %vm461_vm1, %v1256_v50 }
  0x36   : > { %1467 = vmatprep.mubr.msk.bf16.mxu1 %vm461_vm1, %v1288_v54 }
  0x3c   : > { %1434 = vmatmul.mubr.msk.bf16.gmra.mxu0 %vm461_vm1, %v1257_v4 }
  0x3d   : > { %1468 = vmatmul.mubr.msk.bf16.gmra.mxu1 %vm461_vm1, %v1289_v5  ;;  %1437 = vmatprep.mubr.msk.bf16.mxu0 %vm461_vm1, %v1258_v6 }
  0x3e   : > { %1471 = vmatprep.mubr.msk.bf16.mxu1 %vm461_vm1, %v1290_v11 }
  0x44   : > { %1438 = vmatmul.mubr.msk.bf16.gmra.mxu0 %vm461_vm1, %v1259_v25 }
  0x45   : > { %1472 = vmatmul.mubr.msk.bf16.gmra.mxu1 %vm461_vm1, %v1291_v26  ;;  %1441 = vmatprep.mubr.msk.bf16.mxu0 %vm461_vm1, %v1260_v27 }
  0x46   : > { %1475 = vmatprep.mubr.msk.bf16.mxu1 %vm461_vm1, %v1292_v30 }
  0x4c   : > { %1442 = vmatmul.mubr.msk.bf16.gmra.mxu0 %vm461_vm1, %v1261_v37 }
  0x4d   : > { %1476 = vmatmul.mubr.msk.bf16.gmra.mxu1 %vm461_vm1, %v1293_v38 }
  0xd4   : > { %v1415_v39 = vpop.f32.mrf.mxu0 }
  0xd5   : > { %v1449_v40 = vpop.f32.mrf.mxu1 }
  0xd6   : > { %v849_v42 = vadd.f32 %v1449_v40, %v1415_v39  ;;  %v548_v43 = vpop.f32.mrf.mxu0 }
  0xd7   : > { %v840_v44 = vpop.f32.mrf.mxu1 }
  0xd8   : > { %v976_v7 = vmul.f32 %v1720_v41, %v849_v42  ;;  %v841_v45 = vadd.f32 %v840_v44, %v548_v43  ;;  %v1416_v46 = vpop.f32.mrf.mxu0 }
  0xd9   : > { %v1450_v47 = vpop.f32.mrf.mxu1 }
  0xda   : > { %v1347_v48 = vpack.c.bf16 %v976_v7, %v976_v7  ;;  %v974_v49 = vmul.f32 %v1720_v41, %v841_v45  ;;  %v852_v50 = vadd.f32 %v1450_v47, %v1416_v46  ;;  %v551_v51 = vpop.f32.mrf.mxu0 }
  0xdb   : > { %v843_v52 = vpop.f32.mrf.mxu1 }
  0xdc   : > { %1137 = vst.msk [vmem:[%s1727_s11 + $0x8] sm:$0xf] %vm1134_vm2, %v1347_v48  ;;  %v1345_v53 = vpack.c.bf16 %v974_v49, %v974_v49  ;;  %v977_v54 = vmul.f32 %v1720_v41, %v852_v50  ;;  %v844_v55 = vadd.f32 %v843_v52, %v551_v51  ;;  %v1419_v56 = vpop.f32.mrf.mxu0 }
  0xdd   : > { %v1453_v57 = vpop.f32.mrf.mxu1 }
  0xde   : > { %1135 = vst.msk [vmem:[%s1727_s11] sm:$0xf] %vm1134_vm2, %v1345_v53  ;;  %v1348_v58 = vpack.c.bf16 %v977_v54, %v977_v54  ;;  %v975_v59 = vmul.f32 %v1720_v41, %v844_v55  ;;  %v865_v60 = vadd.f32 %v1453_v57, %v1419_v56  ;;  %v564_v61 = vpop.f32.mrf.mxu0 }
  0xdf   : > { %v856_v62 = vpop.f32.mrf.mxu1 }
  0xe0   : > { %1138 = vst.msk [vmem:[%s1727_s11 + $0xc] sm:$0xf] %vm1134_vm2, %v1348_v58  ;;  %v1346_v63 = vpack.c.bf16 %v975_v59, %v975_v59  ;;  %v980_v0 = vmul.f32 %v1720_v41, %v865_v60  ;;  %v857_v1 = vadd.f32 %v856_v62, %v564_v61  ;;  %v1420_v2 = vpop.f32.mrf.mxu0 }
  0xe1   : > { %v1454_v3 = vpop.f32.mrf.mxu1 }
  0xe2   : > { %1136 = vst.msk [vmem:[%s1727_s11 + $0x4] sm:$0xf] %vm1134_vm2, %v1346_v63  ;;  %v1351_v4 = vpack.c.bf16 %v980_v0, %v980_v0  ;;  %v978_v5 = vmul.f32 %v1720_v41, %v857_v1  ;;  %v868_v6 = vadd.f32 %v1454_v3, %v1420_v2  ;;  %v567_v8 = vpop.f32.mrf.mxu0 }
  0xe3   : > { %v859_v9 = vpop.f32.mrf.mxu1 }
  0xe4   : > { %1141 = vst.msk [vmem:[%s1727_s11 + $0x18] sm:$0xf] %vm1134_vm2, %v1351_v4  ;;  %v1349_v10 = vpack.c.bf16 %v978_v5, %v978_v5  ;;  %v981_v11 = vmul.f32 %v1720_v41, %v868_v6  ;;  %v860_v12 = vadd.f32 %v859_v9, %v567_v8  ;;  %v1423_v13 = vpop.f32.mrf.mxu0 }
  0xe5   : > { %v1457_v14 = vpop.f32.mrf.mxu1 }
  0xe6   : > { %1139 = vst.msk [vmem:[%s1727_s11 + $0x10] sm:$0xf] %vm1134_vm2, %v1349_v10  ;;  %v1352_v15 = vpack.c.bf16 %v981_v11, %v981_v11  ;;  %v979_v16 = vmul.f32 %v1720_v41, %v860_v12  ;;  %v881_v17 = vadd.f32 %v1457_v14, %v1423_v13  ;;  %v580_v18 = vpop.f32.mrf.mxu0 }
  0xe7   : > { %v872_v19 = vpop.f32.mrf.mxu1 }
  0xe8   : > { %1142 = vst.msk [vmem:[%s1727_s11 + $0x1c] sm:$0xf] %vm1134_vm2, %v1352_v15  ;;  %v1350_v20 = vpack.c.bf16 %v979_v16, %v979_v16  ;;  %v984_v21 = vmul.f32 %v1720_v41, %v881_v17  ;;  %v873_v22 = vadd.f32 %v872_v19, %v580_v18  ;;  %v1424_v23 = vpop.f32.mrf.mxu0 }
  0xe9   : > { %v1458_v24 = vpop.f32.mrf.mxu1 }
  0xea   : > { %1140 = vst.msk [vmem:[%s1727_s11 + $0x14] sm:$0xf] %vm1134_vm2, %v1350_v20  ;;  %v1355_v25 = vpack.c.bf16 %v984_v21, %v984_v21  ;;  %v982_v26 = vmul.f32 %v1720_v41, %v873_v22  ;;  %v884_v27 = vadd.f32 %v1458_v24, %v1424_v23  ;;  %v583_v28 = vpop.f32.mrf.mxu0 }
  0xeb   : > { %v875_v29 = vpop.f32.mrf.mxu1 }
  0xec   : > { %1145 = vst.msk [vmem:[%s1727_s11 + $0x28] sm:$0xf] %vm1134_vm2, %v1355_v25  ;;  %v1353_v30 = vpack.c.bf16 %v982_v26, %v982_v26  ;;  %v985_v31 = vmul.f32 %v1720_v41, %v884_v27  ;;  %v876_v32 = vadd.f32 %v875_v29, %v583_v28  ;;  %v1427_v33 = vpop.f32.mrf.mxu0 }
  0xed   : > { %v1461_v34 = vpop.f32.mrf.mxu1 }
  0xee   : > { %1143 = vst.msk [vmem:[%s1727_s11 + $0x20] sm:$0xf] %vm1134_vm2, %v1353_v30  ;;  %v1356_v35 = vpack.c.bf16 %v985_v31, %v985_v31  ;;  %v983_v36 = vmul.f32 %v1720_v41, %v876_v32  ;;  %v897_v37 = vadd.f32 %v1461_v34, %v1427_v33  ;;  %v596_v38 = vpop.f32.mrf.mxu0 }
  0xef   : > { %v888_v39 = vpop.f32.mrf.mxu1 }
  0xf0   : > { %1146 = vst.msk [vmem:[%s1727_s11 + $0x2c] sm:$0xf] %vm1134_vm2, %v1356_v35  ;;  %v1354_v40 = vpack.c.bf16 %v983_v36, %v983_v36  ;;  %v988_v42 = vmul.f32 %v1720_v41, %v897_v37  ;;  %v889_v43 = vadd.f32 %v888_v39, %v596_v38  ;;  %v1428_v44 = vpop.f32.mrf.mxu0 }
  0xf1   : > { %v1462_v7 = vpop.f32.mrf.mxu1 }
  0xf2   : > { %1144 = vst.msk [vmem:[%s1727_s11 + $0x24] sm:$0xf] %vm1134_vm2, %v1354_v40  ;;  %v1359_v45 = vpack.c.bf16 %v988_v42, %v988_v42  ;;  %v986_v46 = vmul.f32 %v1720_v41, %v889_v43  ;;  %v900_v47 = vadd.f32 %v1462_v7, %v1428_v44  ;;  %v599_v48 = vpop.f32.mrf.mxu0 }
  0xf3   : > { %v891_v49 = vpop.f32.mrf.mxu1 }
  0xf4   : > { %1149 = vst.msk [vmem:[%s1727_s11 + $0x38] sm:$0xf] %vm1134_vm2, %v1359_v45  ;;  %v1357_v50 = vpack.c.bf16 %v986_v46, %v986_v46  ;;  %v989_v51 = vmul.f32 %v1720_v41, %v900_v47  ;;  %v892_v52 = vadd.f32 %v891_v49, %v599_v48  ;;  %v1431_v53 = vpop.f32.mrf.mxu0 }
  0xf5   : > { %v1465_v54 = vpop.f32.mrf.mxu1 }
  0xf6   : > { %1147 = vst.msk [vmem:[%s1727_s11 + $0x30] sm:$0xf] %vm1134_vm2, %v1357_v50  ;;  %v1360_v55 = vpack.c.bf16 %v989_v51, %v989_v51  ;;  %v987_v56 = vmul.f32 %v1720_v41, %v892_v52  ;;  %v913_v57 = vadd.f32 %v1465_v54, %v1431_v53  ;;  %v612_v58 = vpop.f32.mrf.mxu0 }
  0xf7   : > { %v904_v59 = vpop.f32.mrf.mxu1 }
  0xf8   : > { %1150 = vst.msk [vmem:[%s1727_s11 + $0x3c] sm:$0xf] %vm1134_vm2, %v1360_v55  ;;  %v1358_v60 = vpack.c.bf16 %v987_v56, %v987_v56  ;;  %v992_v61 = vmul.f32 %v1720_v41, %v913_v57  ;;  %v905_v62 = vadd.f32 %v904_v59, %v612_v58  ;;  %v1432_v63 = vpop.f32.mrf.mxu0 }
  0xf9   : > { %v1466_v0 = vpop.f32.mrf.mxu1 }
  0xfa   : > { %1148 = vst.msk [vmem:[%s1727_s11 + $0x34] sm:$0xf] %vm1134_vm2, %v1358_v60  ;;  %v1363_v1 = vpack.c.bf16 %v992_v61, %v992_v61  ;;  %v990_v2 = vmul.f32 %v1720_v41, %v905_v62  ;;  %v916_v3 = vadd.f32 %v1466_v0, %v1432_v63  ;;  %v615_v4 = vpop.f32.mrf.mxu0 }
  0xfb   : > { %v907_v5 = vpop.f32.mrf.mxu1 }
  0xfc   : > { %1153 = vst.msk [vmem:[%s1727_s11 + $0x48] sm:$0xf] %vm1134_vm2, %v1363_v1  ;;  %v1361_v6 = vpack.c.bf16 %v990_v2, %v990_v2  ;;  %v993_v8 = vmul.f32 %v1720_v41, %v916_v3  ;;  %v908_v9 = vadd.f32 %v907_v5, %v615_v4  ;;  %v1435_v10 = vpop.f32.mrf.mxu0 }
  0xfd   : > { %v1469_v11 = vpop.f32.mrf.mxu1 }
  0xfe   : > { %1151 = vst.msk [vmem:[%s1727_s11 + $0x40] sm:$0xf] %vm1134_vm2, %v1361_v6  ;;  %v1364_v12 = vpack.c.bf16 %v993_v8, %v993_v8  ;;  %v991_v13 = vmul.f32 %v1720_v41, %v908_v9  ;;  %v929_v14 = vadd.f32 %v1469_v11, %v1435_v10  ;;  %v628_v15 = vpop.f32.mrf.mxu0 }
  0xff   : > { %v920_v16 = vpop.f32.mrf.mxu1 }
 0x100   : > { %1154 = vst.msk [vmem:[%s1727_s11 + $0x4c] sm:$0xf] %vm1134_vm2, %v1364_v12  ;;  %v1362_v17 = vpack.c.bf16 %v991_v13, %v991_v13  ;;  %v996_v18 = vmul.f32 %v1720_v41, %v929_v14  ;;  %v921_v19 = vadd.f32 %v920_v16, %v628_v15  ;;  %v1436_v20 = vpop.f32.mrf.mxu0 }
 0x101   : > { %v1470_v21 = vpop.f32.mrf.mxu1 }
 0x102   : > { %1152 = vst.msk [vmem:[%s1727_s11 + $0x44] sm:$0xf] %vm1134_vm2, %v1362_v17  ;;  %v1367_v22 = vpack.c.bf16 %v996_v18, %v996_v18  ;;  %v994_v23 = vmul.f32 %v1720_v41, %v921_v19  ;;  %v932_v24 = vadd.f32 %v1470_v21, %v1436_v20  ;;  %v631_v25 = vpop.f32.mrf.mxu0 }
 0x103   : > { %v923_v26 = vpop.f32.mrf.mxu1 }
 0x104   : > { %1157 = vst.msk [vmem:[%s1727_s11 + $0x58] sm:$0xf] %vm1134_vm2, %v1367_v22  ;;  %v1365_v27 = vpack.c.bf16 %v994_v23, %v994_v23  ;;  %v997_v28 = vmul.f32 %v1720_v41, %v932_v24  ;;  %v924_v29 = vadd.f32 %v923_v26, %v631_v25  ;;  %v1439_v30 = vpop.f32.mrf.mxu0 }
 0x105   : > { %v1473_v31 = vpop.f32.mrf.mxu1 }
 0x106   : > { %1155 = vst.msk [vmem:[%s1727_s11 + $0x50] sm:$0xf] %vm1134_vm2, %v1365_v27  ;;  %v1368_v32 = vpack.c.bf16 %v997_v28, %v997_v28  ;;  %v995_v33 = vmul.f32 %v1720_v41, %v924_v29  ;;  %v945_v34 = vadd.f32 %v1473_v31, %v1439_v30  ;;  %v644_v35 = vpop.f32.mrf.mxu0 }
 0x107   : > { %v936_v36 = vpop.f32.mrf.mxu1 }
 0x108   : > { %1158 = vst.msk [vmem:[%s1727_s11 + $0x5c] sm:$0xf] %vm1134_vm2, %v1368_v32  ;;  %v1366_v37 = vpack.c.bf16 %v995_v33, %v995_v33  ;;  %v1000_v38 = vmul.f32 %v1720_v41, %v945_v34  ;;  %v937_v39 = vadd.f32 %v936_v36, %v644_v35  ;;  %v1440_v40 = vpop.f32.mrf.mxu0 }
 0x109   : > { %v1474_v42 = vpop.f32.mrf.mxu1 }
 0x10a   : > { %1156 = vst.msk [vmem:[%s1727_s11 + $0x54] sm:$0xf] %vm1134_vm2, %v1366_v37  ;;  %v1371_v43 = vpack.c.bf16 %v1000_v38, %v1000_v38  ;;  %v998_v44 = vmul.f32 %v1720_v41, %v937_v39  ;;  %v948_v7 = vadd.f32 %v1474_v42, %v1440_v40  ;;  %v647_v45 = vpop.f32.mrf.mxu0 }
 0x10b   : > { %v939_v46 = vpop.f32.mrf.mxu1 }
 0x10c   : > { %1161 = vst.msk [vmem:[%s1727_s11 + $0x68] sm:$0xf] %vm1134_vm2, %v1371_v43  ;;  %v1369_v47 = vpack.c.bf16 %v998_v44, %v998_v44  ;;  %v1001_v48 = vmul.f32 %v1720_v41, %v948_v7  ;;  %v940_v49 = vadd.f32 %v939_v46, %v647_v45  ;;  %v1443_v50 = vpop.f32.mrf.mxu0 }
 0x10d   : > { %v1477_v51 = vpop.f32.mrf.mxu1 }
 0x10e   : > { %1159 = vst.msk [vmem:[%s1727_s11 + $0x60] sm:$0xf] %vm1134_vm2, %v1369_v47  ;;  %v1372_v52 = vpack.c.bf16 %v1001_v48, %v1001_v48  ;;  %v999_v53 = vmul.f32 %v1720_v41, %v940_v49  ;;  %v961_v54 = vadd.f32 %v1477_v51, %v1443_v50  ;;  %v660_v55 = vpop.f32.mrf.mxu0 }
 0x10f   : > { %v952_v56 = vpop.f32.mrf.mxu1 }
 0x110   : > { %1162 = vst.msk [vmem:[%s1727_s11 + $0x6c] sm:$0xf] %vm1134_vm2, %v1372_v52  ;;  %v1370_v57 = vpack.c.bf16 %v999_v53, %v999_v53  ;;  %v1004_v58 = vmul.f32 %v1720_v41, %v961_v54  ;;  %v953_v59 = vadd.f32 %v952_v56, %v660_v55  ;;  %v1444_v60 = vpop.f32.mrf.mxu0 }
 0x111   : > { %v1478_v61 = vpop.f32.mrf.mxu1 }
 0x112   : > { %1160 = vst.msk [vmem:[%s1727_s11 + $0x64] sm:$0xf] %vm1134_vm2, %v1370_v57  ;;  %v1375_v62 = vpack.c.bf16 %v1004_v58, %v1004_v58  ;;  %v1002_v63 = vmul.f32 %v1720_v41, %v953_v59  ;;  %v964_v0 = vadd.f32 %v1478_v61, %v1444_v60  ;;  %v663_v1 = vpop.f32.mrf.mxu0 }
 0x113   : > { %v955_v2 = vpop.f32.mrf.mxu1 }
 0x114   : > { %1165 = vst.msk [vmem:[%s1727_s11 + $0x78] sm:$0xf] %vm1134_vm2, %v1375_v62  ;;  %v1373_v3 = vpack.c.bf16 %v1002_v63, %v1002_v63  ;;  %v1005_v4 = vmul.f32 %v1720_v41, %v964_v0  ;;  %v956_v5 = vadd.f32 %v955_v2, %v663_v1 }
 0x116   : > { %1163 = vst.msk [vmem:[%s1727_s11 + $0x70] sm:$0xf] %vm1134_vm2, %v1373_v3  ;;  %v1376_v6 = vpack.c.bf16 %v1005_v4, %v1005_v4  ;;  %v1003_v8 = vmul.f32 %v1720_v41, %v956_v5 }
 0x118   : > { %1166 = vst.msk [vmem:[%s1727_s11 + $0x7c] sm:$0xf] %vm1134_vm2, %v1376_v6  ;;  %v1374_v9 = vpack.c.bf16 %v1003_v8, %v1003_v8 }
 0x11a   : > { %1164 = vst.msk [vmem:[%s1727_s11 + $0x74] sm:$0xf] %vm1134_vm2, %v1374_v9 }
 0x11b PF: > { %s15_s18 = sadd.s32 1, %s1496_s18  }
 0x11c   : > { %p12_p4 = scmp.ge.s32.totalorder %s15_s18, 4  }
 0x11e   :  { %14 = sbr.rel (!%p12_p4) target bundleno = 1 (0x1), region = 73 }

</bundles_post_ra>
